<compile_context>
chip_gen: v6e
topology: v6e:2x2x1
jax: 0.10.0
libtpu: 0.0.40
codegen_flags: <defaults>
</compile_context>

<pallas_src>
import functools

import jax
import jax.numpy as jnp
from jax import lax
from jax.experimental import pallas as pl
from jax.experimental.pallas import tpu as pltpu


# Per-buffer (single-block, lane-padded) VMEM budget for the input.  The
# pipeline double-buffers it (~2x), which together with the small output and
# accumulator buffers stays far below the requested 48 MiB scoped VMEM limit.
_DEFAULT_BLOCK_BUDGET_BYTES = 8 * 1024 * 1024
_VMEM_LIMIT_BYTES = 48 * 1024 * 1024


def _round_up(x, m):
    return (x + m - 1) // m * m


def _avg_pool_kernel(x_ref, o_ref, acc_ref, *, inv_hw, hw_total, hw_tile,
                     mask_tail):
    """Accumulate per-(n, c) sums over HW chunks; finalize with * 1/(H*W)."""
    k = pl.program_id(1)

    @pl.when(k == 0)
    def _():
        acc_ref[...] = jnp.zeros_like(acc_ref)

    x = x_ref[...].astype(jnp.float32)
    if mask_tail:
        # Only emitted when hw_tile does not divide H*W: the final HW block is
        # partial and its out-of-range lanes hold undefined VMEM data, so zero
        # them before the reduce (the mask is all-true on non-final blocks).
        lane = lax.broadcasted_iota(jnp.int32, x.shape, 2)
        x = jnp.where(lane < (hw_total - k * hw_tile), x, 0.0)

    # Cross-lane sum (XLU); free slack in this HBM-bandwidth-bound kernel.
    acc_ref[...] += jnp.sum(x, axis=-1)

    @pl.when(k == pl.num_programs(1) - 1)
    def _():
        o_ref[...] = (acc_ref[...] * inv_hw).astype(o_ref.dtype)


def _pick_hw_tile(C, HW, itemsize, budget):
    """Full HW when a (1, C, HW) lane-padded block fits; else a 128-multiple chunk."""
    row_bytes = _round_up(C, 8) * itemsize          # bytes per padded lane
    if HW <= 128 or row_bytes * _round_up(HW, 128) <= budget:
        return HW                                    # typical case: HW = 49
    lanes = max(128, (budget // row_bytes) // 128 * 128)
    return min(lanes, _round_up(HW, 128))


def _pick_n_tile(N, per_n_bytes, budget):
    max_fit = max(1, budget // per_n_bytes)
    fits = [d for d in range(1, N + 1) if N % d == 0 and d <= max_fit]

    def rank(d):
        # Prefer sublane-aligned (or full-N) output blocks, then keeping >= 2
        # grid steps on N (v7x megacore sharding comes from N, never from C),
        # then the largest tile (fewest grid steps; ~0.35 us per step).
        aligned = (d % 8 == 0) or (d == N)
        keeps_two_steps = (N // d) >= 2
        return (aligned, keeps_two_steps, d)

    return max(fits, key=rank)


@functools.partial(jax.jit, static_argnames=("block_budget_bytes",))
def _average_pooling(x, *, block_budget_bytes):
    N, C, H, W = x.shape
    HW = H * W
    itemsize = jnp.dtype(x.dtype).itemsize

    # Free, contiguous reshape: whole spatial extent on the lane axis.
    x3 = x.reshape(N, C, HW)

    hw_tile = _pick_hw_tile(C, HW, itemsize, block_budget_bytes)
    per_n_bytes = _round_up(C, 8) * _round_up(hw_tile, 128) * itemsize
    n_tile = _pick_n_tile(N, per_n_bytes, block_budget_bytes)

    hw_steps = pl.cdiv(HW, hw_tile)
    grid = (N // n_tile, hw_steps)
    mask_tail = (HW % hw_tile) != 0
    inv_hw = 1.0 / float(HW)

    kernel = functools.partial(
        _avg_pool_kernel,
        inv_hw=inv_hw,
        hw_total=HW,
        hw_tile=hw_tile,
        mask_tail=mask_tail,
    )

    return pl.pallas_call(
        kernel,
        out_shape=jax.ShapeDtypeStruct((N, C), x.dtype),
        grid_spec=pltpu.PrefetchScalarGridSpec(
            num_scalar_prefetch=0,
            grid=grid,
            in_specs=[
                # (n_tile, C, hw_tile): C is the full channel dim and hw_tile
                # is either the full HW or a multiple of 128, so the (8, 128)
                # block constraint holds on the last two dims.
                pl.BlockSpec((n_tile, C, hw_tile), lambda i, k: (i, 0, k)),
            ],
            # Output block resident across the HW reduction axis (index ignores k).
            out_specs=pl.BlockSpec((n_tile, C), lambda i, k: (i, 0)),
            scratch_shapes=[pltpu.VMEM((n_tile, C), jnp.float32)],
        ),
        compiler_params=pltpu.CompilerParams(
            dimension_semantics=("parallel", "arbitrary"),
            vmem_limit_bytes=_VMEM_LIMIT_BYTES,
        ),
        cost_estimate=pl.CostEstimate(
            flops=N * C * HW,
            transcendentals=0,
            bytes_accessed=N * C * HW * itemsize + N * C * itemsize,
        ),
    )(x3)


def average_pooling(x, block_budget_bytes=_DEFAULT_BLOCK_BUDGET_BYTES):
    """AdaptiveAvgPool2d((1,1)) + flatten(1) for NCHW input: (N,C,H,W) -> (N,C)."""
    return _average_pooling(x, block_budget_bytes=block_budget_bytes)


class AveragePooling:
    """JAX/Pallas port of domainbed.networks.Average_Pooling.

    The module holds no learnable parameters; `channel` only records the
    expected featurizer width (512 for resnet18, else 2048).
    """

    def __init__(self, hparams):
        self.hparams = hparams
        self.channel = 512 if self.hparams["resnet18"] else 2048

    def __call__(self, x):
        return average_pooling(x)


if __name__ == "__main__":
    hparams = {"resnet18": True}   # -> channel = 512
    model = AveragePooling(hparams)

    # Small, deterministic input consistent with a resnet18 feature map.
    N, C, H, W = 2, model.channel, 7, 7
    key = jax.random.PRNGKey(0)
    x = jax.random.normal(key, (N, C, H, W), dtype=jnp.float32)

    out = jax.block_until_ready(model(x))
    ref = jnp.mean(x, axis=(2, 3))
    assert out.shape == (N, C), out.shape
    assert jnp.allclose(out, ref, atol=1e-5, rtol=1e-5)

    # Also exercise the chunked-HW (reduction axis + masked tail) path by
    # shrinking the VMEM block budget, covering large-feature-map shapes.
    x2 = jax.random.normal(jax.random.PRNGKey(0), (1, 8, 40, 40),
                           dtype=jnp.float32)
    out2 = jax.block_until_ready(
        average_pooling(x2, block_budget_bytes=16 * 1024))
    ref2 = jnp.mean(x2, axis=(2, 3))
    assert out2.shape == (1, 8), out2.shape
    assert jnp.allclose(out2, ref2, atol=1e-5, rtol=1e-5)

    print("KERNEL_OK")
</pallas_src>

<mosaic_0001>
module attributes {stable_mosaic.version = 11 : i64} {
  func.func @_avg_pool_kernel(%arg0: i32, %arg1: i32, %arg2: memref<2x512x49xf32, #tpu.memory_space<vmem>>, %arg3: memref<2x512xf32, #tpu.memory_space<vmem>>, %arg4: memref<2x512xf32, #tpu.memory_space<vmem>>) attributes {dimension_semantics = [#tpu.dimension_semantics<parallel>, #tpu.dimension_semantics<arbitrary>], iteration_bounds = array<i64: 1, 1>, scalar_prefetch = 0 : i64, scratch_operands = 1 : i64, tpu.core_type = #tpu.core_type<tc>, window_params = [{transform_indices = @transform_0, window_bounds = array<i64: 2, 512, 49>}, {transform_indices = @transform_1, window_bounds = array<i64: 2, 512>}]} {
    %c0_i32 = arith.constant 0 : i32
    %0 = arith.cmpi eq, %arg1, %c0_i32 : i32
    %1 = arith.extui %0 : i1 to i32
    %c0_i32_0 = arith.constant 0 : i32
    %2 = arith.cmpi ne, %1, %c0_i32_0 : i32
    scf.if %2 {
      %cst_9 = arith.constant 0.000000e+00 : f32
      %11 = vector.broadcast %cst_9 : f32 to vector<2x512xf32>
      %c0_10 = arith.constant 0 : index
      %c0_11 = arith.constant 0 : index
      %12 = vector.load %arg4[%c0_10, %c0_11] : memref<2x512xf32, #tpu.memory_space<vmem>>, vector<2x512xf32>
      tpu.vector_store %arg4[%c0_10, %c0_11], %11 {strides = array<i32>} : memref<2x512xf32, #tpu.memory_space<vmem>>, vector<2x512xf32>,
    } else {
    }
    %c0 = arith.constant 0 : index
    %c0_1 = arith.constant 0 : index
    %c0_2 = arith.constant 0 : index
    %3 = vector.load %arg2[%c0, %c0_1, %c0_2] : memref<2x512x49xf32, #tpu.memory_space<vmem>>, vector<2x512x49xf32>
    %c0_3 = arith.constant 0 : index
    %c0_4 = arith.constant 0 : index
    %4 = vector.load %arg4[%c0_3, %c0_4] : memref<2x512xf32, #tpu.memory_space<vmem>>, vector<2x512xf32>
    %cst = arith.constant dense<0.000000e+00> : vector<2x512xf32>
    %5 = vector.multi_reduction <add>, %3, %cst [2] : vector<2x512x49xf32> to vector<2x512xf32>
    %6 = arith.addf %4, %5 : vector<2x512xf32>
    %c0_5 = arith.constant 0 : index
    %c0_6 = arith.constant 0 : index
    %7 = vector.load %arg4[%c0_5, %c0_6] : memref<2x512xf32, #tpu.memory_space<vmem>>, vector<2x512xf32>
    tpu.vector_store %arg4[%c0_5, %c0_6], %6 {strides = array<i32>} : memref<2x512xf32, #tpu.memory_space<vmem>>, vector<2x512xf32>,
    %c0_i32_7 = arith.constant 0 : i32
    %8 = arith.cmpi eq, %arg1, %c0_i32_7 : i32
    %9 = arith.extui %8 : i1 to i32
    %c0_i32_8 = arith.constant 0 : i32
    %10 = arith.cmpi ne, %9, %c0_i32_8 : i32
    scf.if %10 {
      %c0_9 = arith.constant 0 : index
      %c0_10 = arith.constant 0 : index
      %11 = vector.load %arg4[%c0_9, %c0_10] : memref<2x512xf32, #tpu.memory_space<vmem>>, vector<2x512xf32>
      %cst_11 = arith.constant 0.0204081628 : f32
      %12 = vector.broadcast %cst_11 : f32 to vector<2x512xf32>
      %13 = arith.mulf %11, %12 : vector<2x512xf32>
      %c0_12 = arith.constant 0 : index
      %c0_13 = arith.constant 0 : index
      %14 = vector.load %arg3[%c0_12, %c0_13] : memref<2x512xf32, #tpu.memory_space<vmem>>, vector<2x512xf32>
      tpu.vector_store %arg3[%c0_12, %c0_13], %13 {strides = array<i32>} : memref<2x512xf32, #tpu.memory_space<vmem>>, vector<2x512xf32>,
    } else {
    }
    return
  }
  func.func @transform_0(%arg0: i32, %arg1: i32) -> (i32, i32, i32) {
    %c0_i32 = arith.constant 0 : i32
    %c0_i32_0 = arith.constant 0 : i32
    return %arg0, %c0_i32, %arg1 : i32, i32, i32
  }
  func.func @transform_1(%arg0: i32, %arg1: i32) -> (i32, i32) {
    %c0_i32 = arith.constant 0 : i32
    %c0_i32_0 = arith.constant 0 : i32
    return %arg0, %c0_i32 : i32, i32
  }
}

</mosaic_0001>

<bundles_post_ra>
// kernel: _average_pooling.1
= control target key start
LH: loop header
LB: loop body
LE: loop exit
PB: predicated region body
PF: predicated region fallthrough
CT: control target
= control target key end

     0   :  { %vm143_vm0 = vcmask 400384   ;;  %s10973_s0 = inlined_call_operand.vmem [shape: f32[2,512,49], index: 0, kind: input, shape index: {}]   ;;  %s10974_s1 = inlined_call_operand.hbm [shape: f32[2,512], index: 1, kind: output, shape index: {}]  }
   0x1   :  { %v16_v0 = vld [vmem:[%s10973_s0 + $0x10] sm:$0xff]  ;;  %v14_v1 = vld [vmem:[%s10973_s0] sm:$0xff]  ;;  %v17_v2 = vld [vmem:[%s10973_s0 + $0x18] sm:$0xff] }
   0x2   :  { %v150_v3 = vsel %vm143_vm0, %v16_v0, 0.0  ;;  %v144_v4 = vsel %vm143_vm0, %v14_v1, 0.0  ;;  %v15_v5 = vld [vmem:[%s10973_s0 + $0x8] sm:$0xff]  ;;  %v153_v6 = vsel %vm143_vm0, %v17_v2, 0.0  ;;  %v18_v9 = vld [vmem:[%s10973_s0 + $0x20] sm:$0xff]  ;;  %v21_v12 = vld [vmem:[%s10973_s0 + $0x38] sm:$0xff] }
   0x3   :  { %151 = vadd.xlane.f32.xlu1 %v150_v3  ;;  %145 = vadd.xlane.f32.xlu0 %v144_v4  ;;  %v147_v7 = vsel %vm143_vm0, %v15_v5, 0.0  ;;  %v19_v8 = vld [vmem:[%s10973_s0 + $0x28] sm:$0xff]  ;;  %v156_v11 = vsel %vm143_vm0, %v18_v9, 0.0  ;;  %v20_v13 = vld [vmem:[%s10973_s0 + $0x30] sm:$0xff]  ;;  %v165_v14 = vsel %vm143_vm0, %v21_v12, 0.0  ;;  %v22_v17 = vld [vmem:[%s10973_s0 + $0x40] sm:$0xff] }
   0x4   :  { %v159_v10 = vsel %vm143_vm0, %v19_v8, 0.0  ;;  %v162_v15 = vsel %vm143_vm0, %v20_v13, 0.0  ;;  %v23_v16 = vld [vmem:[%s10973_s0 + $0x48] sm:$0xff]  ;;  %v168_v19 = vsel %vm143_vm0, %v22_v17, 0.0  ;;  %v25_v20 = vld [vmem:[%s10973_s0 + $0x58] sm:$0xff]  ;;  %v24_v21 = vld [vmem:[%s10973_s0 + $0x50] sm:$0xff] }
   0x5   :  { %v171_v18 = vsel %vm143_vm0, %v23_v16, 0.0  ;;  %v177_v22 = vsel %vm143_vm0, %v25_v20, 0.0  ;;  %v174_v23 = vsel %vm143_vm0, %v24_v21, 0.0  ;;  %v27_v24 = vld [vmem:[%s10973_s0 + $0x68] sm:$0xff]  ;;  %v26_v25 = vld [vmem:[%s10973_s0 + $0x60] sm:$0xff]  ;;  %v29_v28 = vld [vmem:[%s10973_s0 + $0x78] sm:$0xff] }
   0x6   :  { %v183_v26 = vsel %vm143_vm0, %v27_v24, 0.0  ;;  %v180_v27 = vsel %vm143_vm0, %v26_v25, 0.0  ;;  %v28_v29 = vld [vmem:[%s10973_s0 + $0x70] sm:$0xff]  ;;  %v189_v30 = vsel %vm143_vm0, %v29_v28, 0.0  ;;  %v31_v32 = vld [vmem:[%s10973_s0 + $0x88] sm:$0xff]  ;;  %v30_v33 = vld [vmem:[%s10973_s0 + $0x80] sm:$0xff] }
   0x7   :  { %154 = vadd.xlane.f32.xlu1 %v153_v6  ;;  %148 = vadd.xlane.f32.xlu0 %v147_v7  ;;  %v186_v31 = vsel %vm143_vm0, %v28_v29, 0.0 }
   0xb   :  { %160 = vadd.xlane.f32.xlu1 %v159_v10  ;;  %157 = vadd.xlane.f32.xlu0 %v156_v11 }
   0xf   :  { %166 = vadd.xlane.f32.xlu1 %v165_v14  ;;  %163 = vadd.xlane.f32.xlu0 %v162_v15 }
  0x13   :  { %172 = vadd.xlane.f32.xlu1 %v171_v18  ;;  %169 = vadd.xlane.f32.xlu0 %v168_v19 }
  0x17   :  { %178 = vadd.xlane.f32.xlu1 %v177_v22  ;;  %175 = vadd.xlane.f32.xlu0 %v174_v23 }
  0x1b   :  { %184 = vadd.xlane.f32.xlu1 %v183_v26  ;;  %181 = vadd.xlane.f32.xlu0 %v180_v27 }
  0x1c   :  { %6 = vsyncpa [#allocation4], 0  ;;  %v195_v34 = vsel %vm143_vm0, %v31_v32, 0.0  ;;  %v192_v35 = vsel %vm143_vm0, %v30_v33, 0.0  ;;  %v33_v36 = vld [vmem:[%s10973_s0 + $0x98] sm:$0xff]  ;;  %v32_v37 = vld [vmem:[%s10973_s0 + $0x90] sm:$0xff] }
  0x1d   :  { %v201_v38 = vsel %vm143_vm0, %v33_v36, 0.0  ;;  %v198_v39 = vsel %vm143_vm0, %v32_v37, 0.0  ;;  %v35_v40 = vld [vmem:[%s10973_s0 + $0xa8] sm:$0xff]  ;;  %v34_v41 = vld [vmem:[%s10973_s0 + $0xa0] sm:$0xff]  ;;  %v37_v44 = vld [vmem:[%s10973_s0 + $0xb8] sm:$0xff]  ;;  %vm6811_vm1 = vcmask 130112  }
  0x1e   :  { %v207_v42 = vsel %vm143_vm0, %v35_v40, 0.0  ;;  %v204_v43 = vsel %vm143_vm0, %v34_v41, 0.0  ;;  %v36_v45 = vld [vmem:[%s10973_s0 + $0xb0] sm:$0xff]  ;;  %v213_v46 = vsel %vm143_vm0, %v37_v44, 0.0  ;;  %v39_v48 = vld [vmem:[%s10973_s0 + $0xc8] sm:$0xff]  ;;  %v38_v49 = vld [vmem:[%s10973_s0 + $0xc0] sm:$0xff] }
  0x1f   :  { %190 = vadd.xlane.f32.xlu1 %v189_v30  ;;  %187 = vadd.xlane.f32.xlu0 %v186_v31  ;;  %v210_v47 = vsel %vm143_vm0, %v36_v45, 0.0  ;;  %v219_v50 = vsel %vm143_vm0, %v39_v48, 0.0  ;;  %v216_v51 = vsel %vm143_vm0, %v38_v49, 0.0  ;;  %v41_v52 = vld [vmem:[%s10973_s0 + $0xd8] sm:$0xff]  ;;  %v40_v53 = vld [vmem:[%s10973_s0 + $0xd0] sm:$0xff]  ;;  %v43_v56 = vld [vmem:[%s10973_s0 + $0xe8] sm:$0xff] }
  0x20   :  { %v225_v54 = vsel %vm143_vm0, %v41_v52, 0.0  ;;  %v222_v55 = vsel %vm143_vm0, %v40_v53, 0.0  ;;  %v42_v57 = vld [vmem:[%s10973_s0 + $0xe0] sm:$0xff]  ;;  %v231_v58 = vsel %vm143_vm0, %v43_v56, 0.0  ;;  %v45_v60 = vld [vmem:[%s10973_s0 + $0xf8] sm:$0xff]  ;;  %v44_v61 = vld [vmem:[%s10973_s0 + $0xf0] sm:$0xff] }
  0x21   :  { %v228_v59 = vsel %vm143_vm0, %v42_v57, 0.0  ;;  %v237_v62 = vsel %vm143_vm0, %v45_v60, 0.0  ;;  %v234_v63 = vsel %vm143_vm0, %v44_v61, 0.0  ;;  %v47_v0 = vld [vmem:[%s10973_s0 + $0x108] sm:$0xff]  ;;  %v46_v1 = vld [vmem:[%s10973_s0 + $0x100] sm:$0xff]  ;;  %v49_v4 = vld [vmem:[%s10973_s0 + $0x118] sm:$0xff] }
  0x22   :  { %v243_v2 = vsel %vm143_vm0, %v47_v0, 0.0  ;;  %v240_v3 = vsel %vm143_vm0, %v46_v1, 0.0  ;;  %v48_v5 = vld [vmem:[%s10973_s0 + $0x110] sm:$0xff]  ;;  %v249_v6 = vsel %vm143_vm0, %v49_v4, 0.0  ;;  %v51_v8 = vld [vmem:[%s10973_s0 + $0x128] sm:$0xff]  ;;  %v50_v9 = vld [vmem:[%s10973_s0 + $0x120] sm:$0xff] }
  0x23   :  { %196 = vadd.xlane.f32.xlu1 %v195_v34  ;;  %193 = vadd.xlane.f32.xlu0 %v192_v35  ;;  %v246_v7 = vsel %vm143_vm0, %v48_v5, 0.0  ;;  %v255_v10 = vsel %vm143_vm0, %v51_v8, 0.0  ;;  %v252_v11 = vsel %vm143_vm0, %v50_v9, 0.0  ;;  %v53_v12 = vld [vmem:[%s10973_s0 + $0x138] sm:$0xff]  ;;  %v52_v13 = vld [vmem:[%s10973_s0 + $0x130] sm:$0xff]  ;;  %v55_v16 = vld [vmem:[%s10973_s0 + $0x148] sm:$0xff] }
  0x24   :  { %v261_v14 = vsel %vm143_vm0, %v53_v12, 0.0  ;;  %v258_v15 = vsel %vm143_vm0, %v52_v13, 0.0  ;;  %v54_v17 = vld [vmem:[%s10973_s0 + $0x140] sm:$0xff]  ;;  %v267_v18 = vsel %vm143_vm0, %v55_v16, 0.0  ;;  %v57_v20 = vld [vmem:[%s10973_s0 + $0x158] sm:$0xff]  ;;  %v56_v21 = vld [vmem:[%s10973_s0 + $0x150] sm:$0xff] }
  0x25   :  { %v264_v19 = vsel %vm143_vm0, %v54_v17, 0.0  ;;  %v273_v22 = vsel %vm143_vm0, %v57_v20, 0.0  ;;  %v270_v23 = vsel %vm143_vm0, %v56_v21, 0.0  ;;  %v59_v24 = vld [vmem:[%s10973_s0 + $0x168] sm:$0xff]  ;;  %v58_v25 = vld [vmem:[%s10973_s0 + $0x160] sm:$0xff]  ;;  %v61_v28 = vld [vmem:[%s10973_s0 + $0x178] sm:$0xff] }
  0x26   :  { %v279_v26 = vsel %vm143_vm0, %v59_v24, 0.0  ;;  %v276_v27 = vsel %vm143_vm0, %v58_v25, 0.0  ;;  %v60_v29 = vld [vmem:[%s10973_s0 + $0x170] sm:$0xff]  ;;  %v285_v30 = vsel %vm143_vm0, %v61_v28, 0.0  ;;  %v63_v32 = vld [vmem:[%s10973_s0 + $0x188] sm:$0xff]  ;;  %v62_v33 = vld [vmem:[%s10973_s0 + $0x180] sm:$0xff] }
  0x27   :  { %202 = vadd.xlane.f32.xlu1 %v201_v38  ;;  %199 = vadd.xlane.f32.xlu0 %v198_v39  ;;  %v282_v31 = vsel %vm143_vm0, %v60_v29, 0.0  ;;  %v291_v34 = vsel %vm143_vm0, %v63_v32, 0.0  ;;  %v288_v35 = vsel %vm143_vm0, %v62_v33, 0.0  ;;  %v65_v36 = vld [vmem:[%s10973_s0 + $0x198] sm:$0xff]  ;;  %v64_v37 = vld [vmem:[%s10973_s0 + $0x190] sm:$0xff]  ;;  %v67_v40 = vld [vmem:[%s10973_s0 + $0x1a8] sm:$0xff] }
  0x28   :  { %v297_v38 = vsel %vm143_vm0, %v65_v36, 0.0  ;;  %v294_v39 = vsel %vm143_vm0, %v64_v37, 0.0  ;;  %v66_v41 = vld [vmem:[%s10973_s0 + $0x1a0] sm:$0xff]  ;;  %v69_v44 = vld [vmem:[%s10973_s0 + $0x1b8] sm:$0xff]  ;;  %v68_v45 = vld [vmem:[%s10973_s0 + $0x1b0] sm:$0xff]  ;;  %v7540_v24 = vmov 0  }
  0x29   :  { %v71_v48 = vld [vmem:[%s10973_s0 + $0x1c8] sm:$0xff]  ;;  %v70_v49 = vld [vmem:[%s10973_s0 + $0x1c0] sm:$0xff]  ;;  %v73_v52 = vld [vmem:[%s10973_s0 + $0x1d8] sm:$0xff]  ;;  %7517 = vset.pattern.permute.xlu1 %v7540_v24  ;;  %7516 = vset.pattern.permute.xlu0 %v7540_v24  ;;  %vm6818_vm2 = vcmask 195712   ;;  %vm6825_vm3 = vcmask 261312   ;;  %vm6832_vm4 = vcmask 326912  }
  0x2a   :  { %v72_v53 = vld [vmem:[%s10973_s0 + $0x1d0] sm:$0xff]  ;;  %v75_v56 = vld [vmem:[%s10973_s0 + $0x1e8] sm:$0xff]  ;;  %v74_v57 = vld [vmem:[%s10973_s0 + $0x1e0] sm:$0xff]  ;;  %vm6839_vm5 = vcmask 392512   ;;  %vm6846_vm6 = vcmask 458112   ;;  %vm6853_vm7 = vcmask 523712  }
  0x2b   :  { %208 = vadd.xlane.f32.xlu1 %v207_v42  ;;  %205 = vadd.xlane.f32.xlu0 %v204_v43  ;;  %v303_v42 = vsel %vm143_vm0, %v67_v40, 0.0  ;;  %v300_v43 = vsel %vm143_vm0, %v66_v41, 0.0  ;;  %v77_v60 = vld [vmem:[%s10973_s0 + $0x1f8] sm:$0xff]  ;;  %v76_v61 = vld [vmem:[%s10973_s0 + $0x1f0] sm:$0xff]  ;;  %v79_v0 = vld [vmem:[%s10973_s0 + $0x208] sm:$0xff]  ;;  %vm6860_vm8 = vcmask 589312  }
  0x2c   :  { %v78_v1 = vld [vmem:[%s10973_s0 + $0x200] sm:$0xff]  ;;  %v81_v4 = vld [vmem:[%s10973_s0 + $0x218] sm:$0xff]  ;;  %v80_v5 = vld [vmem:[%s10973_s0 + $0x210] sm:$0xff]  ;;  %vm6867_vm9 = vcmask 654912   ;;  %vm6874_vm10 = vcmask 720512   ;;  %vm6881_vm11 = vcmask 786112  }
  0x2d   :  { %v83_v8 = vld [vmem:[%s10973_s0 + $0x228] sm:$0xff]  ;;  %v82_v9 = vld [vmem:[%s10973_s0 + $0x220] sm:$0xff]  ;;  %v85_v12 = vld [vmem:[%s10973_s0 + $0x238] sm:$0xff]  ;;  %vm6888_vm12 = vcmask 851712   ;;  %vm6895_vm13 = vcmask 917312   ;;  %vm6902_vm14 = vcmask 982912  }
  0x2e   :  { %v84_v13 = vld [vmem:[%s10973_s0 + $0x230] sm:$0xff]  ;;  %v89_v25 = vld [vmem:[%s10973_s0 + $0x258] sm:$0xff]  ;;  %v90_v32 = vld [vmem:[%s10973_s0 + $0x260] sm:$0xff]  ;;  %vm6909_vm15 = vcmask 1048512  }
  0x2f   :  { %214 = vadd.xlane.f32.xlu1 %v213_v46  ;;  %211 = vadd.xlane.f32.xlu0 %v210_v47  ;;  %v309_v46 = vsel %vm143_vm0, %v69_v44, 0.0  ;;  %v306_v47 = vsel %vm143_vm0, %v68_v45, 0.0  ;;  %v354_v16 = vsel %vm143_vm0, %v84_v13, 0.0  ;;  %v369_v28 = vsel %vm143_vm0, %v89_v25, 0.0  ;;  %v93_v37 = vld [vmem:[%s10973_s0 + $0x278] sm:$0xff]  ;;  %v94_v44 = vld [vmem:[%s10973_s0 + $0x280] sm:$0xff] }
  0x30   :  { %v381_v40 = vsel %vm143_vm0, %v93_v37, 0.0  ;;  %v7541_v25 = vmov 269488144  }
  0x33   :  { %220 = vadd.xlane.f32.xlu1 %v219_v50  ;;  %217 = vadd.xlane.f32.xlu0 %v216_v51  ;;  %v315_v50 = vsel %vm143_vm0, %v71_v48, 0.0  ;;  %v312_v51 = vsel %vm143_vm0, %v70_v49, 0.0  ;;  %v97_v49 = vld [vmem:[%s10973_s0 + $0x298] sm:$0xff] }
  0x37   :  { %226 = vadd.xlane.f32.xlu1 %v225_v54  ;;  %223 = vadd.xlane.f32.xlu0 %v222_v55  ;;  %v321_v54 = vsel %vm143_vm0, %v73_v52, 0.0  ;;  %v318_v55 = vsel %vm143_vm0, %v72_v53, 0.0  ;;  %v393_v52 = vsel %vm143_vm0, %v97_v49, 0.0 }
  0x3b   :  { %232 = vadd.xlane.f32.xlu1 %v231_v58  ;;  %229 = vadd.xlane.f32.xlu0 %v228_v59  ;;  %v327_v58 = vsel %vm143_vm0, %v75_v56, 0.0  ;;  %v324_v59 = vsel %vm143_vm0, %v74_v57, 0.0  ;;  %v98_v56 = vld [vmem:[%s10973_s0 + $0x2a0] sm:$0xff] }
  0x3f   :  { %238 = vadd.xlane.f32.xlu1 %v237_v62  ;;  %235 = vadd.xlane.f32.xlu0 %v234_v63  ;;  %v333_v62 = vsel %vm143_vm0, %v77_v60, 0.0  ;;  %v330_v63 = vsel %vm143_vm0, %v76_v61, 0.0  ;;  %v101_v61 = vld [vmem:[%s10973_s0 + $0x2b8] sm:$0xff] }
  0x43   :  { %244 = vadd.xlane.f32.xlu1 %v243_v2  ;;  %241 = vadd.xlane.f32.xlu0 %v240_v3  ;;  %v339_v2 = vsel %vm143_vm0, %v79_v0, 0.0  ;;  %v336_v3 = vsel %vm143_vm0, %v78_v1, 0.0  ;;  %v405_v0 = vsel %vm143_vm0, %v101_v61, 0.0 }
  0x47   :  { %250 = vadd.xlane.f32.xlu1 %v249_v6  ;;  %247 = vadd.xlane.f32.xlu0 %v246_v7  ;;  %v345_v6 = vsel %vm143_vm0, %v81_v4, 0.0  ;;  %v342_v7 = vsel %vm143_vm0, %v80_v5, 0.0  ;;  %v102_v4 = vld [vmem:[%s10973_s0 + $0x2c0] sm:$0xff] }
  0x4b   :  { %256 = vadd.xlane.f32.xlu1 %v255_v10  ;;  %253 = vadd.xlane.f32.xlu0 %v252_v11  ;;  %v351_v10 = vsel %vm143_vm0, %v83_v8, 0.0  ;;  %v348_v11 = vsel %vm143_vm0, %v82_v9, 0.0  ;;  %v105_v9 = vld [vmem:[%s10973_s0 + $0x2d8] sm:$0xff] }
  0x4f   :  { %262 = vadd.xlane.f32.xlu1 %v261_v14  ;;  %259 = vadd.xlane.f32.xlu0 %v258_v15  ;;  %v357_v15 = vsel %vm143_vm0, %v85_v12, 0.0  ;;  %v417_v12 = vsel %vm143_vm0, %v105_v9, 0.0  ;;  %v115_v9 = vld [vmem:[%s10973_s0 + $0x328] sm:$0xff] }
  0x53   :  { %268 = vadd.xlane.f32.xlu1 %v267_v18  ;;  %265 = vadd.xlane.f32.xlu0 %v264_v19  ;;  %v87_v18 = vld [vmem:[%s10973_s0 + $0x248] sm:$0xff]  ;;  %v86_v19 = vld [vmem:[%s10973_s0 + $0x240] sm:$0xff] }
  0x54   :  { %v363_v21 = vsel %vm143_vm0, %v87_v18, 0.0  ;;  %v106_v18 = vld [vmem:[%s10973_s0 + $0x2e0] sm:$0xff] }
  0x57   :  { %274 = vadd.xlane.f32.xlu1 %v273_v22  ;;  %271 = vadd.xlane.f32.xlu0 %v270_v23  ;;  %v360_v22 = vsel %vm143_vm0, %v86_v19, 0.0 }
  0x5b   :  { %280 = vadd.xlane.f32.xlu1 %v279_v26  ;;  %277 = vadd.xlane.f32.xlu0 %v276_v27  ;;  %v88_v26 = vld [vmem:[%s10973_s0 + $0x250] sm:$0xff] }
  0x5c   :  { %v366_v29 = vsel %vm143_vm0, %v88_v26, 0.0  ;;  %v657_v26 = vunpack.c.l.s4 %v7541_v25 }
  0x5f   :  { %286 = vadd.xlane.f32.xlu1 %v285_v30  ;;  %283 = vadd.xlane.f32.xlu0 %v282_v31  ;;  %v91_v31 = vld [vmem:[%s10973_s0 + $0x268] sm:$0xff] }
  0x63   :  { %292 = vadd.xlane.f32.xlu1 %v291_v34  ;;  %289 = vadd.xlane.f32.xlu0 %v288_v35  ;;  %v375_v34 = vsel %vm143_vm0, %v91_v31, 0.0  ;;  %v372_v35 = vsel %vm143_vm0, %v90_v32, 0.0  ;;  %v109_v32 = vld [vmem:[%s10973_s0 + $0x2f8] sm:$0xff] }
  0x67   :  { %298 = vadd.xlane.f32.xlu1 %v297_v38  ;;  %295 = vadd.xlane.f32.xlu0 %v294_v39  ;;  %v92_v38 = vld [vmem:[%s10973_s0 + $0x270] sm:$0xff] }
  0x68   :  { %v378_v41 = vsel %vm143_vm0, %v92_v38, 0.0  ;;  %v7544_v38 = vmov 1987475062  }
  0x6b   :  { %304 = vadd.xlane.f32.xlu1 %v303_v42  ;;  %301 = vadd.xlane.f32.xlu0 %v300_v43  ;;  %v95_v43 = vld [vmem:[%s10973_s0 + $0x288] sm:$0xff] }
  0x6f   :  { %310 = vadd.xlane.f32.xlu1 %v309_v46  ;;  %307 = vadd.xlane.f32.xlu0 %v306_v47  ;;  %v387_v46 = vsel %vm143_vm0, %v95_v43, 0.0  ;;  %v384_v47 = vsel %vm143_vm0, %v94_v44, 0.0  ;;  %v429_v43 = vsel %vm143_vm0, %v109_v32, 0.0  ;;  %v118_v32 = vld [vmem:[%s10973_s0 + $0x340] sm:$0xff] }
  0x73   :  { %316 = vadd.xlane.f32.xlu1 %v315_v50  ;;  %313 = vadd.xlane.f32.xlu0 %v312_v51  ;;  %v96_v50 = vld [vmem:[%s10973_s0 + $0x290] sm:$0xff] }
  0x74   :  { %v390_v53 = vsel %vm143_vm0, %v96_v50, 0.0 }
  0x77   :  { %322 = vadd.xlane.f32.xlu1 %v321_v54  ;;  %319 = vadd.xlane.f32.xlu0 %v318_v55  ;;  %v99_v55 = vld [vmem:[%s10973_s0 + $0x2a8] sm:$0xff] }
  0x7b   :  { %328 = vadd.xlane.f32.xlu1 %v327_v58  ;;  %325 = vadd.xlane.f32.xlu0 %v324_v59  ;;  %v399_v58 = vsel %vm143_vm0, %v99_v55, 0.0  ;;  %v396_v59 = vsel %vm143_vm0, %v98_v56, 0.0  ;;  %v7545_v55 = vmov 1983009808  }
  0x7c   :  { %v4243_v56 = vunpack.c.l.s4 %v7545_v55  ;;  %v125_v55 = vld [vmem:[%s10973_s0 + $0x378] sm:$0xff] }
  0x7f   :  { %334 = vadd.xlane.f32.xlu1 %v333_v62  ;;  %331 = vadd.xlane.f32.xlu0 %v330_v63  ;;  %v100_v62 = vld [vmem:[%s10973_s0 + $0x2b0] sm:$0xff] }
  0x80   :  { %v402_v1 = vsel %vm143_vm0, %v100_v62, 0.0 }
  0x83   :  { %340 = vadd.xlane.f32.xlu1 %v339_v2  ;;  %337 = vadd.xlane.f32.xlu0 %v336_v3  ;;  %v103_v3 = vld [vmem:[%s10973_s0 + $0x2c8] sm:$0xff] }
  0x87   :  { %346 = vadd.xlane.f32.xlu1 %v345_v6  ;;  %343 = vadd.xlane.f32.xlu0 %v342_v7  ;;  %v411_v6 = vsel %vm143_vm0, %v103_v3, 0.0  ;;  %v408_v7 = vsel %vm143_vm0, %v102_v4, 0.0 }
  0x8b   :  { %352 = vadd.xlane.f32.xlu1 %v351_v10  ;;  %349 = vadd.xlane.f32.xlu0 %v348_v11  ;;  %v104_v10 = vld [vmem:[%s10973_s0 + $0x2d0] sm:$0xff] }
  0x8c   :  { %v7843_v14 = vpop.xlane.xlu1 %151  ;;  %v7847_v17 = vpop.xlane.xlu0 %145  ;;  %v414_v13 = vsel %vm143_vm0, %v104_v10, 0.0  ;;  %v114_v10 = vld [vmem:[%s10973_s0 + $0x320] sm:$0xff] }
  0x8f   :  { %358 = vadd.xlane.f32.xlu1 %v357_v15  ;;  %355 = vadd.xlane.f32.xlu0 %v354_v16  ;;  %v107_v16 = vld [vmem:[%s10973_s0 + $0x2e8] sm:$0xff] }
  0x90   :  { %v7855_v20 = vpop.xlane.xlu1 %154  ;;  %v7859_v23 = vpop.xlane.xlu0 %148 }
  0x93   :  { %364 = vadd.xlane.f32.xlu1 %v363_v21  ;;  %361 = vadd.xlane.f32.xlu0 %v360_v22  ;;  %v423_v21 = vsel %vm143_vm0, %v107_v16, 0.0  ;;  %v420_v22 = vsel %vm143_vm0, %v106_v18, 0.0  ;;  %v117_v18 = vld [vmem:[%s10973_s0 + $0x338] sm:$0xff] }
  0x94   :  { %v7867_v27 = vpop.xlane.xlu1 %160  ;;  %v7871_v30 = vpop.xlane.xlu0 %157 }
  0x97   :  { %370 = vadd.xlane.f32.xlu1 %v369_v28  ;;  %367 = vadd.xlane.f32.xlu0 %v366_v29  ;;  %v10975_v28 = vlaneseq  ;;  %v7542_v29 = vmov 842150450  }
  0x98   :  { %v7879_v33 = vpop.xlane.xlu1 %166  ;;  %v7883_v36 = vpop.xlane.xlu0 %163  ;;  %v664_v31 = vunpack.c.l.s4 %v7542_v29 }
  0x99   :  { %v7994_v49 = vshrl.u32 %v10975_v28, 7 }
  0x9a   :  { %v665_v50 = vunpack.c.0.s8 %v664_v31 }
  0x9b   :  { %376 = vadd.xlane.f32.xlu1 %v375_v34  ;;  %373 = vadd.xlane.f32.xlu0 %v372_v35  ;;  %v108_v34 = vld [vmem:[%s10973_s0 + $0x2f0] sm:$0xff]  ;;  %v7543_v35 = vmov 1414812756   ;;  %11064 = vst [vmem:[#allocation9_spill] sm:$0xff] %v7994_v49 }
  0x9c   :  { %v7891_v39 = vpop.xlane.xlu1 %172  ;;  %v7895_v42 = vpop.xlane.xlu0 %169  ;;  %v671_v37 = vunpack.c.l.s4 %v7543_v35  ;;  %v426_v44 = vsel %vm143_vm0, %v108_v34, 0.0  ;;  %v8012_v4 = vsub.s32 %v665_v50, %v7994_v49  ;;  %v121_v34 = vld [vmem:[%s10973_s0 + $0x358] sm:$0xff] }
  0x9f   :  { %382 = vadd.xlane.f32.xlu1 %v381_v40  ;;  %379 = vadd.xlane.f32.xlu0 %v378_v41  ;;  %v678_v40 = vunpack.c.l.s4 %v7544_v38  ;;  %v447_v38 = vsel %vm143_vm0, %v115_v9, 0.0  ;;  %v126_v9 = vld [vmem:[%s10973_s0 + $0x380] sm:$0xff] }
  0xa0   :  { %v7903_v45 = vpop.xlane.xlu1 %178  ;;  %v7907_v48 = vpop.xlane.xlu0 %175 }
  0xa3   :  { %388 = vadd.xlane.f32.xlu1 %v387_v46  ;;  %385 = vadd.xlane.f32.xlu0 %v384_v47  ;;  %v658_v47 = vunpack.c.0.s8 %v657_v26 }
  0xa4   :  { %v7915_v51 = vpop.xlane.xlu1 %184  ;;  %v7919_v54 = vpop.xlane.xlu0 %181 }
  0xa5   :  { %v8009_v3 = vsub.s32 %v658_v47, %v7994_v49  ;;  %v453_v47 = vsel %vm143_vm0, %v117_v18, 0.0 }
  0xa7   :  { %394 = vadd.xlane.f32.xlu1 %v393_v52  ;;  %391 = vadd.xlane.f32.xlu0 %v390_v53  ;;  %v111_v52 = vld [vmem:[%s10973_s0 + $0x308] sm:$0xff]  ;;  %v110_v53 = vld [vmem:[%s10973_s0 + $0x300] sm:$0xff]  ;;  %v718_v35 = vrot.slane %v7843_v14, %v8009_v3 }
  0xa8   :  { %v7927_v57 = vpop.xlane.xlu1 %190  ;;  %v7931_v60 = vpop.xlane.xlu0 %187  ;;  %v435_v62 = vsel %vm143_vm0, %v111_v52, 0.0 }
  0xab   :  { %400 = vadd.xlane.f32.xlu1 %v399_v58  ;;  %397 = vadd.xlane.f32.xlu0 %v396_v59  ;;  %v672_v58 = vunpack.c.0.s8 %v671_v37  ;;  %v679_v59 = vunpack.c.0.s8 %v678_v40  ;;  %v725_v37 = vrot.slane %v7843_v14, %v8012_v4  ;;  %v444_v40 = vsel %vm143_vm0, %v114_v10, 0.0 }
  0xac   :  { %v7939_v63 = vpop.xlane.xlu1 %196  ;;  %v7943_v2 = vpop.xlane.xlu0 %193  ;;  %v662_v10 = vrot.slane %v7847_v17, %v8009_v3 }
  0xad   :  { %v8030_v16 = vsub.s32 %v679_v59, %v7994_v49 }
  0xaf   :  { %406 = vadd.xlane.f32.xlu1 %v405_v0  ;;  %403 = vadd.xlane.f32.xlu0 %v402_v1  ;;  %v432_v0 = vsel %vm143_vm0, %v110_v53, 0.0  ;;  %v122_v53 = vld [vmem:[%s10973_s0 + $0x360] sm:$0xff] }
  0xb0   :  { %v7951_v5 = vpop.xlane.xlu1 %202  ;;  %v7955_v8 = vpop.xlane.xlu0 %199 }
  0xb3   :  { %412 = vadd.xlane.f32.xlu1 %v411_v6  ;;  %409 = vadd.xlane.f32.xlu0 %v408_v7  ;;  %v113_v6 = vld [vmem:[%s10973_s0 + $0x318] sm:$0xff]  ;;  %v112_v7 = vld [vmem:[%s10973_s0 + $0x310] sm:$0xff] }
  0xb4   :  { %v7963_v11 = vpop.xlane.xlu1 %208  ;;  %v7967_v15 = vpop.xlane.xlu0 %205  ;;  %v441_v26 = vsel %vm143_vm0, %v113_v6, 0.0  ;;  %v438_v29 = vsel %vm143_vm0, %v112_v7, 0.0  ;;  %v8090_v6 = vsel %vm143_vm0, %v121_v34, 0.0  ;;  %v127_v7 = vld [vmem:[%s10973_s0 + $0x388] sm:$0xff]  ;;  %v8121_v34 = vsel %vm143_vm0, %v125_v55, 0.0 }
  0xb5   :  { %v683_v55 = vrot.slane %v7847_v17, %v8030_v16 }
  0xb7   :  { %418 = vadd.xlane.f32.xlu1 %v417_v12  ;;  %415 = vadd.xlane.f32.xlu0 %v414_v13  ;;  %v4244_v12 = vunpack.c.0.s8 %v4243_v56  ;;  %v8027_v13 = vsub.s32 %v672_v58, %v7994_v49  ;;  %v124_v56 = vld [vmem:[%s10973_s0 + $0x370] sm:$0xff] }
  0xb8   :  { %v7975_v19 = vpop.xlane.xlu1 %214  ;;  %v7979_v24 = vpop.xlane.xlu0 %211  ;;  %v8124_v28 = vsel %vm143_vm0, %v124_v56, 0.0 }
  0xb9   :  { %11061 = vst [vmem:[#allocation6_spill] sm:$0xff] %v7979_v24  ;;  %v8080_v58 = vsub.s32 %v4244_v12, %v7994_v49  ;;  %v732_v59 = vrot.slane %v7843_v14, %v8027_v13  ;;  %v8131_v49 = vsel %vm143_vm0, %v127_v7, 0.0 }
  0xbb   :  { %424 = vadd.xlane.f32.xlu1 %v423_v21  ;;  %421 = vadd.xlane.f32.xlu0 %v420_v22  ;;  %v116_v21 = vld [vmem:[%s10973_s0 + $0x330] sm:$0xff]  ;;  %v119_v22 = vld [vmem:[%s10973_s0 + $0x348] sm:$0xff] }
  0xbc   :  { %v7987_v41 = vpop.xlane.xlu1 %220  ;;  %v7991_v46 = vpop.xlane.xlu0 %217  ;;  %v450_v50 = vsel %vm143_vm0, %v116_v21, 0.0  ;;  %v8068_v52 = vsel %vm143_vm0, %v119_v22, 0.0 }
  0xbd   :  { %11062 = vst [vmem:[#allocation7_spill] sm:$0xff] %v7987_v41  ;;  %11063 = vst [vmem:[#allocation8_spill] sm:$0xff] %v7991_v46  ;;  %v130_v41 = vld [vmem:[%s10973_s0 + $0x3a0] sm:$0xff] }
  0xbf   :  { %430 = vadd.xlane.f32.xlu1 %v429_v43  ;;  %427 = vadd.xlane.f32.xlu0 %v426_v44  ;;  %v120_v43 = vld [vmem:[%s10973_s0 + $0x350] sm:$0xff]  ;;  %v123_v44 = vld [vmem:[%s10973_s0 + $0x368] sm:$0xff] }
  0xc0   :  { %v8002_v61 = vpop.xlane.xlu1 %226  ;;  %v8006_v1 = vpop.xlane.xlu0 %223  ;;  %v8107_v21 = vsel %vm143_vm0, %v120_v43, 0.0  ;;  %v8110_v22 = vsel %vm143_vm0, %v123_v44, 0.0  ;;  %v690_v43 = vrot.slane %v7859_v23, %v8009_v3  ;;  %v697_v44 = vrot.slane %v7859_v23, %v8012_v4 }
  0xc1   :  { %11065 = vst [vmem:[#allocation10_spill] sm:$0xff] %v8002_v61  ;;  %11066 = vst [vmem:[#allocation11_spill] sm:$0xff] %v8006_v1 }
  0xc3   :  { %436 = vadd.xlane.f32.xlu1 %v435_v62  ;;  %433 = vadd.xlane.f32.xlu0 %v432_v0  ;;  %v739_v62 = vrot.slane %v7843_v14, %v8030_v16  ;;  %v8087_v0 = vsel %vm143_vm0, %v118_v32, 0.0  ;;  %v669_v14 = vrot.slane %v7847_v17, %v8012_v4  ;;  %v8118_v32 = vsel %vm143_vm0, %v122_v53, 0.0 }
  0xc4   :  { %v8041_v25 = vpop.xlane.xlu1 %232  ;;  %v8045_v31 = vpop.xlane.xlu0 %229  ;;  %v676_v53 = vrot.slane %v7847_v17, %v8027_v13  ;;  %v128_v17 = vld [vmem:[%s10973_s0 + $0x390] sm:$0xff] }
  0xc5   :  { %11067 = vst [vmem:[#allocation12_spill] sm:$0xff] %v8041_v25  ;;  %11068 = vst [vmem:[#allocation13_spill] sm:$0xff] %v8045_v31  ;;  %v8145_v7 = vcombine.low %v662_v10, %v669_v14  ;;  %v767_v10 = vrot.slane %v7855_v20, %v8030_v16  ;;  %v802_v14 = vrot.slane %v7867_v27, %v8009_v3  ;;  %v131_v31 = vld [vmem:[%s10973_s0 + $0x3a8] sm:$0xff]  ;;  %v8182_v1 = vsel %vm143_vm0, %v128_v17, 0.0 }
  0xc6   :  { %v781_v25 = vrot.slane %v7871_v30, %v8012_v4 }
  0xc7   :  { %442 = vadd.xlane.f32.xlu1 %v441_v26  ;;  %439 = vadd.xlane.f32.xlu0 %v438_v29  ;;  %v129_v26 = vld [vmem:[%s10973_s0 + $0x398] sm:$0xff]  ;;  %v8115_v29 = vcombine.low %v718_v35, %v725_v37  ;;  %v8134_v35 = vsel %vm143_vm0, %v126_v9, 0.0  ;;  %v4275_v37 = vcombine.low %v732_v59, %v739_v62  ;;  %v704_v9 = vrot.slane %v7859_v23, %v8027_v13 }
  0xc8   :  { %v8102_v12 = vpop.xlane.xlu1 %238  ;;  %v8104_v18 = vpop.xlane.xlu0 %235  ;;  %v8141_v56 = vsel %vm143_vm0, %v129_v26, 0.0  ;;  %v711_v59 = vrot.slane %v7859_v23, %v8030_v16  ;;  %v809_v26 = vrot.slane %v7867_v27, %v8012_v4 }
  0xc9   :  { %11069 = vst [vmem:[#allocation14_spill] sm:$0xff] %v8102_v12  ;;  %11070 = vst [vmem:[#allocation15_spill] sm:$0xff] %v8104_v18  ;;  %v746_v18 = vrot.slane %v7855_v20, %v8009_v3  ;;  %v4282_v23 = vrot.slane %v8115_v29, %v8080_v58  ;;  %v774_v29 = vrot.slane %v7871_v30, %v8009_v3 }
  0xca   :  { %v4258_v61 = vcombine.low %v704_v9, %v711_v59  ;;  %v4241_v9 = vcombine.low %v676_v53, %v683_v55  ;;  %v8201_v59 = vsel %vm143_vm0, %v131_v31, 0.0  ;;  %v8203_v24 = vcombine.low %v802_v14, %v809_v26 }
  0xcb   :  { %448 = vadd.xlane.f32.xlu1 %v447_v38  ;;  %445 = vadd.xlane.f32.xlu0 %v444_v40  ;;  %v753_v38 = vrot.slane %v7855_v20, %v8012_v4  ;;  %v760_v40 = vrot.slane %v7855_v20, %v8027_v13  ;;  %v823_v20 = vrot.slane %v7867_v27, %v8030_v16  ;;  %v8218_v31 = vsel %vm143_vm0, %v130_v41, 0.0 }
  0xcc   :  { %v8151_v62 = vpop.xlane.xlu1 %244  ;;  %v8153_v12 = vpop.xlane.xlu0 %241  ;;  %v872_v55 = vrot.slane %v7879_v33, %v8027_v13  ;;  %v879_v41 = vrot.slane %v7879_v33, %v8030_v16  ;;  %v914_v26 = vrot.slane %v7891_v39, %v8009_v3 }
  0xcd   :  { %11071 = vst [vmem:[#allocation16_spill] sm:$0xff] %v8151_v62  ;;  %11072 = vst [vmem:[#allocation17_spill] sm:$0xff] %v8153_v12  ;;  %v816_v12 = vrot.slane %v7867_v27, %v8027_v13  ;;  %v4257_v62 = vcombine.low %v690_v43, %v697_v44  ;;  %v788_v43 = vrot.slane %v7871_v30, %v8027_v13 }
  0xce   :  { %v795_v44 = vrot.slane %v7871_v30, %v8030_v16  ;;  %v8198_v17 = vcombine.low %v760_v40, %v767_v10  ;;  %v858_v30 = vrot.slane %v7879_v33, %v8009_v3  ;;  %v844_v10 = vrot.slane %v7883_v36, %v8027_v13 }
  0xcf   :  { %454 = vadd.xlane.f32.xlu1 %v453_v47  ;;  %451 = vadd.xlane.f32.xlu0 %v450_v50  ;;  %v4289_v47 = vrot.slane %v4275_v37, %v8080_v58  ;;  %v8196_v50 = vcombine.low %v746_v18, %v753_v38  ;;  %v8211_v37 = vcombine.low %v816_v12, %v823_v20 }
  0xd0   :  { %v8188_v46 = vpop.xlane.xlu1 %250  ;;  %v8190_v27 = vpop.xlane.xlu0 %247  ;;  %v8213_v18 = vcombine.low %v774_v29, %v781_v25  ;;  %v4265_v53 = vrot.slane %v4257_v62, %v8080_v58  ;;  %v8223_v38 = vcombine.low %v788_v43, %v795_v44  ;;  %v133_v25 = vld [vmem:[%s10973_s0 + $0x3b8] sm:$0xff]  ;;  %v837_v62 = vrot.slane %v7883_v36, %v8012_v4 }
  0xd1   :  { %11073 = vst [vmem:[#allocation18_spill] sm:$0xff] %v8188_v46  ;;  %11074 = vst [vmem:[#allocation19_spill] sm:$0xff] %v8190_v27  ;;  %v865_v27 = vrot.slane %v7879_v33, %v8012_v4  ;;  %v4248_v46 = vrot.slane %v8145_v7, %v8080_v58  ;;  %v830_v7 = vrot.slane %v7883_v36, %v8009_v3  ;;  %v8259_v43 = vsel %vm143_vm0, %v133_v25, 0.0 }
  0xd2   :  { %v921_v33 = vrot.slane %v7891_v39, %v8012_v4  ;;  %v928_v20 = vrot.slane %v7891_v39, %v8027_v13  ;;  %v935_v29 = vrot.slane %v7891_v39, %v8030_v16  ;;  %v893_v44 = vrot.slane %v7895_v42, %v8012_v4 }
  0xd3   :  { %460 = vadd.xlane.f32.xlu1 %v8068_v52  ;;  %457 = vadd.xlane.f32.xlu0 %v8087_v0  ;;  %v4272_v52 = vrot.slane %v4258_v61, %v8080_v58  ;;  %v8233_v0 = vcombine.low %v4282_v23, %v4289_v47  ;;  %v8243_v14 = vcombine.low %v858_v30, %v865_v27 }
  0xd4   :  { %v8225_v40 = vpop.xlane.xlu1 %256  ;;  %v8227_v12 = vpop.xlane.xlu0 %253  ;;  %v851_v61 = vrot.slane %v7883_v36, %v8030_v16  ;;  %v4255_v23 = vrot.slane %v4241_v9, %v8080_v58  ;;  %v886_v36 = vrot.slane %v7895_v42, %v8009_v3  ;;  %v900_v27 = vrot.slane %v7895_v42, %v8027_v13 }
  0xd5   :  { %11075 = vst [vmem:[#allocation20_spill] sm:$0xff] %v8225_v40  ;;  %11076 = vst [vmem:[#allocation21_spill] sm:$0xff] %v8227_v12  ;;  %v907_v47 = vrot.slane %v7895_v42, %v8030_v16  ;;  %v8276_v9 = vcombine.low %v872_v55, %v879_v41  ;;  %v8278_v30 = vcombine.low %v4265_v53, %v4272_v52 }
  0xd6   :  { %11077 = vst [vmem:[#allocation22_spill] sm:$0xff] %v8233_v0  ;;  %v4299_v25 = vrot.slane %v8196_v50, %v8080_v58  ;;  %v4306_v0 = vrot.slane %v8198_v17, %v8080_v58  ;;  %v970_v42 = vrot.slane %v7903_v45, %v8009_v3  ;;  %v991_v55 = vrot.slane %v7903_v45, %v8030_v16 }
  0xd7   :  { %466 = vadd.xlane.f32.xlu1 %v8090_v6  ;;  %463 = vadd.xlane.f32.xlu0 %v8107_v21  ;;  %v132_v21 = vld [vmem:[%s10973_s0 + $0x3b0] sm:$0xff]  ;;  %11080 = vst [vmem:[#allocation25_spill] sm:$0xff] %v8278_v30  ;;  %v4393_v53 = vcombine.low %v914_v26, %v921_v33  ;;  %v4394_v52 = vcombine.low %v928_v20, %v935_v29 }
  0xd8   :  { %v8269_v39 = vpop.xlane.xlu1 %262  ;;  %v8271_v6 = vpop.xlane.xlu0 %259  ;;  %v8292_v41 = vcombine.low %v830_v7, %v837_v62  ;;  %v8297_v50 = vsel %vm143_vm0, %v132_v21, 0.0  ;;  %v8299_v17 = vcombine.low %v844_v10, %v851_v61  ;;  %v8301_v30 = vcombine.low %v886_v36, %v893_v44  ;;  %v135_v7 = vld [vmem:[%s10973_s0 + $0x3c8] sm:$0xff] }
  0xd9   :  { %11078 = vst [vmem:[#allocation23_spill] sm:$0xff] %v8269_v39  ;;  %11079 = vst [vmem:[#allocation24_spill] sm:$0xff] %v8271_v6  ;;  %v977_v6 = vrot.slane %v7903_v45, %v8012_v4  ;;  %v984_v39 = vrot.slane %v7903_v45, %v8027_v13  ;;  %v8303_v12 = vcombine.low %v900_v27, %v907_v47  ;;  %v8335_v29 = vsel %vm143_vm0, %v135_v7, 0.0  ;;  %v134_v47 = vld [vmem:[%s10973_s0 + $0x3c0] sm:$0xff] }
  0xda   :  { %v949_v62 = vrot.slane %v7907_v48, %v8012_v4  ;;  %v956_v10 = vrot.slane %v7907_v48, %v8027_v13  ;;  %v4316_v26 = vrot.slane %v8213_v18, %v8080_v58  ;;  %v1026_v20 = vrot.slane %v7915_v51, %v8009_v3 }
  0xdb   :  { %472 = vadd.xlane.f32.xlu1 %v8110_v22  ;;  %469 = vadd.xlane.f32.xlu0 %v8118_v32  ;;  %v8312_v22 = vcombine.low %v4248_v46, %v4255_v23  ;;  %v942_v32 = vrot.slane %v7907_v48, %v8009_v3  ;;  %v8322_v61 = vcombine.low %v970_v42, %v977_v6  ;;  %v8379_v7 = vsel %vm143_vm0, %v134_v47, 0.0 }
  0xdc   :  { %v8305_v40 = vpop.xlane.xlu1 %268  ;;  %v8307_v45 = vpop.xlane.xlu0 %265  ;;  %v8324_v33 = vcombine.low %v984_v39, %v991_v55  ;;  %v963_v46 = vrot.slane %v7907_v48, %v8030_v16  ;;  %v8328_v23 = vcombine.low %v4299_v25, %v4306_v0  ;;  %v4401_v18 = vrot.slane %v4393_v53, %v8080_v58 }
  0xdd   :  { %v4408_v36 = vrot.slane %v4394_v52, %v8080_v58  ;;  %v1033_v44 = vrot.slane %v7915_v51, %v8012_v4  ;;  %v1040_v48 = vrot.slane %v7915_v51, %v8027_v13  ;;  %v1047_v0 = vrot.slane %v7915_v51, %v8030_v16 }
  0xde   :  { %11081 = vst [vmem:[#allocation26_spill] sm:$0xff] %v8328_v23  ;;  %v1005_v39 = vrot.slane %v7919_v54, %v8012_v4  ;;  %v1012_v6 = vrot.slane %v7919_v54, %v8027_v13  ;;  %v1019_v51 = vrot.slane %v7919_v54, %v8030_v16  ;;  %v4323_v21 = vrot.slane %v8223_v38, %v8080_v58  ;;  %v137_v23 = vld [vmem:[%s10973_s0 + $0x3d8] sm:$0xff] }
  0xdf   :  { %478 = vadd.xlane.f32.xlu1 %v8121_v34  ;;  %475 = vadd.xlane.f32.xlu0 %v8124_v28  ;;  %v998_v34 = vrot.slane %v7919_v54, %v8009_v3  ;;  %v1082_v25 = vrot.slane %v7927_v57, %v8009_v3  ;;  %v1089_v42 = vrot.slane %v7927_v57, %v8012_v4 }
  0xe0   :  { %v8347_v28 = vpop.xlane.xlu1 %274  ;;  %v8349_v27 = vpop.xlane.xlu0 %271  ;;  %v1096_v55 = vrot.slane %v7927_v57, %v8027_v13  ;;  %v1103_v53 = vrot.slane %v7927_v57, %v8030_v16  ;;  %v8370_v52 = vcombine.low %v942_v32, %v949_v62  ;;  %v1054_v54 = vrot.slane %v7931_v60, %v8009_v3 }
  0xe1   :  { %11082 = vst [vmem:[#allocation27_spill] sm:$0xff] %v8347_v28  ;;  %11083 = vst [vmem:[#allocation28_spill] sm:$0xff] %v8349_v27  ;;  %v1061_v38 = vrot.slane %v7931_v60, %v8012_v4  ;;  %v8381_v27 = vcombine.low %v1026_v20, %v1033_v44  ;;  %v8383_v28 = vcombine.low %v1040_v48, %v1047_v0 }
  0xe2   :  { %v8385_v57 = vcombine.low %v956_v10, %v963_v46  ;;  %v8398_v47 = vcombine.low %v1012_v6, %v1019_v51  ;;  %v1068_v20 = vrot.slane %v7931_v60, %v8027_v13  ;;  %v4435_v10 = vrot.slane %v8322_v61, %v8080_v58 }
  0xe3   :  { %484 = vadd.xlane.f32.xlu1 %v8131_v49  ;;  %481 = vadd.xlane.f32.xlu0 %v8134_v35  ;;  %v8394_v49 = vcombine.low %v4401_v18, %v4408_v36  ;;  %v8396_v35 = vcombine.low %v998_v34, %v1005_v39  ;;  %v8404_v46 = vcombine.low %v1082_v25, %v1089_v42  ;;  %v8417_v36 = vsel %vm143_vm0, %v137_v23, 0.0 }
  0xe4   :  { %v8387_v32 = vpop.xlane.xlu1 %280  ;;  %v8389_v62 = vpop.xlane.xlu0 %277  ;;  %v8406_v44 = vcombine.low %v1096_v55, %v1103_v53  ;;  %v1075_v48 = vrot.slane %v7931_v60, %v8030_v16  ;;  %v8410_v0 = vcombine.low %v4316_v26, %v4323_v21  ;;  %v8412_v18 = vcombine.low %v1054_v54, %v1061_v38 }
  0xe5   :  { %11084 = vst [vmem:[#allocation29_spill] sm:$0xff] %v8389_v62  ;;  %v4442_v61 = vrot.slane %v8324_v33, %v8080_v58  ;;  %v4333_v34 = vrot.slane %v8203_v24, %v8080_v58  ;;  %v1138_v60 = vrot.slane %v7939_v63, %v8009_v3  ;;  %v1145_v26 = vrot.slane %v7939_v63, %v8012_v4  ;;  %v136_v24 = vld [vmem:[%s10973_s0 + $0x3d0] sm:$0xff] }
  0xe6   :  { %11085 = vst [vmem:[#allocation30_spill] sm:$0xff] %v8410_v0  ;;  %v1110_v33 = vrot.slane %v7943_v2, %v8009_v3  ;;  %v1117_v6 = vrot.slane %v7943_v2, %v8012_v4  ;;  %v1124_v51 = vrot.slane %v7943_v2, %v8027_v13  ;;  %v1194_v21 = vrot.slane %v7951_v5, %v8009_v3 }
  0xe7   :  { %490 = vadd.xlane.f32.xlu1 %v8141_v56  ;;  %487 = vadd.xlane.f32.xlu0 %v8182_v1  ;;  %v1152_v56 = vrot.slane %v7939_v63, %v8027_v13  ;;  %v1159_v1 = vrot.slane %v7939_v63, %v8030_v16  ;;  %v1131_v63 = vrot.slane %v7943_v2, %v8030_v16  ;;  %v510_v38 = vsel %vm143_vm0, %v136_v24, 0.0 }
  0xe8   :  { %v8431_v23 = vpop.xlane.xlu1 %286  ;;  %v8433_v39 = vpop.xlane.xlu0 %283  ;;  %v1201_v25 = vrot.slane %v7951_v5, %v8012_v4  ;;  %v1208_v42 = vrot.slane %v7951_v5, %v8027_v13  ;;  %v4340_v55 = vrot.slane %v8211_v37, %v8080_v58  ;;  %v1215_v53 = vrot.slane %v7951_v5, %v8030_v16 }
  0xe9   :  { %11086 = vst [vmem:[#allocation31_spill] sm:$0xff] %v8431_v23  ;;  %11087 = vst [vmem:[#allocation32_spill] sm:$0xff] %v8433_v39  ;;  %v1166_v54 = vrot.slane %v7955_v8, %v8009_v3  ;;  %v1173_v2 = vrot.slane %v7955_v8, %v8012_v4  ;;  %v8463_v39 = vcombine.low %v1138_v60, %v1145_v26 }
  0xea   :  { %v8465_v23 = vcombine.low %v1068_v20, %v1075_v48  ;;  %v1180_v37 = vrot.slane %v7955_v8, %v8027_v13  ;;  %v1187_v5 = vrot.slane %v7955_v8, %v8030_v16  ;;  %v8480_v60 = vcombine.low %v1110_v33, %v1117_v6 }
  0xeb   :  { %496 = vadd.xlane.f32.xlu1 %v8201_v59  ;;  %493 = vadd.xlane.f32.xlu0 %v8218_v31  ;;  %v139_v59 = vld [vmem:[%s10973_s0 + $0x3e8] sm:$0xff]  ;;  %v8478_v31 = vcombine.low %v1152_v56, %v1159_v1  ;;  %v8482_v20 = vcombine.low %v1124_v51, %v1131_v63  ;;  %v8484_v48 = vcombine.low %v4435_v10, %v4442_v61 }
  0xec   :  { %v8471_v62 = vpop.xlane.xlu1 %292  ;;  %v8473_v0 = vpop.xlane.xlu0 %289  ;;  %11090 = vst [vmem:[#allocation35_spill] sm:$0xff] %v8480_v60  ;;  %v8486_v26 = vcombine.low %v1194_v21, %v1201_v25  ;;  %v1250_v8 = vrot.slane %v7963_v11, %v8009_v3  ;;  %v1257_v24 = vrot.slane %v7963_v11, %v8012_v4  ;;  %v8496_v56 = vcombine.low %v1166_v54, %v1173_v2 }
  0xed   :  { %11088 = vst [vmem:[#allocation33_spill] sm:$0xff] %v8471_v62  ;;  %11089 = vst [vmem:[#allocation34_spill] sm:$0xff] %v8473_v0  ;;  %v4469_v0 = vrot.slane %v8381_v27, %v8080_v58  ;;  %v8494_v62 = vcombine.low %v1208_v42, %v1215_v53  ;;  %v519_v10 = vsel %vm143_vm0, %v139_v59, 0.0  ;;  %v8501_v61 = vcombine.low %v4333_v34, %v4340_v55 }
  0xee   :  { %11091 = vst [vmem:[#allocation36_spill] sm:$0xff] %v8482_v20  ;;  %11092 = vst [vmem:[#allocation37_spill] sm:$0xff] %v8484_v48  ;;  %v1264_v1 = vrot.slane %v7963_v11, %v8027_v13  ;;  %v1271_v33 = vrot.slane %v7963_v11, %v8030_v16  ;;  %v8507_v6 = vcombine.low %v1180_v37, %v1187_v5 }
  0xef   :  { %11093 = vst [vmem:[#allocation38_spill] sm:$0xff] %v8496_v56  ;;  %502 = vadd.xlane.f32.xlu1 %v8259_v43  ;;  %499 = vadd.xlane.f32.xlu0 %v8297_v50  ;;  %11094 = vst [vmem:[#allocation39_spill] sm:$0xff] %v8501_v61  ;;  %v138_v43 = vld [vmem:[%s10973_s0 + $0x3e0] sm:$0xff]  ;;  %v4476_v50 = vrot.slane %v8383_v28, %v8080_v58  ;;  %v1222_v34 = vrot.slane %v7967_v15, %v8009_v3 }
  0xf0   :  { %11095 = vst [vmem:[#allocation40_spill] sm:$0xff] %v8507_v6  ;;  %v8509_v27 = vpop.xlane.xlu1 %298  ;;  %v8511_v51 = vpop.xlane.xlu0 %295  ;;  %v1229_v63 = vrot.slane %v7967_v15, %v8012_v4  ;;  %v1236_v11 = vrot.slane %v7967_v15, %v8027_v13  ;;  %v1243_v21 = vrot.slane %v7967_v15, %v8030_v16  ;;  %v8526_v25 = vcombine.low %v1250_v8, %v1257_v24  ;;  %v11104_v6 = vld [vmem:[#allocation7_spill] sm:$0xff] }
  0xf1   :  { %11096 = vst [vmem:[#allocation41_spill] sm:$0xff] %v8509_v27  ;;  %11097 = vst [vmem:[#allocation42_spill] sm:$0xff] %v8511_v51  ;;  %v1306_v42 = vrot.slane %v7975_v19, %v8009_v3  ;;  %v4350_v28 = vrot.slane %v8292_v41, %v8080_v58  ;;  %v4357_v55 = vrot.slane %v8299_v17, %v8080_v58  ;;  %v516_v2 = vsel %vm143_vm0, %v138_v43, 0.0  ;;  %v11098_v41 = vld [vmem:[#allocation6_spill] sm:$0xff] }
  0xf2   :  { %v1313_v53 = vrot.slane %v7975_v19, %v8012_v4  ;;  %v1320_v54 = vrot.slane %v7975_v19, %v8027_v13  ;;  %v1327_v15 = vrot.slane %v7975_v19, %v8030_v16  ;;  %v1278_v37 = vrot.slane %v11098_v41, %v8009_v3 }
  0xf3   :  { %508 = vadd.xlane.f32.xlu1 %v8335_v29  ;;  %505 = vadd.xlane.f32.xlu0 %v8379_v7  ;;  %v1285_v17 = vrot.slane %v11098_v41, %v8012_v4  ;;  %v1292_v5 = vrot.slane %v11098_v41, %v8027_v13  ;;  %v1299_v59 = vrot.slane %v11098_v41, %v8030_v16  ;;  %v141_v29 = vld [vmem:[%s10973_s0 + $0x3f8] sm:$0xff] }
  0xf4   :  { %v8551_v8 = vpop.xlane.xlu1 %304  ;;  %v8553_v19 = vpop.xlane.xlu0 %301  ;;  %v8558_v7 = vcombine.low %v1264_v1, %v1271_v33  ;;  %v8560_v24 = vcombine.low %v1222_v34, %v1229_v63  ;;  %v8562_v43 = vcombine.low %v1236_v11, %v1243_v21  ;;  %v8564_v51 = vcombine.low %v4469_v0, %v4476_v50 }
  0xf5   :  { %11099 = vst [vmem:[#allocation6_spill] sm:$0xff] %v8551_v8  ;;  %11100 = vst [vmem:[#allocation43_spill] sm:$0xff] %v8553_v19  ;;  %v1362_v56 = vrot.slane %v11104_v6, %v8009_v3  ;;  %v1369_v41 = vrot.slane %v11104_v6, %v8012_v4  ;;  %v1376_v19 = vrot.slane %v11104_v6, %v8027_v13  ;;  %v525_v0 = vsel %vm143_vm0, %v141_v29, 0.0 }
  0xf6   :  { %11101 = vst [vmem:[#allocation44_spill] sm:$0xff] %v8560_v24  ;;  %11102 = vst [vmem:[#allocation45_spill] sm:$0xff] %v8562_v43  ;;  %v1383_v8 = vrot.slane %v11104_v6, %v8030_v16  ;;  %v8574_v1 = vcombine.low %v1306_v42, %v1313_v53  ;;  %v8576_v33 = vcombine.low %v1320_v54, %v1327_v15  ;;  %v140_v6 = vld [vmem:[%s10973_s0 + $0x3f0] sm:$0xff]  ;;  %s7546_s0 = smov [#allocation3]  }
  0xf7   :  { %11103 = vst [vmem:[#allocation46_spill] sm:$0xff] %v8564_v51  ;;  %514 = vadd.xlane.f32.xlu1 %v8417_v36  ;;  %511 = vadd.xlane.f32.xlu0 %v510_v38  ;;  %v4503_v50 = vrot.slane %v8404_v46, %v8080_v58  ;;  %v8582_v34 = vcombine.low %v1278_v37, %v1285_v17  ;;  %v11110_v38 = vld [vmem:[#allocation8_spill] sm:$0xff]  ;;  %s7501_s30 = sshll.u32 %s7546_s0, 4  ;;  %s7502_s30 = int_to_ptr.vmem [resolvable:$true] %s7501_s30 }
  0xf8   :  { %v8584_v63 = vcombine.low %v1292_v5, %v1299_v59  ;;  %v8586_v11 = vpop.xlane.xlu1 %310  ;;  %v8588_v21 = vpop.xlane.xlu0 %307  ;;  %v8593_v42 = vcombine.low %v4350_v28, %v4357_v55  ;;  %v4510_v36 = vrot.slane %v8406_v44, %v8080_v58  ;;  %v1334_v46 = vrot.slane %v11110_v38, %v8009_v3  ;;  %v11111_v55 = vld [vmem:[#allocation10_spill] sm:$0xff]  ;;  %s7518_s2 = scalar_lea.vmem %s7502_s30, 128  ;;  %p7523_p1 = scmp.lt.s32.totalorder %s7502_s30, %s7502_s30 }
  0xf9   :  { %11105 = vst [vmem:[#allocation7_spill] sm:$0xff] %v8582_v34  ;;  %11107 = vst [vmem:[#allocation48_spill] sm:$0xff] %v8586_v11  ;;  %v1341_v53 = vrot.slane %v11110_v38, %v8012_v4  ;;  %v1348_v54 = vrot.slane %v11110_v38, %v8027_v13  ;;  %v4367_v15 = vrot.slane %v8243_v14, %v8080_v58  ;;  %v522_v14 = vsel %vm143_vm0, %v140_v6, 0.0  ;;  %p7519_p0 = scmp.ne.s32.totalorder %s7502_s30, %s7518_s2  ;;  %p7524_p2 = scmp.lt.s32.totalorder %s7518_s2, %s7518_s2 }
  0xfa   :  { %11106 = vst [vmem:[#allocation47_spill] sm:$0xff] %v8584_v63  ;;  %11108 = vst [vmem:[#allocation49_spill] sm:$0xff] %v8588_v21  ;;  %v8605_v37 = vcombine.low %v1362_v56, %v1369_v41  ;;  %v8607_v17 = vcombine.low %v1376_v19, %v1383_v8  ;;  %v1355_v28 = vrot.slane %v11110_v38, %v8030_v16  ;;  %v11116_v21 = vld [vmem:[#allocation13_spill] sm:$0xff]  ;;  %vm7464_vm0 = vcmask 1041409  }
  0xfb   :  { %11109 = vst [vmem:[#allocation50_spill] sm:$0xff] %v8593_v42  ;;  %v4374_v44 = vrot.slane %v8276_v9, %v8080_v58  ;;  %v1418_v5 = vrot.slane %v11111_v55, %v8009_v3  ;;  %v1425_v59 = vrot.slane %v11111_v55, %v8012_v4  ;;  %520 = vadd.xlane.f32.xlu1 %v519_v10  ;;  %v11112_v9 = vld [vmem:[#allocation11_spill] sm:$0xff]  ;;  %p7525_p3 = por %p7524_p2, %p7523_p1 }
  0xfc   :  { %517 = vadd.xlane.f32.xlu0 %v516_v2  ;;  %v4537_v56 = vrot.slane %v8463_v39, %v8080_v58  ;;  %v1432_v8 = vrot.slane %v11111_v55, %v8027_v13  ;;  %v1439_v19 = vrot.slane %v11111_v55, %v8030_v16  ;;  %v1390_v29 = vrot.slane %v11112_v9, %v8009_v3  ;;  %v8628_v38 = vpop.xlane.xlu1 %316  ;;  %v8630_v10 = vpop.xlane.xlu0 %313  ;;  %v11115_v2 = vld [vmem:[#allocation12_spill] sm:$0xff] }
  0xfd   :  { %v1397_v41 = vrot.slane %v11112_v9, %v8012_v4  ;;  %11113 = vst [vmem:[#allocation8_spill] sm:$0xff] %v8628_v38  ;;  %11114 = vst [vmem:[#allocation10_spill] sm:$0xff] %v8630_v10  ;;  %v1474_v6 = vrot.slane %v11115_v2, %v8009_v3  ;;  %v1404_v39 = vrot.slane %v11112_v9, %v8027_v13  ;;  %p7526_p4 = pnand %p7525_p3, %p7519_p0 }
  0xfe   :  { %v1411_v63 = vrot.slane %v11112_v9, %v8030_v16  ;;  %v4544_v55 = vrot.slane %v8478_v31, %v8080_v58  ;;  %v1481_v34 = vrot.slane %v11115_v2, %v8012_v4  ;;  %v1488_v38 = vrot.slane %v11115_v2, %v8027_v13 }
  0xff   :  { %v1495_v10 = vrot.slane %v11115_v2, %v8030_v16  ;;  %v1446_v43 = vrot.slane %v11116_v21, %v8009_v3  ;;  %v1453_v11 = vrot.slane %v11116_v21, %v8012_v4  ;;  %v1460_v9 = vrot.slane %v11116_v21, %v8027_v13  ;;  %526 = vadd.xlane.f32.xlu1 %v525_v0 }
 0x100   :  { %v1467_v31 = vrot.slane %v11116_v21, %v8030_v16  ;;  %523 = vadd.xlane.f32.xlu0 %v522_v14  ;;  %v8654_v24 = vcombine.low %v1418_v5, %v1425_v59  ;;  %v8656_v27 = vcombine.low %v1334_v46, %v1341_v53  ;;  %v8658_v42 = vcombine.low %v1348_v54, %v1355_v28  ;;  %v8660_v2 = vpop.xlane.xlu1 %322  ;;  %v8662_v20 = vpop.xlane.xlu0 %319  ;;  %v11124_v46 = vld [vmem:[#allocation14_spill] sm:$0xff] }
 0x101   :  { %11119 = vst [vmem:[#allocation13_spill] sm:$0xff] %v8660_v2  ;;  %11120 = vst [vmem:[#allocation51_spill] sm:$0xff] %v8662_v20  ;;  %v8664_v51 = vcombine.low %v4503_v50, %v4510_v36  ;;  %v8666_v61 = vcombine.low %v1432_v8, %v1439_v19  ;;  %v8668_v60 = vcombine.low %v1390_v29, %v1397_v41  ;;  %v11132_v41 = vld [vmem:[#allocation16_spill] sm:$0xff] }
 0x102   :  { %11117 = vst [vmem:[#allocation11_spill] sm:$0xff] %v8656_v27  ;;  %11118 = vst [vmem:[#allocation12_spill] sm:$0xff] %v8658_v42  ;;  %v8670_v48 = vcombine.low %v1404_v39, %v1411_v63  ;;  %v8672_v0 = vcombine.low %v4367_v15, %v4374_v44  ;;  %v8674_v21 = vcombine.low %v1474_v6, %v1481_v34 }
 0x103   :  { %11121 = vst [vmem:[#allocation52_spill] sm:$0xff] %v8668_v60  ;;  %v1530_v53 = vrot.slane %v11124_v46, %v8009_v3  ;;  %v1537_v54 = vrot.slane %v11124_v46, %v8012_v4  ;;  %v4384_v50 = vrot.slane %v8301_v30, %v8080_v58  ;;  %v8682_v36 = vcombine.low %v1488_v38, %v1495_v10 }
 0x104   :  { %11122 = vst [vmem:[#allocation53_spill] sm:$0xff] %v8670_v48  ;;  %11123 = vst [vmem:[#allocation54_spill] sm:$0xff] %v8674_v21  ;;  %v8684_v28 = vcombine.low %v1446_v43, %v1453_v11  ;;  %v8686_v5 = vcombine.low %v1460_v9, %v1467_v31  ;;  %v8688_v63 = vcombine.low %v4537_v56, %v4544_v55  ;;  %v8694_v44 = vpop.xlane.xlu1 %328  ;;  %v8696_v59 = vpop.xlane.xlu0 %325  ;;  %v11130_v11 = vld [vmem:[#allocation15_spill] sm:$0xff]  ;;  %v11133_v55 = vld [vmem:[#allocation17_spill] sm:$0xff] }
 0x105   :  { %11125 = vst [vmem:[#allocation14_spill] sm:$0xff] %v8682_v36  ;;  %v1544_v34 = vrot.slane %v11124_v46, %v8027_v13  ;;  %v1551_v15 = vrot.slane %v11124_v46, %v8030_v16  ;;  %11128 = vst [vmem:[#allocation57_spill] sm:$0xff] %v8694_v44  ;;  %v4391_v30 = vrot.slane %v8303_v12, %v8080_v58 }
 0x106   :  { %11126 = vst [vmem:[#allocation55_spill] sm:$0xff] %v8684_v28  ;;  %11127 = vst [vmem:[#allocation56_spill] sm:$0xff] %v8686_v5  ;;  %v4571_v43 = vrot.slane %v8486_v26, %v8080_v58  ;;  %v1502_v14 = vrot.slane %v11130_v11, %v8009_v3  ;;  %v1509_v56 = vrot.slane %v11130_v11, %v8012_v4 }
 0x107   :  { %11129 = vst [vmem:[#allocation58_spill] sm:$0xff] %v8696_v59  ;;  %v1516_v8 = vrot.slane %v11130_v11, %v8027_v13  ;;  %v1523_v19 = vrot.slane %v11130_v11, %v8030_v16  ;;  %v8710_v29 = vcombine.low %v1530_v53, %v1537_v54  ;;  %v1586_v12 = vrot.slane %v11132_v41, %v8009_v3  ;;  %v11136_v11 = vld [vmem:[#allocation18_spill] sm:$0xff] }
 0x108   :  { %v4578_v26 = vrot.slane %v8494_v62, %v8080_v58  ;;  %v4418_v38 = vrot.slane %v8370_v52, %v8080_v58  ;;  %v1593_v10 = vrot.slane %v11132_v41, %v8012_v4  ;;  %v1600_v6 = vrot.slane %v11132_v41, %v8027_v13  ;;  %v8732_v46 = vpop.xlane.xlu1 %334  ;;  %v8734_v53 = vpop.xlane.xlu0 %331 }
 0x109   :  { %11131 = vst [vmem:[#allocation15_spill] sm:$0xff] %v8710_v29  ;;  %v1607_v39 = vrot.slane %v11132_v41, %v8030_v16  ;;  %v1558_v9 = vrot.slane %v11133_v55, %v8009_v3  ;;  %v1565_v31 = vrot.slane %v11133_v55, %v8012_v4  ;;  %v1572_v62 = vrot.slane %v11133_v55, %v8027_v13 }
 0x10a   :  { %v1579_v52 = vrot.slane %v11133_v55, %v8030_v16  ;;  %11134 = vst [vmem:[#allocation16_spill] sm:$0xff] %v8732_v46  ;;  %11135 = vst [vmem:[#allocation17_spill] sm:$0xff] %v8734_v53  ;;  %v4425_v54 = vrot.slane %v8385_v57, %v8080_v58  ;;  %v1642_v41 = vrot.slane %v11136_v11, %v8009_v3  ;;  %v11137_v55 = vld [vmem:[#allocation19_spill] sm:$0xff] }
 0x10b   :  { %v1649_v5 = vrot.slane %v11136_v11, %v8012_v4  ;;  %v1656_v28 = vrot.slane %v11136_v11, %v8027_v13  ;;  %v1663_v48 = vrot.slane %v11136_v11, %v8030_v16  ;;  %v1614_v60 = vrot.slane %v11137_v55, %v8009_v3 }
 0x10c   :  { %v1621_v53 = vrot.slane %v11137_v55, %v8012_v4  ;;  %v1628_v57 = vrot.slane %v11137_v55, %v8027_v13  ;;  %v1635_v46 = vrot.slane %v11137_v55, %v8030_v16  ;;  %v8754_v42 = vcombine.low %v1544_v34, %v1551_v15  ;;  %v8768_v29 = vpop.xlane.xlu1 %340  ;;  %v8770_v36 = vpop.xlane.xlu0 %337 }
 0x10d   :  { %v8756_v27 = vcombine.low %v1502_v14, %v1509_v56  ;;  %v8758_v59 = vcombine.low %v1516_v8, %v1523_v19  ;;  %v8760_v44 = vcombine.low %v4384_v50, %v4391_v30  ;;  %v8762_v11 = vcombine.low %v1586_v12, %v1593_v10  ;;  %v11145_v10 = vld [vmem:[#allocation25_spill] sm:$0xff] }
 0x10e   :  { %v8764_v20 = vcombine.low %v1600_v6, %v1607_v39  ;;  %v8766_v2 = vcombine.low %v1558_v9, %v1565_v31  ;;  %v8772_v21 = vcombine.low %v4571_v43, %v4578_v26  ;;  %v8774_v34 = vcombine.low %v1642_v41, %v1649_v5  ;;  %v11143_v43 = vld [vmem:[#allocation20_spill] sm:$0xff]  ;;  %v11146_v9 = vld [vmem:[#allocation23_spill] sm:$0xff] }
 0x10f   :  { %11138 = vst [vmem:[#allocation18_spill] sm:$0xff] %v8758_v59  ;;  %v8776_v15 = vcombine.low %v1656_v28, %v1663_v48  ;;  %v8778_v14 = vcombine.low %v1572_v62, %v1579_v52  ;;  %v4605_v50 = vrot.slane %v8526_v25, %v8080_v58  ;;  %v8782_v30 = vcombine.low %v1614_v60, %v1621_v53  ;;  %v11144_v25 = vld [vmem:[#allocation21_spill] sm:$0xff] }
 0x110   :  { %11139 = vst [vmem:[#allocation19_spill] sm:$0xff] %v8766_v2  ;;  %v8784_v56 = vcombine.low %v1628_v57, %v1635_v46  ;;  %v8786_v8 = vcombine.low %v4418_v38, %v4425_v54  ;;  %v4612_v19 = vrot.slane %v8558_v7, %v8080_v58  ;;  %v1698_v5 = vrot.slane %v11143_v43, %v8009_v3  ;;  %v8804_v38 = vpop.xlane.xlu1 %346  ;;  %v8807_v6 = vpop.xlane.xlu0 %343 }
 0x111   :  { %11140 = vst [vmem:[#allocation59_spill] sm:$0xff] %v8778_v14  ;;  %11141 = vst [vmem:[#allocation60_spill] sm:$0xff] %v8782_v30  ;;  %v1705_v48 = vrot.slane %v11143_v43, %v8012_v4  ;;  %v1712_v28 = vrot.slane %v11143_v43, %v8027_v13  ;;  %v1719_v60 = vrot.slane %v11143_v43, %v8030_v16  ;;  %6420 = vperm.xlu1 %7517, %v11145_v10  }
 0x112   :  { %11142 = vst [vmem:[#allocation61_spill] sm:$0xff] %v8784_v56  ;;  %v1670_v12 = vrot.slane %v11144_v25, %v8009_v3  ;;  %v1677_v26 = vrot.slane %v11144_v25, %v8012_v4  ;;  %v1684_v7 = vrot.slane %v11144_v25, %v8027_v13  ;;  %v4452_v39 = vrot.slane %v8396_v35, %v8080_v58  ;;  %v11147_v35 = vld [vmem:[#allocation24_spill] sm:$0xff] }
 0x113   :  { %v1754_v31 = vrot.slane %v11146_v9, %v8009_v3  ;;  %v1761_v62 = vrot.slane %v11146_v9, %v8012_v4  ;;  %v1691_v52 = vrot.slane %v11144_v25, %v8030_v16  ;;  %v4459_v46 = vrot.slane %v8398_v47, %v8080_v58 }
 0x114   :  { %v1768_v53 = vrot.slane %v11146_v9, %v8027_v13  ;;  %v1775_v54 = vrot.slane %v11146_v9, %v8030_v16  ;;  %v1726_v41 = vrot.slane %v11147_v35, %v8009_v3  ;;  %v1733_v55 = vrot.slane %v11147_v35, %v8012_v4  ;;  %v8841_v30 = vpop.xlane.xlu1 %352 }
 0x115   :  { %v8827_v57 = vcombine.low %v1698_v5, %v1705_v48  ;;  %v8829_v43 = vcombine.low %v1712_v28, %v1719_v60  ;;  %v1740_v25 = vrot.slane %v11147_v35, %v8027_v13  ;;  %v1747_v47 = vrot.slane %v11147_v35, %v8030_v16  ;;  %v11149_v5 = vld [vmem:[#allocation22_spill] sm:$0xff]  ;;  %v8844_v48 = vpop.xlane.xlu0 %349 }
 0x116   :  { %v8835_v10 = vcombine.low %v1670_v12, %v1677_v26  ;;  %v1810_v9 = vrot.slane %v8305_v40, %v8009_v3  ;;  %v1817_v56 = vrot.slane %v8305_v40, %v8012_v4  ;;  %6423 = vperm.xlu1 %7517, %v11149_v5   ;;  %v8846_v28 = vcombine.low %v4605_v50, %v4612_v19 }
 0x117   :  { %v8848_v60 = vcombine.low %v1684_v7, %v1691_v52  ;;  %v1824_v12 = vrot.slane %v8305_v40, %v8027_v13  ;;  %v1831_v26 = vrot.slane %v8305_v40, %v8030_v16  ;;  %6417 = vperm.xlu0 %7516, %v8312_v22   ;;  %v4639_v35 = vrot.slane %v8574_v1, %v8080_v58 }
 0x118   :  { %11148 = vst [vmem:[#allocation20_spill] sm:$0xff] %v8835_v10  ;;  %v8857_v10 = vcombine.low %v1754_v31, %v1761_v62  ;;  %v8859_v5 = vcombine.low %v1768_v53, %v1775_v54  ;;  %v8861_v14 = vcombine.low %v1726_v41, %v1733_v55  ;;  %v8863_v50 = vcombine.low %v4452_v39, %v4459_v46  ;;  %v8881_v52 = vpop.xlane.xlu1 %358  ;;  %v11155_v46 = vld [vmem:[#allocation26_spill] sm:$0xff] }
 0x119   :  { %11150 = vst [vmem:[#allocation21_spill] sm:$0xff] %v8848_v60  ;;  %v8865_v19 = vcombine.low %v1740_v25, %v1747_v47  ;;  %v1782_v7 = vrot.slane %v8307_v45, %v8009_v3  ;;  %v4646_v40 = vrot.slane %v8576_v33, %v8080_v58  ;;  %v4486_v22 = vrot.slane %v8412_v18, %v8080_v58  ;;  %v8884_v53 = vpop.xlane.xlu0 %355  ;;  %v11158_v18 = vld [vmem:[#allocation27_spill] sm:$0xff]  ;;  %v11159_v47 = vld [vmem:[#allocation28_spill] sm:$0xff]  ;;  %v11161_v60 = vld [vmem:[#allocation30_spill] sm:$0xff] }
 0x11a   :  { %11151 = vst [vmem:[#allocation25_spill] sm:$0xff] %v8861_v14  ;;  %v8873_v1 = vcombine.low %v1810_v9, %v1817_v56  ;;  %v1789_v31 = vrot.slane %v8307_v45, %v8012_v4  ;;  %v1796_v39 = vrot.slane %v8307_v45, %v8027_v13  ;;  %v1803_v62 = vrot.slane %v8307_v45, %v8030_v16 }
 0x11b   :  { %11152 = vst [vmem:[#allocation23_spill] sm:$0xff] %v8865_v19  ;;  %11154 = vst [vmem:[#allocation22_spill] sm:$0xff] %v8881_v52  ;;  %6426 = vperm.xlu1 %7517, %v11155_v46   ;;  %v8886_v33 = vcombine.low %v1824_v12, %v1831_v26  ;;  %v1866_v56 = vrot.slane %v11158_v18, %v8009_v3  ;;  %6444 = vperm.xlu0 %7516, %v8394_v49  }
 0x11c   :  { %11153 = vst [vmem:[#allocation24_spill] sm:$0xff] %v8873_v1  ;;  %11156 = vst [vmem:[#allocation26_spill] sm:$0xff] %v8884_v53  ;;  %v4493_v54 = vrot.slane %v8465_v23, %v8080_v58  ;;  %v4673_v41 = vrot.slane %v8605_v37, %v8080_v58  ;;  %v1873_v45 = vrot.slane %v11158_v18, %v8012_v4  ;;  %v8919_v14 = vpop.xlane.xlu1 %364  ;;  %v11165_v1 = vld [vmem:[#allocation37_spill] sm:$0xff] }
 0x11d   :  { %11157 = vst [vmem:[#allocation62_spill] sm:$0xff] %v8886_v33  ;;  %v1880_v55 = vrot.slane %v11158_v18, %v8027_v13  ;;  %v1887_v25 = vrot.slane %v11158_v18, %v8030_v16  ;;  %v1838_v9 = vrot.slane %v11159_v47, %v8009_v3  ;;  %v1845_v49 = vrot.slane %v11159_v47, %v8012_v4 }
 0x11e   :  { %v1852_v23 = vrot.slane %v11159_v47, %v8027_v13  ;;  %v1859_v37 = vrot.slane %v11159_v47, %v8030_v16  ;;  %v4680_v12 = vrot.slane %v8607_v17, %v8080_v58  ;;  %v1922_v26 = vrot.slane %v8387_v32, %v8009_v3  ;;  %11160 = vst [vmem:[#allocation27_spill] sm:$0xff] %v8919_v14  ;;  %v8922_v47 = vpop.xlane.xlu0 %361  ;;  %v11164_v17 = vld [vmem:[#allocation29_spill] sm:$0xff] }
 0x11f   :  { %v1929_v46 = vrot.slane %v8387_v32, %v8012_v4  ;;  %v1936_v18 = vrot.slane %v8387_v32, %v8027_v13  ;;  %v1943_v19 = vrot.slane %v8387_v32, %v8030_v16  ;;  %6429 = vperm.xlu1 %7517, %v11161_v60   ;;  %11162 = vst [vmem:[#allocation28_spill] sm:$0xff] %v8922_v47  ;;  %v11171_v47 = vld [vmem:[#allocation35_spill] sm:$0xff] }
 0x120   :  { %v8924_v2 = vcombine.low %v1782_v7, %v1789_v31  ;;  %v1894_v33 = vrot.slane %v11164_v17, %v8009_v3  ;;  %v1901_v53 = vrot.slane %v11164_v17, %v8012_v4  ;;  %6450 = vperm.xlu0 %7516, %v11165_v1   ;;  %v8931_v52 = vcombine.low %v4639_v35, %v4646_v40 }
 0x121   :  { %v8933_v59 = vcombine.low %v1866_v56, %v1873_v45  ;;  %v8935_v32 = vcombine.low %v1880_v55, %v1887_v25  ;;  %v8937_v14 = vcombine.low %v1796_v39, %v1803_v62  ;;  %v8939_v60 = vcombine.low %v4486_v22, %v4493_v54  ;;  %v8955_v62 = vpop.xlane.xlu1 %370  ;;  %v11175_v22 = vld [vmem:[#allocation39_spill] sm:$0xff] }
 0x122   :  { %11163 = vst [vmem:[#allocation30_spill] sm:$0xff] %v8924_v2  ;;  %v8941_v7 = vcombine.low %v1838_v9, %v1845_v49  ;;  %v8943_v31 = vcombine.low %v1852_v23, %v1859_v37  ;;  %v1908_v2 = vrot.slane %v11164_v17, %v8027_v13  ;;  %v4520_v1 = vrot.slane %v11171_v47, %v8080_v58  ;;  %v8958_v56 = vpop.xlane.xlu0 %367  ;;  %v11177_v45 = vld [vmem:[#allocation31_spill] sm:$0xff]  ;;  %v11179_v9 = vld [vmem:[#allocation46_spill] sm:$0xff]  ;;  %v11182_v47 = vld [vmem:[#allocation33_spill] sm:$0xff] }
 0x123   :  { %11166 = vst [vmem:[#allocation29_spill] sm:$0xff] %v8933_v59  ;;  %11167 = vst [vmem:[#allocation37_spill] sm:$0xff] %v8935_v32  ;;  %v8949_v35 = vcombine.low %v1922_v26, %v1929_v46  ;;  %v8951_v40 = vcombine.low %v1936_v18, %v1943_v19  ;;  %v1915_v39 = vrot.slane %v11164_v17, %v8030_v16  ;;  %6432 = vperm.xlu1 %7517, %v11175_v22   ;;  %v11180_v19 = vld [vmem:[#allocation36_spill] sm:$0xff]  ;;  %v11192_v32 = vld [vmem:[#allocation41_spill] sm:$0xff] }
 0x124   :  { %11168 = vst [vmem:[#allocation63_spill] sm:$0xff] %v8937_v14  ;;  %11169 = vst [vmem:[#allocation64_spill] sm:$0xff] %v8941_v7  ;;  %v8960_v54 = vcombine.low %v4673_v41, %v4680_v12  ;;  %v1978_v55 = vrot.slane %v11177_v45, %v8009_v3  ;;  %v8964_v25 = vcombine.low %v1894_v33, %v1901_v53  ;;  %6456 = vperm.xlu0 %7516, %v11179_v9   ;;  %v11181_v53 = vld [vmem:[#allocation32_spill] sm:$0xff] }
 0x125   :  { %11170 = vst [vmem:[#allocation65_spill] sm:$0xff] %v8943_v31  ;;  %11172 = vst [vmem:[#allocation35_spill] sm:$0xff] %v8949_v35  ;;  %v4527_v49 = vrot.slane %v11180_v19, %v8080_v58  ;;  %v4707_v23 = vrot.slane %v8654_v24, %v8080_v58  ;;  %v1985_v37 = vrot.slane %v11177_v45, %v8012_v4  ;;  %v8995_v19 = vpop.xlane.xlu1 %376 }
 0x126   :  { %11173 = vst [vmem:[#allocation66_spill] sm:$0xff] %v8951_v40  ;;  %11174 = vst [vmem:[#allocation67_spill] sm:$0xff] %v8955_v62  ;;  %v1992_v41 = vrot.slane %v11177_v45, %v8027_v13  ;;  %v1999_v12 = vrot.slane %v11177_v45, %v8030_v16  ;;  %v1950_v33 = vrot.slane %v11181_v53, %v8009_v3 }
 0x127   :  { %11176 = vst [vmem:[#allocation39_spill] sm:$0xff] %v8958_v56  ;;  %11178 = vst [vmem:[#allocation31_spill] sm:$0xff] %v8964_v25  ;;  %v1957_v26 = vrot.slane %v11181_v53, %v8012_v4  ;;  %v1964_v46 = vrot.slane %v11181_v53, %v8027_v13  ;;  %v1971_v24 = vrot.slane %v11181_v53, %v8030_v16  ;;  %v11184_v25 = vld [vmem:[#allocation50_spill] sm:$0xff]  ;;  %v8998_v53 = vpop.xlane.xlu0 %373 }
 0x128   :  { %v4714_v18 = vrot.slane %v8666_v61, %v8080_v58  ;;  %v2034_v17 = vrot.slane %v11182_v47, %v8009_v3  ;;  %v2041_v22 = vrot.slane %v11182_v47, %v8012_v4  ;;  %v2048_v45 = vrot.slane %v11182_v47, %v8027_v13  ;;  %11183 = vst [vmem:[#allocation46_spill] sm:$0xff] %v8995_v19  ;;  %v11186_v61 = vld [vmem:[#allocation34_spill] sm:$0xff] }
 0x129   :  { %v2055_v9 = vrot.slane %v11182_v47, %v8030_v16  ;;  %6435 = vperm.xlu1 %7517, %v11184_v25   ;;  %11185 = vst [vmem:[#allocation36_spill] sm:$0xff] %v8998_v53  ;;  %v2006_v31 = vrot.slane %v11186_v61, %v8009_v3  ;;  %v2013_v7 = vrot.slane %v11186_v61, %v8012_v4 }
 0x12a   :  { %v2020_v14 = vrot.slane %v11186_v61, %v8027_v13  ;;  %v2027_v40 = vrot.slane %v11186_v61, %v8030_v16  ;;  %6462 = vperm.xlu0 %7516, %v8664_v51   ;;  %v9009_v47 = vcombine.low %v1978_v55, %v1985_v37  ;;  %v9011_v19 = vcombine.low %v1992_v41, %v1999_v12  ;;  %v9029_v55 = vpop.xlane.xlu1 %382  ;;  %v11200_v12 = vld [vmem:[#allocation40_spill] sm:$0xff] }
 0x12b   :  { %v9013_v25 = vcombine.low %v1908_v2, %v1915_v39  ;;  %v9015_v53 = vcombine.low %v4520_v1, %v4527_v49  ;;  %v9017_v35 = vcombine.low %v1950_v33, %v1957_v26  ;;  %v9019_v56 = vcombine.low %v1964_v46, %v1971_v24  ;;  %11195 = vst [vmem:[#allocation70_spill] sm:$0xff] %v9029_v55  ;;  %v9032_v2 = vpop.xlane.xlu0 %379  ;;  %v11197_v39 = vld [vmem:[#allocation38_spill] sm:$0xff] }
 0x12c   :  { %11187 = vst [vmem:[#allocation32_spill] sm:$0xff] %v9009_v47  ;;  %11188 = vst [vmem:[#allocation33_spill] sm:$0xff] %v9011_v19  ;;  %v2090_v59 = vrot.slane %v11192_v32, %v8009_v3  ;;  %v2097_v61 = vrot.slane %v11192_v32, %v8012_v4  ;;  %v9025_v62 = vcombine.low %v2034_v17, %v2041_v22  ;;  %v11201_v26 = vld [vmem:[#allocation54_spill] sm:$0xff] }
 0x12d   :  { %11189 = vst [vmem:[#allocation50_spill] sm:$0xff] %v9013_v25  ;;  %11190 = vst [vmem:[#allocation34_spill] sm:$0xff] %v9017_v35  ;;  %v9027_v51 = vcombine.low %v2048_v45, %v2055_v9  ;;  %6438 = vperm.xlu1 %7517, %v8672_v0   ;;  %v9034_v1 = vcombine.low %v4707_v23, %v4714_v18  ;;  %v4554_v49 = vrot.slane %v11197_v39, %v8080_v58  ;;  %v11202_v24 = vld [vmem:[#allocation42_spill] sm:$0xff]  ;;  %v11208_v39 = vld [vmem:[#allocation44_spill] sm:$0xff] }
 0x12e   :  { %11191 = vst [vmem:[#allocation68_spill] sm:$0xff] %v9019_v56  ;;  %11193 = vst [vmem:[#allocation41_spill] sm:$0xff] %v9025_v62  ;;  %v9038_v37 = vcombine.low %v2006_v31, %v2013_v7  ;;  %v9040_v41 = vcombine.low %v2020_v14, %v2027_v40  ;;  %6468 = vperm.xlu0 %7516, %v8688_v63   ;;  %v4561_v33 = vrot.slane %v11200_v12, %v8080_v58  ;;  %v11204_v18 = vld [vmem:[#allocation14_spill] sm:$0xff]  ;;  %v11211_v35 = vld [vmem:[#allocation45_spill] sm:$0xff] }
 0x12f   :  { %11194 = vst [vmem:[#allocation69_spill] sm:$0xff] %v9027_v51  ;;  %11196 = vst [vmem:[#allocation71_spill] sm:$0xff] %v9032_v2  ;;  %v4741_v46 = vrot.slane %v11201_v26, %v8080_v58  ;;  %v2104_v0 = vrot.slane %v11192_v32, %v8027_v13  ;;  %v2111_v23 = vrot.slane %v11192_v32, %v8030_v16  ;;  %v11205_v22 = vld [vmem:[#allocation6_spill] sm:$0xff] }
 0x130   :  { %11198 = vst [vmem:[#allocation38_spill] sm:$0xff] %v9038_v37  ;;  %11199 = vst [vmem:[#allocation72_spill] sm:$0xff] %v9040_v41  ;;  %v2062_v7 = vrot.slane %v11202_v24, %v8009_v3  ;;  %v2069_v14 = vrot.slane %v11202_v24, %v8012_v4  ;;  %v9055_v31 = vcombine.low %v2090_v59, %v2097_v61  ;;  %v9069_v59 = vpop.xlane.xlu1 %388  ;;  %v9072_v61 = vpop.xlane.xlu0 %385 }
 0x131   :  { %v2076_v63 = vrot.slane %v11202_v24, %v8027_v13  ;;  %v2083_v40 = vrot.slane %v11202_v24, %v8030_v16  ;;  %v4748_v17 = vrot.slane %v11204_v18, %v8080_v58  ;;  %v2146_v32 = vrot.slane %v11205_v22, %v8009_v3  ;;  %11206 = vst [vmem:[#allocation54_spill] sm:$0xff] %v9069_v59  ;;  %v11209_v24 = vld [vmem:[#allocation43_spill] sm:$0xff] }
 0x132   :  { %11203 = vst [vmem:[#allocation40_spill] sm:$0xff] %v9055_v31  ;;  %v2153_v45 = vrot.slane %v11205_v22, %v8012_v4  ;;  %v2160_v9 = vrot.slane %v11205_v22, %v8027_v13  ;;  %6441 = vperm.xlu1 %7517, %v8760_v44   ;;  %11207 = vst [vmem:[#allocation42_spill] sm:$0xff] %v9072_v61  ;;  %v4588_v12 = vrot.slane %v11208_v39, %v8080_v58  ;;  %v11210_v44 = vld [vmem:[#allocation48_spill] sm:$0xff] }
 0x133   :  { %v2167_v26 = vrot.slane %v11205_v22, %v8030_v16  ;;  %v2118_v18 = vrot.slane %v11209_v24, %v8009_v3  ;;  %v2125_v41 = vrot.slane %v11209_v24, %v8012_v4  ;;  %v2132_v37 = vrot.slane %v11209_v24, %v8027_v13  ;;  %6474 = vperm.xlu0 %7516, %v8772_v21   ;;  %v11212_v21 = vld [vmem:[#allocation49_spill] sm:$0xff] }
 0x134   :  { %v2202_v56 = vrot.slane %v11210_v44, %v8009_v3  ;;  %v2209_v39 = vrot.slane %v11210_v44, %v8012_v4  ;;  %v2139_v22 = vrot.slane %v11209_v24, %v8030_v16  ;;  %v4595_v25 = vrot.slane %v11211_v35, %v8080_v58  ;;  %v9107_v2 = vpop.xlane.xlu1 %394  ;;  %v9110_v55 = vpop.xlane.xlu0 %391 }
 0x135   :  { %v2216_v31 = vrot.slane %v11210_v44, %v8027_v13  ;;  %v2223_v61 = vrot.slane %v11210_v44, %v8030_v16  ;;  %v2174_v59 = vrot.slane %v11212_v21, %v8009_v3  ;;  %v2181_v51 = vrot.slane %v11212_v21, %v8012_v4  ;;  %11214 = vst [vmem:[#allocation6_spill] sm:$0xff] %v9107_v2 }
 0x136   :  { %v9101_v62 = vcombine.low %v2104_v0, %v2111_v23  ;;  %v2188_v24 = vrot.slane %v11212_v21, %v8027_v13  ;;  %v2195_v35 = vrot.slane %v11212_v21, %v8030_v16  ;;  %6447 = vperm.xlu1 %7517, %v8786_v8   ;;  %v9112_v44 = vcombine.low %v4554_v49, %v4561_v33  ;;  %v11219_v8 = vld [vmem:[#allocation15_spill] sm:$0xff] }
 0x137   :  { %v9114_v19 = vcombine.low %v2146_v32, %v2153_v45  ;;  %v9116_v47 = vcombine.low %v2160_v9, %v2167_v26  ;;  %v9118_v0 = vcombine.low %v2062_v7, %v2069_v14  ;;  %v9120_v23 = vcombine.low %v2076_v63, %v2083_v40  ;;  %6480 = vperm.xlu0 %7516, %v8846_v28   ;;  %v11221_v14 = vld [vmem:[#allocation8_spill] sm:$0xff]  ;;  %v11223_v63 = vld [vmem:[#allocation10_spill] sm:$0xff]  ;;  %v11224_v9 = vld [vmem:[#allocation7_spill] sm:$0xff] }
 0x138   :  { %11213 = vst [vmem:[#allocation14_spill] sm:$0xff] %v9101_v62  ;;  %v9123_v62 = vcombine.low %v2118_v18, %v2125_v41  ;;  %v9125_v21 = vcombine.low %v2132_v37, %v2139_v22  ;;  %v9127_v2 = vcombine.low %v4741_v46, %v4748_v17  ;;  %v4775_v49 = vrot.slane %v11219_v8, %v8080_v58  ;;  %v9145_v46 = vpop.xlane.xlu1 %400  ;;  %v11226_v26 = vld [vmem:[#allocation13_spill] sm:$0xff] }
 0x139   :  { %11215 = vst [vmem:[#allocation44_spill] sm:$0xff] %v9118_v0  ;;  %11216 = vst [vmem:[#allocation43_spill] sm:$0xff] %v9120_v23  ;;  %v9131_v33 = vcombine.low %v2202_v56, %v2209_v39  ;;  %v9133_v32 = vcombine.low %v2216_v31, %v2223_v61  ;;  %v9135_v45 = vcombine.low %v2174_v59, %v2181_v51  ;;  %v9148_v56 = vpop.xlane.xlu0 %397  ;;  %v11225_v61 = vld [vmem:[#allocation47_spill] sm:$0xff] }
 0x13a   :  { %11217 = vst [vmem:[#allocation48_spill] sm:$0xff] %v9123_v62  ;;  %11218 = vst [vmem:[#allocation45_spill] sm:$0xff] %v9125_v21  ;;  %v9137_v7 = vcombine.low %v4588_v12, %v4595_v25  ;;  %v2258_v28 = vrot.slane %v11221_v14, %v8009_v3  ;;  %v2265_v37 = vrot.slane %v11221_v14, %v8012_v4  ;;  %6453 = vperm.xlu1 %7517, %v8863_v50   ;;  %v11229_v62 = vld [vmem:[#allocation57_spill] sm:$0xff] }
 0x13b   :  { %11220 = vst [vmem:[#allocation49_spill] sm:$0xff] %v9135_v45  ;;  %v9143_v41 = vcombine.low %v2188_v24, %v2195_v35  ;;  %v4782_v51 = vrot.slane %v8754_v42, %v8080_v58  ;;  %v2272_v25 = vrot.slane %v11221_v14, %v8027_v13  ;;  %v2279_v31 = vrot.slane %v11221_v14, %v8030_v16  ;;  %v11227_v24 = vld [vmem:[#allocation51_spill] sm:$0xff] }
 0x13c   :  { %v2230_v40 = vrot.slane %v11223_v63, %v8009_v3  ;;  %v2237_v17 = vrot.slane %v11223_v63, %v8012_v4  ;;  %6486 = vperm.xlu0 %7516, %v8931_v52   ;;  %v2244_v50 = vrot.slane %v11223_v63, %v8027_v13  ;;  %v2251_v42 = vrot.slane %v11223_v63, %v8030_v16 }
 0x13d   :  { %11222 = vst [vmem:[#allocation15_spill] sm:$0xff] %v9143_v41  ;;  %v4622_v59 = vrot.slane %v11224_v9, %v8080_v58  ;;  %v4629_v12 = vrot.slane %v11225_v61, %v8080_v58  ;;  %v2314_v18 = vrot.slane %v11226_v26, %v8009_v3  ;;  %v2321_v39 = vrot.slane %v11226_v26, %v8012_v4  ;;  %v9185_v9 = vpop.xlane.xlu1 %406  ;;  %v9188_v61 = vpop.xlane.xlu0 %403 }
 0x13e   :  { %v2328_v52 = vrot.slane %v11226_v26, %v8027_v13  ;;  %v2335_v22 = vrot.slane %v11226_v26, %v8030_v16  ;;  %v2286_v35 = vrot.slane %v11227_v24, %v8009_v3  ;;  %v2293_v8 = vrot.slane %v11227_v24, %v8012_v4  ;;  %6459 = vperm.xlu1 %7517, %v8939_v60  }
 0x13f   :  { %v2300_v14 = vrot.slane %v11227_v24, %v8027_v13  ;;  %v2307_v63 = vrot.slane %v11227_v24, %v8030_v16  ;;  %v9190_v41 = vcombine.low %v2258_v28, %v2265_v37  ;;  %v9192_v26 = vcombine.low %v2272_v25, %v2279_v31 }
 0x140   :  { %v9194_v45 = vcombine.low %v2230_v40, %v2237_v17  ;;  %6492 = vperm.xlu0 %7516, %v8960_v54   ;;  %v4783_v21 = vcombine.low %v4775_v49, %v4782_v51  ;;  %v2370_v23 = vrot.slane %v11229_v62, %v8009_v3  ;;  %v2377_v24 = vrot.slane %v11229_v62, %v8012_v4 }
 0x141   :  { %v2384_v60 = vrot.slane %v11229_v62, %v8027_v13  ;;  %v2391_v28 = vrot.slane %v11229_v62, %v8030_v16  ;;  %v9205_v37 = vcombine.low %v2314_v18, %v2321_v39  ;;  %v9207_v25 = vcombine.low %v2328_v52, %v2335_v22  ;;  %v9217_v40 = vpop.xlane.xlu1 %412  ;;  %v9220_v17 = vpop.xlane.xlu0 %409  ;;  %v11234_v39 = vld [vmem:[#allocation11_spill] sm:$0xff]  ;;  %v11235_v22 = vld [vmem:[#allocation12_spill] sm:$0xff] }
 0x142   :  { %11228 = vst [vmem:[#allocation8_spill] sm:$0xff] %v9194_v45  ;;  %v9209_v31 = vcombine.low %v2244_v50, %v2251_v42  ;;  %v4809_v54 = vrot.slane %v8762_v11, %v8080_v58  ;;  %v9213_v49 = vcombine.low %v2286_v35, %v2293_v8  ;;  %v9215_v51 = vcombine.low %v2300_v14, %v2307_v63  ;;  %v11233_v50 = vld [vmem:[#allocation58_spill] sm:$0xff]  ;;  %v11238_v8 = vld [vmem:[#allocation16_spill] sm:$0xff] }
 0x143   :  { %6465 = vperm.xlu1 %7517, %v9015_v53   ;;  %v4630_v62 = vcombine.low %v4622_v59, %v4629_v12  ;;  %v4816_v18 = vrot.slane %v8764_v20, %v8080_v58  ;;  %v2342_v42 = vrot.slane %v11233_v50, %v8009_v3  ;;  %v2349_v11 = vrot.slane %v11233_v50, %v8012_v4 }
 0x144   :  { %11230 = vst [vmem:[#allocation10_spill] sm:$0xff] %v9209_v31  ;;  %11231 = vst [vmem:[#allocation7_spill] sm:$0xff] %v9213_v49  ;;  %6498 = vperm.xlu0 %7516, %v9034_v1   ;;  %v4656_v52 = vrot.slane %v11234_v39, %v8080_v58  ;;  %v4663_v53 = vrot.slane %v11235_v22, %v8080_v58  ;;  %v9233_v35 = vcombine.low %v2370_v23, %v2377_v24 }
 0x145   :  { %11232 = vst [vmem:[#allocation47_spill] sm:$0xff] %v9215_v51  ;;  %v9235_v59 = vcombine.low %v2384_v60, %v2391_v28  ;;  %v2356_v20 = vrot.slane %v11233_v50, %v8027_v13  ;;  %v2363_v12 = vrot.slane %v11233_v50, %v8030_v16  ;;  %v2426_v14 = vrot.slane %v11238_v8, %v8009_v3  ;;  %v11239_v28 = vld [vmem:[#allocation17_spill] sm:$0xff]  ;;  %v9257_v22 = vpop.xlane.xlu1 %418 }
 0x146   :  { %11236 = vst [vmem:[#allocation13_spill] sm:$0xff] %v9233_v35  ;;  %v2433_v1 = vrot.slane %v11238_v8, %v8012_v4  ;;  %v4843_v63 = vrot.slane %v8774_v34, %v8080_v58  ;;  %v4850_v23 = vrot.slane %v8776_v15, %v8080_v58  ;;  %v2440_v24 = vrot.slane %v11238_v8, %v8027_v13  ;;  %v9260_v34 = vpop.xlane.xlu0 %415 }
 0x147   :  { %11237 = vst [vmem:[#allocation51_spill] sm:$0xff] %v9235_v59  ;;  %v2447_v60 = vrot.slane %v11238_v8, %v8030_v16  ;;  %v2398_v50 = vrot.slane %v11239_v28, %v8009_v3  ;;  %v2405_v39 = vrot.slane %v11239_v28, %v8012_v4  ;;  %11240 = vst [vmem:[#allocation57_spill] sm:$0xff] %v9257_v22  ;;  %6471 = vperm.xlu1 %7517, %v9112_v44  }
 0x148   :  { %11241 = vst [vmem:[#allocation58_spill] sm:$0xff] %v9260_v34  ;;  %v2412_v15 = vrot.slane %v11239_v28, %v8027_v13  ;;  %v2419_v51 = vrot.slane %v11239_v28, %v8030_v16  ;;  %6504 = vperm.xlu0 %7516, %v9127_v2   ;;  %v4817_v8 = vcombine.low %v4809_v54, %v4816_v18  ;;  %v11244_v2 = vld [vmem:[#allocation52_spill] sm:$0xff]  ;;  %v11245_v18 = vld [vmem:[#allocation53_spill] sm:$0xff] }
 0x149   :  { %v4664_v49 = vcombine.low %v4656_v52, %v4663_v53  ;;  %v2482_v31 = vrot.slane %v8768_v29, %v8009_v3  ;;  %v2489_v45 = vrot.slane %v8768_v29, %v8012_v4  ;;  %v2496_v44 = vrot.slane %v8768_v29, %v8027_v13  ;;  %v9289_v0 = vpop.xlane.xlu1 %424 }
 0x14a   :  { %v2503_v34 = vrot.slane %v8768_v29, %v8030_v16  ;;  %v9275_v22 = vcombine.low %v2342_v42, %v2349_v11  ;;  %v9277_v59 = vcombine.low %v2356_v20, %v2363_v12  ;;  %v4690_v54 = vrot.slane %v11244_v2, %v8080_v58  ;;  %v9292_v29 = vpop.xlane.xlu0 %421 }
 0x14b   :  { %v4697_v52 = vrot.slane %v11245_v18, %v8080_v58  ;;  %v9283_v53 = vcombine.low %v2426_v14, %v2433_v1  ;;  %v9285_v28 = vcombine.low %v2440_v24, %v2447_v60  ;;  %v9287_v35 = vcombine.low %v2398_v50, %v2405_v39  ;;  %6477 = vperm.xlu1 %7517, %v9137_v7   ;;  %v11249_v60 = vld [vmem:[#allocation55_spill] sm:$0xff]  ;;  %v11250_v50 = vld [vmem:[#allocation56_spill] sm:$0xff] }
 0x14c   :  { %11242 = vst [vmem:[#allocation11_spill] sm:$0xff] %v9275_v22  ;;  %11243 = vst [vmem:[#allocation12_spill] sm:$0xff] %v9277_v59  ;;  %v4851_v42 = vcombine.low %v4843_v63, %v4850_v23  ;;  %v9294_v11 = vcombine.low %v2412_v15, %v2419_v51  ;;  %v2454_v20 = vrot.slane %v8770_v36, %v8009_v3  ;;  %6510 = vperm.xlu0 %7516, %v4783_v21  }
 0x14d   :  { %11246 = vst [vmem:[#allocation16_spill] sm:$0xff] %v9287_v35  ;;  %v2461_v12 = vrot.slane %v8770_v36, %v8012_v4  ;;  %v4877_v14 = vrot.slane %v8827_v57, %v8080_v58  ;;  %v9302_v1 = vcombine.low %v2482_v31, %v2489_v45  ;;  %v9304_v24 = vcombine.low %v2496_v44, %v2503_v34  ;;  %v9324_v34 = vpop.xlane.xlu1 %430 }
 0x14e   :  { %11247 = vst [vmem:[#allocation17_spill] sm:$0xff] %v9294_v11  ;;  %v2468_v7 = vrot.slane %v8770_v36, %v8027_v13  ;;  %v2475_v51 = vrot.slane %v8770_v36, %v8030_v16  ;;  %v4698_v63 = vcombine.low %v4690_v54, %v4697_v52  ;;  %v4884_v23 = vrot.slane %v8829_v43, %v8080_v58  ;;  %v9326_v43 = vpop.xlane.xlu0 %427 }
 0x14f   :  { %11248 = vst [vmem:[#allocation52_spill] sm:$0xff] %v9304_v24  ;;  %v4724_v21 = vrot.slane %v11249_v60, %v8080_v58  ;;  %v4731_v57 = vrot.slane %v11250_v50, %v8080_v58  ;;  %v2538_v45 = vrot.slane %v8804_v38, %v8009_v3  ;;  %v2545_v31 = vrot.slane %v8804_v38, %v8012_v4 }
 0x150   :  { %v2552_v39 = vrot.slane %v8804_v38, %v8027_v13  ;;  %v2559_v36 = vrot.slane %v8804_v38, %v8030_v16  ;;  %11251 = vst [vmem:[#allocation53_spill] sm:$0xff] %v9324_v34  ;;  %6483 = vperm.xlu1 %7517, %v4630_v62   ;;  %11252 = vst [vmem:[#allocation55_spill] sm:$0xff] %v9326_v43  ;;  %v2510_v15 = vrot.slane %v8807_v6, %v8009_v3 }
 0x151   :  { %v2517_v44 = vrot.slane %v8807_v6, %v8012_v4  ;;  %v2524_v2 = vrot.slane %v8807_v6, %v8027_v13  ;;  %v2531_v54 = vrot.slane %v8807_v6, %v8030_v16  ;;  %6516 = vperm.xlu0 %7516, %v4817_v8   ;;  %v2594_v38 = vrot.slane %v8841_v30, %v8009_v3 }
 0x152   :  { %v2601_v62 = vrot.slane %v8841_v30, %v8012_v4  ;;  %v2608_v18 = vrot.slane %v8841_v30, %v8027_v13  ;;  %v2615_v52 = vrot.slane %v8841_v30, %v8030_v16  ;;  %v2566_v60 = vrot.slane %v8844_v48, %v8009_v3  ;;  %v9360_v30 = vpop.xlane.xlu1 %436  ;;  %v9362_v43 = vpop.xlane.xlu0 %433 }
 0x153   :  { %v2573_v50 = vrot.slane %v8844_v48, %v8012_v4  ;;  %v4911_v6 = vrot.slane %v8857_v10, %v8080_v58  ;;  %v4918_v8 = vrot.slane %v8859_v5, %v8080_v58  ;;  %v9352_v11 = vcombine.low %v2538_v45, %v2545_v31  ;;  %11255 = vst [vmem:[#allocation74_spill] sm:$0xff] %v9362_v43 }
 0x154   :  { %v9354_v35 = vcombine.low %v2552_v39, %v2559_v36  ;;  %v9356_v59 = vcombine.low %v2454_v20, %v2461_v12  ;;  %v9358_v22 = vcombine.low %v2468_v7, %v2475_v51  ;;  %6489 = vperm.xlu1 %7517, %v4664_v49   ;;  %v9364_v34 = vcombine.low %v2510_v15, %v2517_v44  ;;  %v11265_v15 = vld [vmem:[#allocation24_spill] sm:$0xff] }
 0x155   :  { %v9366_v24 = vcombine.low %v2524_v2, %v2531_v54  ;;  %6522 = vperm.xlu0 %7516, %v4851_v42   ;;  %v4885_v10 = vcombine.low %v4877_v14, %v4884_v23  ;;  %v4732_v5 = vcombine.low %v4724_v21, %v4731_v57  ;;  %v9368_v45 = vcombine.low %v2594_v38, %v2601_v62  ;;  %v11261_v42 = vld [vmem:[#allocation18_spill] sm:$0xff] }
 0x156   :  { %11253 = vst [vmem:[#allocation56_spill] sm:$0xff] %v9356_v59  ;;  %11254 = vst [vmem:[#allocation73_spill] sm:$0xff] %v9358_v22  ;;  %v9370_v31 = vcombine.low %v2608_v18, %v2615_v52  ;;  %v2580_v20 = vrot.slane %v8844_v48, %v8027_v13  ;;  %v2587_v12 = vrot.slane %v8844_v48, %v8030_v16  ;;  %v11262_v23 = vld [vmem:[#allocation22_spill] sm:$0xff]  ;;  %v9388_v36 = vpop.xlane.xlu1 %442  ;;  %v9390_v48 = vpop.xlane.xlu0 %439 }
 0x157   :  { %11256 = vst [vmem:[#allocation75_spill] sm:$0xff] %v9364_v34  ;;  %11257 = vst [vmem:[#allocation76_spill] sm:$0xff] %v9366_v24  ;;  %v9376_v49 = vcombine.low %v2566_v60, %v2573_v50  ;;  %v4919_v7 = vcombine.low %v4911_v6, %v4918_v8  ;;  %v4758_v51 = vrot.slane %v8756_v27, %v8080_v58  ;;  %v11266_v2 = vld [vmem:[#allocation26_spill] sm:$0xff]  ;;  %v11271_v24 = vld [vmem:[#allocation28_spill] sm:$0xff] }
 0x158   :  { %11258 = vst [vmem:[#allocation77_spill] sm:$0xff] %v9368_v45  ;;  %11259 = vst [vmem:[#allocation78_spill] sm:$0xff] %v9370_v31  ;;  %v4765_v14 = vrot.slane %v11261_v42, %v8080_v58  ;;  %v2650_v21 = vrot.slane %v11262_v23, %v8009_v3  ;;  %v2657_v57 = vrot.slane %v11262_v23, %v8012_v4  ;;  %6495 = vperm.xlu1 %7517, %v4698_v63   ;;  %v11267_v63 = vld [vmem:[#allocation27_spill] sm:$0xff]  ;;  %v11268_v50 = vld [vmem:[#allocation62_spill] sm:$0xff] }
 0x159   :  { %11260 = vst [vmem:[#allocation79_spill] sm:$0xff] %v9376_v49  ;;  %v2664_v39 = vrot.slane %v11262_v23, %v8027_v13  ;;  %11263 = vst [vmem:[#allocation18_spill] sm:$0xff] %v9388_v36  ;;  %v4945_v27 = vrot.slane %v11265_v15, %v8080_v58  ;;  %v2671_v44 = vrot.slane %v11262_v23, %v8030_v16  ;;  %6528 = vperm.xlu0 %7516, %v4885_v10   ;;  %v11269_v10 = vld [vmem:[#allocation19_spill] sm:$0xff] }
 0x15a   :  { %11264 = vst [vmem:[#allocation22_spill] sm:$0xff] %v9390_v48  ;;  %v2622_v54 = vrot.slane %v11266_v2, %v8009_v3  ;;  %v2629_v38 = vrot.slane %v11266_v2, %v8012_v4  ;;  %v2636_v62 = vrot.slane %v11266_v2, %v8027_v13  ;;  %v2706_v18 = vrot.slane %v11267_v63, %v8009_v3  ;;  %v11270_v15 = vld [vmem:[#allocation59_spill] sm:$0xff]  ;;  %v9426_v59 = vpop.xlane.xlu1 %448 }
 0x15b   :  { %v2713_v52 = vrot.slane %v11267_v63, %v8012_v4  ;;  %v2643_v60 = vrot.slane %v11266_v2, %v8030_v16  ;;  %v4952_v6 = vrot.slane %v11268_v50, %v8080_v58  ;;  %v2720_v8 = vrot.slane %v11267_v63, %v8027_v13  ;;  %11272 = vst [vmem:[#allocation24_spill] sm:$0xff] %v9426_v59  ;;  %v11277_v59 = vld [vmem:[#allocation67_spill] sm:$0xff] }
 0x15c   :  { %v2727_v42 = vrot.slane %v11267_v63, %v8030_v16  ;;  %v4792_v23 = vrot.slane %v11269_v10, %v8080_v58  ;;  %v4799_v49 = vrot.slane %v11270_v15, %v8080_v58  ;;  %v2678_v34 = vrot.slane %v11271_v24, %v8009_v3  ;;  %6501 = vperm.xlu1 %7517, %v4732_v5   ;;  %v9428_v63 = vpop.xlane.xlu0 %445 }
 0x15d   :  { %v2685_v2 = vrot.slane %v11271_v24, %v8012_v4  ;;  %v2692_v50 = vrot.slane %v11271_v24, %v8027_v13  ;;  %v2699_v22 = vrot.slane %v11271_v24, %v8030_v16  ;;  %11273 = vst [vmem:[#allocation26_spill] sm:$0xff] %v9428_v63  ;;  %v9430_v10 = vcombine.low %v2650_v21, %v2657_v57  ;;  %v11278_v57 = vld [vmem:[#allocation29_spill] sm:$0xff] }
 0x15e   :  { %v9432_v15 = vcombine.low %v2664_v39, %v2671_v44  ;;  %v9434_v48 = vcombine.low %v2580_v20, %v2587_v12  ;;  %6534 = vperm.xlu0 %7516, %v4919_v7   ;;  %v4766_v36 = vcombine.low %v4758_v51, %v4765_v14  ;;  %v9436_v43 = vcombine.low %v2706_v18, %v2713_v52  ;;  %v11279_v20 = vld [vmem:[#allocation37_spill] sm:$0xff]  ;;  %v9456_v44 = vpop.xlane.xlu1 %454  ;;  %v11284_v18 = vld [vmem:[#allocation39_spill] sm:$0xff] }
 0x15f   :  { %v9438_v31 = vcombine.low %v2622_v54, %v2629_v38  ;;  %v9440_v45 = vcombine.low %v2636_v62, %v2643_v60  ;;  %v4953_v24 = vcombine.low %v4945_v27, %v4952_v6  ;;  %v2762_v5 = vrot.slane %v11277_v59, %v8009_v3  ;;  %11282 = vst [vmem:[#allocation67_spill] sm:$0xff] %v9456_v44  ;;  %v11286_v6 = vld [vmem:[#allocation61_spill] sm:$0xff] }
 0x160   :  { %11274 = vst [vmem:[#allocation27_spill] sm:$0xff] %v9434_v48  ;;  %v2769_v21 = vrot.slane %v11277_v59, %v8012_v4  ;;  %v4979_v39 = vrot.slane %v11278_v57, %v8080_v58  ;;  %v4986_v12 = vrot.slane %v11279_v20, %v8080_v58  ;;  %v9450_v7 = vcombine.low %v2720_v8, %v2727_v42  ;;  %v9458_v54 = vpop.xlane.xlu0 %451  ;;  %v11290_v57 = vld [vmem:[#allocation46_spill] sm:$0xff] }
 0x161   :  { %11275 = vst [vmem:[#allocation62_spill] sm:$0xff] %v9438_v31  ;;  %11276 = vst [vmem:[#allocation19_spill] sm:$0xff] %v9440_v45  ;;  %v9452_v51 = vcombine.low %v2678_v34, %v2685_v2  ;;  %v9454_v14 = vcombine.low %v2692_v50, %v2699_v22  ;;  %6507 = vperm.xlu1 %7517, %v4766_v36   ;;  %v4800_v27 = vcombine.low %v4792_v23, %v4799_v49  ;;  %v11285_v36 = vld [vmem:[#allocation60_spill] sm:$0xff]  ;;  %v11288_v23 = vld [vmem:[#allocation35_spill] sm:$0xff] }
 0x162   :  { %11283 = vst [vmem:[#allocation29_spill] sm:$0xff] %v9458_v54  ;;  %v2776_v38 = vrot.slane %v11277_v59, %v8027_v13  ;;  %v2783_v62 = vrot.slane %v11277_v59, %v8030_v16  ;;  %v2734_v52 = vrot.slane %v11284_v18, %v8009_v3  ;;  %v2741_v34 = vrot.slane %v11284_v18, %v8012_v4  ;;  %v11289_v50 = vld [vmem:[#allocation66_spill] sm:$0xff]  ;;  %v11295_v31 = vld [vmem:[#allocation21_spill] sm:$0xff]  ;;  %v11297_v54 = vld [vmem:[#allocation32_spill] sm:$0xff] }
 0x163   :  { %11280 = vst [vmem:[#allocation59_spill] sm:$0xff] %v9452_v51  ;;  %11281 = vst [vmem:[#allocation28_spill] sm:$0xff] %v9454_v14  ;;  %6540 = vperm.xlu0 %7516, %v4953_v24   ;;  %v2748_v22 = vrot.slane %v11284_v18, %v8027_v13  ;;  %v2755_v49 = vrot.slane %v11284_v18, %v8030_v16  ;;  %v4826_v60 = vrot.slane %v11285_v36, %v8080_v58 }
 0x164   :  { %v4833_v8 = vrot.slane %v11286_v6, %v8080_v58  ;;  %v9476_v59 = vcombine.low %v2762_v5, %v2769_v21  ;;  %v4987_v42 = vcombine.low %v4979_v39, %v4986_v12  ;;  %v5013_v2 = vrot.slane %v11288_v23, %v8080_v58  ;;  %v9490_v21 = vpop.xlane.xlu1 %460  ;;  %v9492_v39 = vpop.xlane.xlu0 %457  ;;  %v11293_v12 = vld [vmem:[#allocation36_spill] sm:$0xff] }
 0x165   :  { %v5020_v24 = vrot.slane %v11289_v50, %v8080_v58  ;;  %v2818_v20 = vrot.slane %v11290_v57, %v8009_v3  ;;  %v2825_v18 = vrot.slane %v11290_v57, %v8012_v4  ;;  %v2832_v36 = vrot.slane %v11290_v57, %v8027_v13  ;;  %11291 = vst [vmem:[#allocation39_spill] sm:$0xff] %v9490_v21 }
 0x166   :  { %11287 = vst [vmem:[#allocation37_spill] sm:$0xff] %v9476_v59  ;;  %v2839_v5 = vrot.slane %v11290_v57, %v8030_v16  ;;  %6513 = vperm.xlu1 %7517, %v4800_v27   ;;  %11292 = vst [vmem:[#allocation60_spill] sm:$0xff] %v9492_v39  ;;  %v2790_v6 = vrot.slane %v11293_v12, %v8009_v3  ;;  %v2797_v23 = vrot.slane %v11293_v12, %v8012_v4  ;;  %v11294_v27 = vld [vmem:[#allocation20_spill] sm:$0xff]  ;;  %v11298_v59 = vld [vmem:[#allocation33_spill] sm:$0xff] }
 0x167   :  { %v2804_v50 = vrot.slane %v11293_v12, %v8027_v13  ;;  %v2811_v14 = vrot.slane %v11293_v12, %v8030_v16  ;;  %6546 = vperm.xlu0 %7516, %v4987_v42   ;;  %v9502_v51 = vcombine.low %v2776_v38, %v2783_v62  ;;  %v4834_v57 = vcombine.low %v4826_v60, %v4833_v8  ;;  %v11300_v62 = vld [vmem:[#allocation70_spill] sm:$0xff] }
 0x168   :  { %v4860_v45 = vrot.slane %v11294_v27, %v8080_v58  ;;  %v4867_v39 = vrot.slane %v11295_v31, %v8080_v58  ;;  %v9508_v48 = vcombine.low %v2734_v52, %v2741_v34  ;;  %v5021_v21 = vcombine.low %v5013_v2, %v5020_v24  ;;  %v9522_v31 = vpop.xlane.xlu1 %466  ;;  %v9524_v52 = vpop.xlane.xlu0 %463  ;;  %v11305_v2 = vld [vmem:[#allocation25_spill] sm:$0xff] }
 0x169   :  { %v5047_v44 = vrot.slane %v11297_v54, %v8080_v58  ;;  %v5054_v63 = vrot.slane %v11298_v59, %v8080_v58  ;;  %v9514_v12 = vcombine.low %v2818_v20, %v2825_v18  ;;  %v9516_v38 = vcombine.low %v2748_v22, %v2755_v49  ;;  %11301 = vst [vmem:[#allocation66_spill] sm:$0xff] %v9522_v31  ;;  %v11306_v20 = vld [vmem:[#allocation23_spill] sm:$0xff] }
 0x16a   :  { %11296 = vst [vmem:[#allocation61_spill] sm:$0xff] %v9508_v48  ;;  %v2874_v60 = vrot.slane %v11300_v62, %v8009_v3  ;;  %v2881_v8 = vrot.slane %v11300_v62, %v8012_v4  ;;  %6519 = vperm.xlu1 %7517, %v4834_v57   ;;  %11302 = vst [vmem:[#allocation46_spill] sm:$0xff] %v9524_v52  ;;  %v9526_v34 = vcombine.low %v2832_v36, %v2839_v5  ;;  %v11307_v36 = vld [vmem:[#allocation71_spill] sm:$0xff]  ;;  %v11317_v48 = vld [vmem:[#allocation40_spill] sm:$0xff] }
 0x16b   :  { %11299 = vst [vmem:[#allocation35_spill] sm:$0xff] %v9516_v38  ;;  %v2888_v54 = vrot.slane %v11300_v62, %v8027_v13  ;;  %v9530_v59 = vcombine.low %v2790_v6, %v2797_v23  ;;  %v9532_v22 = vcombine.low %v2804_v50, %v2811_v14  ;;  %6552 = vperm.xlu0 %7516, %v5021_v21   ;;  %v11308_v6 = vld [vmem:[#allocation41_spill] sm:$0xff] }
 0x16c   :  { %v2895_v49 = vrot.slane %v11300_v62, %v8030_v16  ;;  %v4868_v42 = vcombine.low %v4860_v45, %v4867_v39  ;;  %v4894_v24 = vrot.slane %v11305_v2, %v8080_v58  ;;  %v4901_v18 = vrot.slane %v11306_v20, %v8080_v58  ;;  %v11309_v14 = vld [vmem:[#allocation69_spill] sm:$0xff]  ;;  %v9554_v62 = vpop.xlane.xlu1 %472 }
 0x16d   :  { %11303 = vst [vmem:[#allocation36_spill] sm:$0xff] %v9530_v59  ;;  %11304 = vst [vmem:[#allocation20_spill] sm:$0xff] %v9532_v22  ;;  %v2846_v5 = vrot.slane %v11307_v36, %v8009_v3  ;;  %v5055_v57 = vcombine.low %v5047_v44, %v5054_v63  ;;  %v5081_v23 = vrot.slane %v11308_v6, %v8080_v58  ;;  %v9556_v63 = vpop.xlane.xlu0 %469  ;;  %v11313_v44 = vld [vmem:[#allocation54_spill] sm:$0xff] }
 0x16e   :  { %v5088_v21 = vrot.slane %v11309_v14, %v8080_v58  ;;  %v9546_v50 = vcombine.low %v2874_v60, %v2881_v8  ;;  %v2853_v45 = vrot.slane %v11307_v36, %v8012_v4  ;;  %v2860_v39 = vrot.slane %v11307_v36, %v8027_v13  ;;  %11311 = vst [vmem:[#allocation32_spill] sm:$0xff] %v9554_v62  ;;  %v11316_v62 = vld [vmem:[#allocation63_spill] sm:$0xff] }
 0x16f   :  { %v2867_v27 = vrot.slane %v11307_v36, %v8030_v16  ;;  %6525 = vperm.xlu1 %7517, %v4868_v42   ;;  %11312 = vst [vmem:[#allocation33_spill] sm:$0xff] %v9556_v63  ;;  %v2930_v2 = vrot.slane %v11313_v44, %v8009_v3  ;;  %v2937_v60 = vrot.slane %v11313_v44, %v8012_v4  ;;  %v11314_v36 = vld [vmem:[#allocation42_spill] sm:$0xff] }
 0x170   :  { %11310 = vst [vmem:[#allocation21_spill] sm:$0xff] %v9546_v50  ;;  %v2944_v8 = vrot.slane %v11313_v44, %v8027_v13  ;;  %v2951_v20 = vrot.slane %v11313_v44, %v8030_v16  ;;  %6558 = vperm.xlu0 %7516, %v5055_v57   ;;  %v2902_v6 = vrot.slane %v11314_v36, %v8009_v3  ;;  %v11315_v42 = vld [vmem:[#allocation30_spill] sm:$0xff] }
 0x171   :  { %v4902_v14 = vcombine.low %v4894_v24, %v4901_v18  ;;  %v4928_v63 = vrot.slane %v11315_v42, %v8080_v58  ;;  %v4935_v22 = vrot.slane %v11316_v62, %v8080_v58  ;;  %v2909_v59 = vrot.slane %v11314_v36, %v8012_v4  ;;  %v11318_v44 = vld [vmem:[#allocation14_spill] sm:$0xff]  ;;  %v9586_v62 = vpop.xlane.xlu1 %478 }
 0x172   :  { %v5089_v38 = vcombine.low %v5081_v23, %v5088_v21  ;;  %v5115_v52 = vrot.slane %v11317_v48, %v8080_v58  ;;  %v5122_v57 = vrot.slane %v11318_v44, %v8080_v58  ;;  %v9578_v31 = vcombine.low %v2888_v54, %v2895_v49  ;;  %11320 = vst [vmem:[#allocation25_spill] sm:$0xff] %v9586_v62  ;;  %v9588_v23 = vpop.xlane.xlu0 %475  ;;  %v11323_v54 = vld [vmem:[#allocation6_spill] sm:$0xff] }
 0x173   :  { %v9580_v50 = vcombine.low %v2846_v5, %v2853_v45  ;;  %v2916_v24 = vrot.slane %v11314_v36, %v8027_v13  ;;  %v2923_v18 = vrot.slane %v11314_v36, %v8030_v16  ;;  %6531 = vperm.xlu1 %7517, %v4902_v14   ;;  %11321 = vst [vmem:[#allocation23_spill] sm:$0xff] %v9588_v23  ;;  %v11324_v36 = vld [vmem:[#allocation64_spill] sm:$0xff]  ;;  %v11325_v14 = vld [vmem:[#allocation65_spill] sm:$0xff] }
 0x174   :  { %v9590_v21 = vcombine.low %v2930_v2, %v2937_v60  ;;  %v9592_v48 = vcombine.low %v2860_v39, %v2867_v27  ;;  %v2986_v49 = vrot.slane %v11323_v54, %v8009_v3  ;;  %v2993_v5 = vrot.slane %v11323_v54, %v8012_v4  ;;  %6564 = vperm.xlu0 %7516, %v5089_v38  }
 0x175   :  { %11319 = vst [vmem:[#allocation70_spill] sm:$0xff] %v9580_v50  ;;  %v9598_v45 = vcombine.low %v2944_v8, %v2951_v20  ;;  %v4936_v42 = vcombine.low %v4928_v63, %v4935_v22  ;;  %v4962_v44 = vrot.slane %v11324_v36, %v8080_v58  ;;  %v4969_v62 = vrot.slane %v11325_v14, %v8080_v58 }
 0x176   :  { %11322 = vst [vmem:[#allocation71_spill] sm:$0xff] %v9592_v48  ;;  %v9604_v2 = vcombine.low %v2902_v6, %v2909_v59  ;;  %v5123_v39 = vcombine.low %v5115_v52, %v5122_v57  ;;  %v5149_v27 = vrot.slane %v9114_v19, %v8080_v58  ;;  %v5156_v60 = vrot.slane %v9116_v47, %v8080_v58  ;;  %v9618_v59 = vpop.xlane.xlu1 %484  ;;  %v9620_v52 = vpop.xlane.xlu0 %481 }
 0x177   :  { %v3000_v38 = vrot.slane %v11323_v54, %v8027_v13  ;;  %v3007_v22 = vrot.slane %v11323_v54, %v8030_v16  ;;  %v9614_v63 = vcombine.low %v2916_v24, %v2923_v18  ;;  %v2958_v8 = vrot.slane %v9110_v55, %v8009_v3  ;;  %6537 = vperm.xlu1 %7517, %v4936_v42   ;;  %v11328_v18 = vld [vmem:[#allocation31_spill] sm:$0xff] }
 0x178   :  { %11326 = vst [vmem:[#allocation41_spill] sm:$0xff] %v9604_v2  ;;  %v9622_v19 = vcombine.low %v2986_v49, %v2993_v5  ;;  %v2965_v47 = vrot.slane %v9110_v55, %v8012_v4  ;;  %v2972_v20 = vrot.slane %v9110_v55, %v8027_v13  ;;  %v2979_v6 = vrot.slane %v9110_v55, %v8030_v16  ;;  %v11329_v49 = vld [vmem:[#allocation50_spill] sm:$0xff] }
 0x179   :  { %11327 = vst [vmem:[#allocation69_spill] sm:$0xff] %v9614_v63  ;;  %6570 = vperm.xlu0 %7516, %v5123_v39   ;;  %v3042_v57 = vrot.slane %v9145_v46, %v8009_v3  ;;  %v4970_v24 = vcombine.low %v4962_v44, %v4969_v62  ;;  %v4996_v54 = vrot.slane %v11328_v18, %v8080_v58  ;;  %v11332_v2 = vld [vmem:[#allocation34_spill] sm:$0xff] }
 0x17a   :  { %v5003_v5 = vrot.slane %v11329_v49, %v8080_v58  ;;  %v3049_v42 = vrot.slane %v9145_v46, %v8012_v4  ;;  %v5157_v36 = vcombine.low %v5149_v27, %v5156_v60  ;;  %v5183_v14 = vrot.slane %v9131_v33, %v8080_v58  ;;  %v9650_v49 = vpop.xlane.xlu1 %490  ;;  %v9652_v27 = vpop.xlane.xlu0 %487 }
 0x17b   :  { %v5190_v55 = vrot.slane %v9133_v32, %v8080_v58  ;;  %v3056_v39 = vrot.slane %v9145_v46, %v8027_v13  ;;  %v3063_v62 = vrot.slane %v9145_v46, %v8030_v16  ;;  %v3014_v44 = vrot.slane %v9148_v56, %v8009_v3  ;;  %6543 = vperm.xlu1 %7517, %v4970_v24   ;;  %v11333_v24 = vld [vmem:[#allocation68_spill] sm:$0xff] }
 0x17c   :  { %v3021_v18 = vrot.slane %v9148_v56, %v8012_v4  ;;  %v9654_v33 = vcombine.low %v3000_v38, %v3007_v22  ;;  %v9656_v32 = vcombine.low %v2958_v8, %v2965_v47  ;;  %v3028_v60 = vrot.slane %v9148_v56, %v8027_v13 }
 0x17d   :  { %v3035_v46 = vrot.slane %v9148_v56, %v8030_v16  ;;  %6576 = vperm.xlu0 %7516, %v5157_v36   ;;  %v9662_v23 = vcombine.low %v2972_v20, %v2979_v6  ;;  %v5004_v63 = vcombine.low %v4996_v54, %v5003_v5  ;;  %v5030_v48 = vrot.slane %v11332_v2, %v8080_v58 }
 0x17e   :  { %11330 = vst [vmem:[#allocation54_spill] sm:$0xff] %v9656_v32  ;;  %v5037_v50 = vrot.slane %v11333_v24, %v8080_v58  ;;  %v9668_v38 = vcombine.low %v3042_v57, %v3049_v42  ;;  %v5191_v22 = vcombine.low %v5183_v14, %v5190_v55  ;;  %v5217_v8 = vrot.slane %v9190_v41, %v8080_v58  ;;  %v9682_v54 = vpop.xlane.xlu1 %496  ;;  %v9684_v57 = vpop.xlane.xlu0 %493  ;;  %v11345_v32 = vld [vmem:[#allocation51_spill] sm:$0xff] }
 0x17f   :  { %11331 = vst [vmem:[#allocation42_spill] sm:$0xff] %v9662_v23  ;;  %v5224_v47 = vrot.slane %v9192_v26, %v8080_v58  ;;  %v9674_v56 = vcombine.low %v3056_v39, %v3063_v62  ;;  %v3098_v20 = vrot.slane %v9185_v9, %v8009_v3  ;;  %v3105_v2 = vrot.slane %v9185_v9, %v8012_v4  ;;  %v11338_v39 = vld [vmem:[#allocation72_spill] sm:$0xff] }
 0x180   :  { %v9680_v6 = vcombine.low %v3014_v44, %v3021_v18  ;;  %6549 = vperm.xlu1 %7517, %v5004_v63   ;;  %11335 = vst [vmem:[#allocation63_spill] sm:$0xff] %v9684_v57  ;;  %v3112_v41 = vrot.slane %v9185_v9, %v8027_v13  ;;  %v3119_v26 = vrot.slane %v9185_v9, %v8030_v16  ;;  %v11337_v63 = vld [vmem:[#allocation38_spill] sm:$0xff] }
 0x181   :  { %v9690_v5 = vcombine.low %v3028_v60, %v3035_v46  ;;  %v3070_v42 = vrot.slane %v9188_v61, %v8009_v3  ;;  %6582 = vperm.xlu0 %7516, %v5191_v22   ;;  %v3077_v36 = vrot.slane %v9188_v61, %v8012_v4  ;;  %v5038_v14 = vcombine.low %v5030_v48, %v5037_v50 }
 0x182   :  { %11334 = vst [vmem:[#allocation30_spill] sm:$0xff] %v9680_v6  ;;  %v5064_v55 = vrot.slane %v11337_v63, %v8080_v58  ;;  %v5071_v62 = vrot.slane %v11338_v39, %v8080_v58  ;;  %v3084_v44 = vrot.slane %v9188_v61, %v8027_v13  ;;  %v5225_v9 = vcombine.low %v5217_v8, %v5224_v47  ;;  %v9714_v22 = vpop.xlane.xlu1 %502  ;;  %v9716_v8 = vpop.xlane.xlu0 %499  ;;  %v11342_v39 = vld [vmem:[#allocation43_spill] sm:$0xff] }
 0x183   :  { %11336 = vst [vmem:[#allocation40_spill] sm:$0xff] %v9690_v5  ;;  %v5251_v18 = vrot.slane %v9205_v37, %v8080_v58  ;;  %v5258_v60 = vrot.slane %v9207_v25, %v8080_v58  ;;  %v9706_v46 = vcombine.low %v3098_v20, %v3105_v2  ;;  %v3154_v50 = vrot.slane %v9217_v40, %v8009_v3 }
 0x184   :  { %v3161_v48 = vrot.slane %v9217_v40, %v8012_v4  ;;  %v3091_v24 = vrot.slane %v9188_v61, %v8030_v16  ;;  %11339 = vst [vmem:[#allocation14_spill] sm:$0xff] %v9714_v22  ;;  %6555 = vperm.xlu1 %7517, %v5038_v14   ;;  %11340 = vst [vmem:[#allocation6_spill] sm:$0xff] %v9716_v8  ;;  %v3168_v37 = vrot.slane %v9217_v40, %v8027_v13  ;;  %v11341_v14 = vld [vmem:[#allocation44_spill] sm:$0xff] }
 0x185   :  { %v3175_v25 = vrot.slane %v9217_v40, %v8030_v16  ;;  %v3126_v47 = vrot.slane %v9220_v17, %v8009_v3  ;;  %v3133_v20 = vrot.slane %v9220_v17, %v8012_v4  ;;  %6588 = vperm.xlu0 %7516, %v5225_v9   ;;  %v9726_v2 = vcombine.low %v3112_v41, %v3119_v26  ;;  %v11344_v40 = vld [vmem:[#allocation13_spill] sm:$0xff] }
 0x186   :  { %v5072_v61 = vcombine.low %v5064_v55, %v5071_v62  ;;  %v5098_v63 = vrot.slane %v11341_v14, %v8080_v58  ;;  %v5105_v5 = vrot.slane %v11342_v39, %v8080_v58  ;;  %v9732_v6 = vcombine.low %v3070_v42, %v3077_v36  ;;  %v9746_v62 = vpop.xlane.xlu1 %508  ;;  %v9748_v42 = vpop.xlane.xlu0 %505  ;;  %v11349_v9 = vld [vmem:[#allocation57_spill] sm:$0xff] }
 0x187   :  { %v5259_v8 = vcombine.low %v5251_v18, %v5258_v60  ;;  %v5285_v23 = vrot.slane %v11344_v40, %v8080_v58  ;;  %v5292_v22 = vrot.slane %v11345_v32, %v8080_v58  ;;  %v9738_v57 = vcombine.low %v3154_v50, %v3161_v48  ;;  %11347 = vst [vmem:[#allocation31_spill] sm:$0xff] %v9746_v62  ;;  %v11351_v50 = vld [vmem:[#allocation48_spill] sm:$0xff] }
 0x188   :  { %11343 = vst [vmem:[#allocation64_spill] sm:$0xff] %v9732_v6  ;;  %v9740_v41 = vcombine.low %v3084_v44, %v3091_v24  ;;  %v3140_v26 = vrot.slane %v9220_v17, %v8027_v13  ;;  %v3147_v55 = vrot.slane %v9220_v17, %v8030_v16  ;;  %6561 = vperm.xlu1 %7517, %v5072_v61   ;;  %11348 = vst [vmem:[#allocation50_spill] sm:$0xff] %v9748_v42  ;;  %v11352_v24 = vld [vmem:[#allocation45_spill] sm:$0xff] }
 0x189   :  { %v9750_v36 = vcombine.low %v3168_v37, %v3175_v25  ;;  %v3210_v32 = vrot.slane %v11349_v9, %v8009_v3  ;;  %v3217_v44 = vrot.slane %v11349_v9, %v8012_v4  ;;  %v9756_v18 = vcombine.low %v3126_v47, %v3133_v20  ;;  %6594 = vperm.xlu0 %7516, %v5259_v8   ;;  %v11353_v47 = vld [vmem:[#allocation58_spill] sm:$0xff] }
 0x18a   :  { %11346 = vst [vmem:[#allocation65_spill] sm:$0xff] %v9740_v41  ;;  %v3224_v60 = vrot.slane %v11349_v9, %v8027_v13  ;;  %v5106_v17 = vcombine.low %v5098_v63, %v5105_v5  ;;  %v5132_v48 = vrot.slane %v11351_v50, %v8080_v58  ;;  %v5139_v37 = vrot.slane %v11352_v24, %v8080_v58  ;;  %v9778_v40 = vpop.xlane.xlu1 %514 }
 0x18b   :  { %11350 = vst [vmem:[#allocation34_spill] sm:$0xff] %v9756_v18  ;;  %v3231_v25 = vrot.slane %v11349_v9, %v8030_v16  ;;  %v5293_v61 = vcombine.low %v5285_v23, %v5292_v22  ;;  %v5319_v14 = vrot.slane %v9283_v53, %v8080_v58  ;;  %v5326_v8 = vrot.slane %v9285_v28, %v8080_v58  ;;  %v9780_v23 = vpop.xlane.xlu0 %511 }
 0x18c   :  { %v3182_v20 = vrot.slane %v11353_v47, %v8009_v3  ;;  %v3189_v5 = vrot.slane %v11353_v47, %v8012_v4  ;;  %v3196_v63 = vrot.slane %v11353_v47, %v8027_v13  ;;  %v3203_v39 = vrot.slane %v11353_v47, %v8030_v16  ;;  %11354 = vst [vmem:[#allocation68_spill] sm:$0xff] %v9778_v40 }
 0x18d   :  { %6567 = vperm.xlu1 %7517, %v5106_v17   ;;  %11355 = vst [vmem:[#allocation38_spill] sm:$0xff] %v9780_v23  ;;  %v3266_v53 = vrot.slane %v9289_v0, %v8009_v3  ;;  %v3273_v28 = vrot.slane %v9289_v0, %v8012_v4  ;;  %v3280_v22 = vrot.slane %v9289_v0, %v8027_v13  ;;  %v11356_v17 = vld [vmem:[#allocation49_spill] sm:$0xff]  ;;  %v11357_v23 = vld [vmem:[#allocation15_spill] sm:$0xff] }
 0x18e   :  { %v3287_v9 = vrot.slane %v9289_v0, %v8030_v16  ;;  %6600 = vperm.xlu0 %7516, %v5293_v61   ;;  %v3238_v50 = vrot.slane %v9292_v29, %v8009_v3  ;;  %v5140_v24 = vcombine.low %v5132_v48, %v5139_v37  ;;  %v5166_v47 = vrot.slane %v11356_v17, %v8080_v58  ;;  %v11358_v0 = vld [vmem:[#allocation52_spill] sm:$0xff]  ;;  %v9810_v17 = vpop.xlane.xlu1 %520 }
 0x18f   :  { %v5173_v40 = vrot.slane %v11357_v23, %v8080_v58  ;;  %v3245_v42 = vrot.slane %v9292_v29, %v8012_v4  ;;  %v5327_v62 = vcombine.low %v5319_v14, %v5326_v8  ;;  %v5353_v18 = vrot.slane %v9302_v1, %v8080_v58  ;;  %11361 = vst [vmem:[#allocation43_spill] sm:$0xff] %v9810_v17  ;;  %v9812_v23 = vpop.xlane.xlu0 %517 }
 0x190   :  { %v5360_v61 = vrot.slane %v11358_v0, %v8080_v58  ;;  %v9802_v41 = vcombine.low %v3210_v32, %v3217_v44  ;;  %v9804_v6 = vcombine.low %v3224_v60, %v3231_v25  ;;  %v9806_v48 = vcombine.low %v3140_v26, %v3147_v55  ;;  %11362 = vst [vmem:[#allocation13_spill] sm:$0xff] %v9812_v23  ;;  %v11366_v44 = vld [vmem:[#allocation8_spill] sm:$0xff]  ;;  %v11367_v25 = vld [vmem:[#allocation10_spill] sm:$0xff]  ;;  %v11375_v23 = vld [vmem:[#allocation77_spill] sm:$0xff] }
 0x191   :  { %v9808_v37 = vcombine.low %v3182_v20, %v3189_v5  ;;  %6573 = vperm.xlu1 %7517, %v5140_v24   ;;  %v9814_v14 = vcombine.low %v3266_v53, %v3273_v28  ;;  %v9816_v8 = vcombine.low %v3196_v63, %v3203_v39  ;;  %v3252_v1 = vrot.slane %v9292_v29, %v8027_v13 }
 0x192   :  { %11359 = vst [vmem:[#allocation72_spill] sm:$0xff] %v9806_v48  ;;  %v3259_v32 = vrot.slane %v9292_v29, %v8030_v16  ;;  %6606 = vperm.xlu0 %7516, %v5327_v62   ;;  %v9822_v26 = vcombine.low %v3280_v22, %v3287_v9  ;;  %v5174_v55 = vcombine.low %v5166_v47, %v5173_v40  ;;  %v11369_v29 = vld [vmem:[#allocation53_spill] sm:$0xff]  ;;  %v9842_v22 = vpop.xlane.xlu1 %526 }
 0x193   :  { %11360 = vst [vmem:[#allocation44_spill] sm:$0xff] %v9808_v37  ;;  %11363 = vst [vmem:[#allocation51_spill] sm:$0xff] %v9814_v14  ;;  %v5200_v60 = vrot.slane %v11366_v44, %v8080_v58  ;;  %v5207_v20 = vrot.slane %v11367_v25, %v8080_v58  ;;  %v9828_v5 = vcombine.low %v3238_v50, %v3245_v42  ;;  %v9854_v0 = vpop.xlane.xlu0 %523  ;;  %v11374_v44 = vld [vmem:[#allocation47_spill] sm:$0xff] }
 0x194   :  { %11364 = vst [vmem:[#allocation57_spill] sm:$0xff] %v9816_v8  ;;  %11365 = vst [vmem:[#allocation48_spill] sm:$0xff] %v9822_v26  ;;  %v5361_v63 = vcombine.low %v5353_v18, %v5360_v61  ;;  %v5387_v39 = vrot.slane %v9352_v11, %v8080_v58  ;;  %v5394_v53 = vrot.slane %v9354_v35, %v8080_v58  ;;  %v11371_v11 = vld [vmem:[#allocation55_spill] sm:$0xff]  ;;  %v11383_v26 = vld [vmem:[#allocation12_spill] sm:$0xff] }
 0x195   :  { %11368 = vst [vmem:[#allocation45_spill] sm:$0xff] %v9828_v5  ;;  %v3322_v62 = vrot.slane %v11369_v29, %v8009_v3  ;;  %v3329_v40 = vrot.slane %v11369_v29, %v8012_v4  ;;  %v3336_v28 = vrot.slane %v11369_v29, %v8027_v13  ;;  %v3343_v42 = vrot.slane %v11369_v29, %v8030_v16  ;;  %v11373_v61 = vld [vmem:[#allocation7_spill] sm:$0xff] }
 0x196   :  { %11370 = vst [vmem:[#allocation58_spill] sm:$0xff] %v9842_v22  ;;  %6579 = vperm.xlu1 %7517, %v5174_v55   ;;  %v3294_v18 = vrot.slane %v11371_v11, %v8009_v3  ;;  %v3301_v35 = vrot.slane %v11371_v11, %v8012_v4  ;;  %v3308_v9 = vrot.slane %v11371_v11, %v8027_v13  ;;  %11372 = vst [vmem:[#allocation49_spill] sm:$0xff] %v9854_v0  ;;  %v9874_v5 = vpop.permute.xlu1 %6420  ;;  %v11382_v37 = vld [vmem:[#allocation11_spill] sm:$0xff] }
 0x197   :  { %v3315_v50 = vrot.slane %v11371_v11, %v8030_v16  ;;  %6612 = vperm.xlu0 %7516, %v5361_v63   ;;  %v3378_v24 = vrot.slane %v9360_v30, %v8009_v3  ;;  %v5208_v47 = vcombine.low %v5200_v60, %v5207_v20  ;;  %v5234_v55 = vrot.slane %v11373_v61, %v8080_v58  ;;  %v11376_v63 = vld [vmem:[#allocation78_spill] sm:$0xff] }
 0x198   :  { %v5241_v25 = vrot.slane %v11374_v44, %v8080_v58  ;;  %v3385_v29 = vrot.slane %v9360_v30, %v8012_v4  ;;  %v5395_v22 = vcombine.low %v5387_v39, %v5394_v53  ;;  %v5421_v11 = vrot.slane %v11375_v23, %v8080_v58  ;;  %v11377_v61 = vld [vmem:[#allocation74_spill] sm:$0xff]  ;;  %11378 = vst [vmem:[#allocation15_spill] sm:$0xff] %v9874_v5 }
 0x199   :  { %v5428_v17 = vrot.slane %v11376_v63, %v8080_v58  ;;  %v3392_v60 = vrot.slane %v9360_v30, %v8027_v13  ;;  %v3399_v20 = vrot.slane %v9360_v30, %v8030_v16  ;;  %v3350_v0 = vrot.slane %v11377_v61, %v8009_v3 }
 0x19a   :  { %v3357_v44 = vrot.slane %v11377_v61, %v8012_v4  ;;  %6585 = vperm.xlu1 %7517, %v5208_v47   ;;  %v9876_v39 = vcombine.low %v3322_v62, %v3329_v40  ;;  %v9878_v23 = vcombine.low %v3336_v28, %v3343_v42  ;;  %v9880_v53 = vcombine.low %v3252_v1, %v3259_v32 }
 0x19b   :  { %v9882_v63 = vcombine.low %v3294_v18, %v3301_v35  ;;  %6618 = vperm.xlu0 %7516, %v5395_v22   ;;  %v9884_v8 = vcombine.low %v3308_v9, %v3315_v50  ;;  %v5242_v30 = vcombine.low %v5234_v55, %v5241_v25  ;;  %v5268_v48 = vrot.slane %v11382_v37, %v8080_v58  ;;  %v9906_v18 = vpop.permute.xlu0 %6417  ;;  %v11388_v50 = vld [vmem:[#allocation22_spill] sm:$0xff]  ;;  %v11390_v25 = vld [vmem:[#allocation17_spill] sm:$0xff] }
 0x19c   :  { %11379 = vst [vmem:[#allocation52_spill] sm:$0xff] %v9880_v53  ;;  %v5275_v14 = vrot.slane %v11383_v26, %v8080_v58  ;;  %v3364_v62 = vrot.slane %v11377_v61, %v8027_v13  ;;  %v5429_v40 = vcombine.low %v5421_v11, %v5428_v17  ;;  %v5455_v1 = vrot.slane %v9430_v10, %v8080_v58  ;;  %v9904_v26 = vpop.permute.xlu1 %6423  ;;  %v11387_v17 = vld [vmem:[#allocation18_spill] sm:$0xff] }
 0x19d   :  { %11380 = vst [vmem:[#allocation8_spill] sm:$0xff] %v9882_v63  ;;  %11381 = vst [vmem:[#allocation10_spill] sm:$0xff] %v9884_v8  ;;  %v5462_v32 = vrot.slane %v9432_v15, %v8080_v58  ;;  %v9896_v28 = vcombine.low %v3378_v24, %v3385_v29  ;;  %v9898_v42 = vcombine.low %v3392_v60, %v3399_v20 }
 0x19e   :  { %v3371_v37 = vrot.slane %v11377_v61, %v8030_v16  ;;  %v9902_v22 = vcombine.low %v3350_v0, %v3357_v44  ;;  %11385 = vst [vmem:[#allocation55_spill] sm:$0xff] %v9904_v26  ;;  %6591 = vperm.xlu1 %7517, %v5242_v30   ;;  %11386 = vst [vmem:[#allocation7_spill] sm:$0xff] %v9906_v18  ;;  %v3434_v10 = vrot.slane %v11387_v17, %v8009_v3  ;;  %v11389_v0 = vld [vmem:[#allocation16_spill] sm:$0xff] }
 0x19f   :  { %v3441_v15 = vrot.slane %v11387_v17, %v8012_v4  ;;  %v3448_v35 = vrot.slane %v11387_v17, %v8027_v13  ;;  %v3455_v9 = vrot.slane %v11387_v17, %v8030_v16  ;;  %6624 = vperm.xlu0 %7516, %v5429_v40   ;;  %v3406_v24 = vrot.slane %v11388_v50, %v8009_v3  ;;  %v11391_v44 = vld [vmem:[#allocation24_spill] sm:$0xff] }
 0x1a0   :  { %11384 = vst [vmem:[#allocation53_spill] sm:$0xff] %v9902_v22  ;;  %v5276_v47 = vcombine.low %v5268_v48, %v5275_v14  ;;  %v5302_v55 = vrot.slane %v11389_v0, %v8080_v58  ;;  %v5309_v29 = vrot.slane %v11390_v25, %v8080_v58  ;;  %v3413_v11 = vrot.slane %v11388_v50, %v8012_v4  ;;  %v9936_v17 = vpop.permute.xlu1 %6426 }
 0x1a1   :  { %v5463_v60 = vcombine.low %v5455_v1, %v5462_v32  ;;  %v5489_v20 = vrot.slane %v9436_v43, %v8080_v58  ;;  %v5496_v61 = vrot.slane %v9450_v7, %v8080_v58  ;;  %v3490_v30 = vrot.slane %v11391_v44, %v8009_v3  ;;  %11392 = vst [vmem:[#allocation47_spill] sm:$0xff] %v9936_v17  ;;  %v9938_v1 = vpop.permute.xlu0 %6444  ;;  %v11394_v32 = vld [vmem:[#allocation26_spill] sm:$0xff] }
 0x1a2   :  { %v3497_v48 = vrot.slane %v11391_v44, %v8012_v4  ;;  %v3420_v14 = vrot.slane %v11388_v50, %v8027_v13  ;;  %v3427_v40 = vrot.slane %v11388_v50, %v8030_v16  ;;  %6597 = vperm.xlu1 %7517, %v5276_v47   ;;  %11393 = vst [vmem:[#allocation77_spill] sm:$0xff] %v9938_v1  ;;  %v11396_v47 = vld [vmem:[#allocation56_spill] sm:$0xff]  ;;  %v11397_v1 = vld [vmem:[#allocation73_spill] sm:$0xff] }
 0x1a3   :  { %v3504_v43 = vrot.slane %v11391_v44, %v8027_v13  ;;  %v3511_v7 = vrot.slane %v11391_v44, %v8030_v16  ;;  %v3462_v0 = vrot.slane %v11394_v32, %v8009_v3  ;;  %v3469_v25 = vrot.slane %v11394_v32, %v8012_v4  ;;  %6630 = vperm.xlu0 %7516, %v5463_v60   ;;  %v11398_v44 = vld [vmem:[#allocation37_spill] sm:$0xff] }
 0x1a4   :  { %v9948_v26 = vcombine.low %v3364_v62, %v3371_v37  ;;  %v5310_v50 = vcombine.low %v5302_v55, %v5309_v29  ;;  %v5336_v17 = vrot.slane %v11396_v47, %v8080_v58  ;;  %v5343_v5 = vrot.slane %v11397_v1, %v8080_v58  ;;  %v9968_v29 = vpop.permute.xlu1 %6429 }
 0x1a5   :  { %v9954_v18 = vcombine.low %v3434_v10, %v3441_v15  ;;  %v5497_v22 = vcombine.low %v5489_v20, %v5496_v61  ;;  %v5523_v8 = vrot.slane %v11398_v44, %v8080_v58  ;;  %v5530_v63 = vrot.slane %v9502_v51, %v8080_v58  ;;  %11401 = vst [vmem:[#allocation12_spill] sm:$0xff] %v9968_v29  ;;  %v9970_v10 = vpop.permute.xlu0 %6450  ;;  %v11406_v20 = vld [vmem:[#allocation75_spill] sm:$0xff] }
 0x1a6   :  { %11395 = vst [vmem:[#allocation78_spill] sm:$0xff] %v9948_v26  ;;  %v9960_v53 = vcombine.low %v3448_v35, %v3455_v9  ;;  %v9962_v62 = vcombine.low %v3406_v24, %v3413_v11  ;;  %v9964_v37 = vcombine.low %v3420_v14, %v3427_v40  ;;  %v3476_v55 = vrot.slane %v11394_v32, %v8027_v13  ;;  %v11405_v9 = vld [vmem:[#allocation67_spill] sm:$0xff]  ;;  %v11407_v14 = vld [vmem:[#allocation76_spill] sm:$0xff] }
 0x1a7   :  { %6603 = vperm.xlu1 %7517, %v5310_v50   ;;  %11402 = vst [vmem:[#allocation18_spill] sm:$0xff] %v9970_v10  ;;  %v9972_v15 = vcombine.low %v3490_v30, %v3497_v48  ;;  %v9974_v60 = vcombine.low %v3504_v43, %v3511_v7  ;;  %v3483_v51 = vrot.slane %v11394_v32, %v8030_v16 }
 0x1a8   :  { %11399 = vst [vmem:[#allocation74_spill] sm:$0xff] %v9962_v62  ;;  %11400 = vst [vmem:[#allocation11_spill] sm:$0xff] %v9964_v37  ;;  %v9978_v35 = vcombine.low %v3462_v0, %v3469_v25  ;;  %6636 = vperm.xlu0 %7516, %v5497_v22   ;;  %v3546_v24 = vrot.slane %v11405_v9, %v8009_v3  ;;  %v5344_v11 = vcombine.low %v5336_v17, %v5343_v5  ;;  %v11408_v17 = vld [vmem:[#allocation29_spill] sm:$0xff]  ;;  %v10000_v0 = vpop.permute.xlu1 %6432  ;;  %v11418_v37 = vlaneseq }
 0x1a9   :  { %11403 = vst [vmem:[#allocation22_spill] sm:$0xff] %v9974_v60  ;;  %v5370_v61 = vrot.slane %v11406_v20, %v8080_v58  ;;  %v5377_v40 = vrot.slane %v11407_v14, %v8080_v58  ;;  %v3553_v30 = vrot.slane %v11405_v9, %v8012_v4  ;;  %v5531_v48 = vcombine.low %v5523_v8, %v5530_v63  ;;  %v10002_v8 = vpop.permute.xlu0 %6456  ;;  %v11413_v20 = vld [vmem:[#allocation27_spill] sm:$0xff] }
 0x1aa   :  { %11404 = vst [vmem:[#allocation16_spill] sm:$0xff] %v9978_v35  ;;  %v5557_v1 = vrot.slane %v9514_v12, %v8080_v58  ;;  %v5564_v22 = vrot.slane %v9526_v34, %v8080_v58  ;;  %v3560_v43 = vrot.slane %v11405_v9, %v8027_v13  ;;  %v3567_v5 = vrot.slane %v11405_v9, %v8030_v16  ;;  %v11411_v12 = vld [vmem:[#allocation39_spill] sm:$0xff] }
 0x1ab   :  { %v3518_v7 = vrot.slane %v11408_v17, %v8009_v3  ;;  %v3525_v32 = vrot.slane %v11408_v17, %v8012_v4  ;;  %11409 = vst [vmem:[#allocation17_spill] sm:$0xff] %v10000_v0  ;;  %6609 = vperm.xlu1 %7517, %v5344_v11   ;;  %11410 = vst [vmem:[#allocation24_spill] sm:$0xff] %v10002_v8  ;;  %v3602_v34 = vrot.slane %v11411_v12, %v8009_v3  ;;  %v11412_v9 = vld [vmem:[#allocation79_spill] sm:$0xff]  ;;  %v11414_v0 = vld [vmem:[#allocation21_spill] sm:$0xff] }
 0x1ac   :  { %v3609_v63 = vrot.slane %v11411_v12, %v8012_v4  ;;  %v3532_v25 = vrot.slane %v11408_v17, %v8027_v13  ;;  %v3539_v50 = vrot.slane %v11408_v17, %v8030_v16  ;;  %6642 = vperm.xlu0 %7516, %v5531_v48   ;;  %v3616_v47 = vrot.slane %v11411_v12, %v8027_v13  ;;  %v11415_v17 = vld [vmem:[#allocation60_spill] sm:$0xff] }
 0x1ad   :  { %v5378_v44 = vcombine.low %v5370_v61, %v5377_v40  ;;  %v5404_v11 = vrot.slane %v11412_v9, %v8080_v58  ;;  %v5411_v14 = vrot.slane %v11413_v20, %v8080_v58  ;;  %v3623_v8 = vrot.slane %v11411_v12, %v8030_v16  ;;  %v10032_v12 = vpop.permute.xlu1 %6435 }
 0x1ae   :  { %v5565_v10 = vcombine.low %v5557_v1, %v5564_v22  ;;  %v5591_v29 = vrot.slane %v11414_v0, %v8080_v58  ;;  %v5598_v48 = vrot.slane %v9578_v31, %v8080_v58  ;;  %v3574_v35 = vrot.slane %v11415_v17, %v8009_v3  ;;  %11416 = vst [vmem:[#allocation26_spill] sm:$0xff] %v10032_v12  ;;  %v10034_v1 = vpop.permute.xlu0 %6462 }
 0x1af   :  { %v3581_v61 = vrot.slane %v11415_v17, %v8012_v4  ;;  %v3588_v40 = vrot.slane %v11415_v17, %v8027_v13  ;;  %v3595_v9 = vrot.slane %v11415_v17, %v8030_v16  ;;  %6615 = vperm.xlu1 %7517, %v5378_v44   ;;  %11417 = vst [vmem:[#allocation56_spill] sm:$0xff] %v10034_v1  ;;  %v10045_v62 = vand.u32 127, %v11418_v37  ;;  %v11419_v17 = vld [vmem:[#allocation62_spill] sm:$0xff]  ;;  %v11420_v44 = vld [vmem:[#allocation19_spill] sm:$0xff] }
 0x1b0   :  { %v10036_v22 = vcombine.low %v3546_v24, %v3553_v30  ;;  %v10038_v31 = vcombine.low %v3560_v43, %v3567_v5  ;;  %v10040_v0 = vcombine.low %v3476_v55, %v3483_v51  ;;  %v10042_v20 = vcombine.low %v3518_v7, %v3525_v32  ;;  %6648 = vperm.xlu0 %7516, %v5565_v10  }
 0x1b1   :  { %v5412_v26 = vcombine.low %v5404_v11, %v5411_v14  ;;  %v5438_v60 = vrot.slane %v11419_v17, %v8080_v58  ;;  %v5445_v12 = vrot.slane %v11420_v44, %v8080_v58  ;;  %v10051_v1 = vcombine.low %v3532_v25, %v3539_v50  ;;  %v10065_v5 = vpop.permute.xlu1 %6438  ;;  %v11425_v50 = vld [vmem:[#allocation28_spill] sm:$0xff] }
 0x1b2   :  { %v5599_v24 = vcombine.low %v5591_v29, %v5598_v48  ;;  %v5625_v55 = vrot.slane %v9590_v21, %v8080_v58  ;;  %v5632_v51 = vrot.slane %v9598_v45, %v8080_v58  ;;  %v10057_v10 = vcombine.low %v3602_v34, %v3609_v63  ;;  %11421 = vst [vmem:[#allocation73_spill] sm:$0xff] %v10065_v5  ;;  %v10067_v7 = vpop.permute.xlu0 %6468 }
 0x1b3   :  { %v10059_v37 = vcombine.low %v3616_v47, %v3623_v8  ;;  %v10061_v30 = vcombine.low %v3574_v35, %v3581_v61  ;;  %v10063_v43 = vcombine.low %v3588_v40, %v3595_v9  ;;  %6621 = vperm.xlu1 %7517, %v5412_v26   ;;  %v6806_v8 = vadd.s32 4294967288, %v10045_v62  ;;  %v11424_v26 = vld [vmem:[#allocation59_spill] sm:$0xff] }
 0x1b4   :  { %6654 = vperm.xlu0 %7516, %v5599_v24   ;;  %v5446_v63 = vcombine.low %v5438_v60, %v5445_v12  ;;  %v5472_v25 = vrot.slane %v11424_v26, %v8080_v58  ;;  %v5479_v47 = vrot.slane %v11425_v50, %v8080_v58  ;;  %v6813_v11 = vadd.s32 4294967280, %v10045_v62  ;;  %v11428_v50 = vld [vmem:[#allocation35_spill] sm:$0xff] }
 0x1b5   :  { %v5633_v14 = vcombine.low %v5625_v55, %v5632_v51  ;;  %v5659_v48 = vrot.slane %v9622_v19, %v8080_v58  ;;  %v5666_v61 = vrot.slane %v9654_v33, %v8080_v58  ;;  %v3826_v40 = vrot.slane %v9618_v59, %v8009_v3  ;;  %v10095_v17 = vpop.permute.xlu1 %6441 }
 0x1b6   :  { %v3833_v60 = vrot.slane %v9618_v59, %v8012_v4  ;;  %v3840_v9 = vrot.slane %v9618_v59, %v8027_v13  ;;  %v3847_v12 = vrot.slane %v9618_v59, %v8030_v16  ;;  %11426 = vst [vmem:[#allocation37_spill] sm:$0xff] %v10095_v17  ;;  %v10097_v44 = vpop.permute.xlu0 %6474  ;;  %v3798_v24 = vrot.slane %v9620_v52, %v8009_v3 }
 0x1b7   :  { %6627 = vperm.xlu1 %7517, %v5446_v63   ;;  %v3805_v55 = vrot.slane %v9620_v52, %v8012_v4  ;;  %v3812_v59 = vrot.slane %v9620_v52, %v8027_v13  ;;  %v5480_v51 = vcombine.low %v5472_v25, %v5479_v47  ;;  %v11427_v63 = vld [vmem:[#allocation61_spill] sm:$0xff]  ;;  %v5513_v32 = vrot.slane %v11428_v50, %v8080_v58 }
 0x1b8   :  { %6660 = vperm.xlu0 %7516, %v5633_v14   ;;  %v5506_v26 = vrot.slane %v11427_v63, %v8080_v58  ;;  %v3819_v21 = vrot.slane %v9620_v52, %v8030_v16  ;;  %v5667_v19 = vcombine.low %v5659_v48, %v5666_v61  ;;  %v5693_v33 = vrot.slane %v9668_v38, %v8080_v58  ;;  %v11429_v25 = vld [vmem:[#allocation9_spill] sm:$0xff] }
 0x1b9   :  { %v5700_v14 = vrot.slane %v9674_v56, %v8080_v58  ;;  %v10119_v34 = vcombine.low %v3826_v40, %v3833_v60  ;;  %v10121_v35 = vcombine.low %v3840_v9, %v3847_v12  ;;  %v10124_v47 = vsub.s32 %v6806_v8, %v11429_v25  ;;  %v10129_v50 = vpop.permute.xlu1 %6447  ;;  %v11432_v40 = vld [vmem:[#allocation36_spill] sm:$0xff] }
 0x1ba   :  { %v10127_v63 = vsub.s32 %v6813_v11, %v11429_v25  ;;  %11430 = vst [vmem:[#allocation67_spill] sm:$0xff] %v10129_v50  ;;  %v10131_v52 = vpop.permute.xlu0 %6480  ;;  %v3882_v38 = vrot.slane %v9650_v49, %v8009_v3  ;;  %v3889_v56 = vrot.slane %v9650_v49, %v8012_v4  ;;  %v3896_v48 = vrot.slane %v9650_v49, %v8027_v13  ;;  %v11433_v9 = vld [vmem:[#allocation20_spill] sm:$0xff] }
 0x1bb   :  { %6633 = vperm.xlu1 %7517, %v5480_v51   ;;  %v3903_v8 = vrot.slane %v9650_v49, %v8030_v16  ;;  %v10141_v11 = vcombine.low %v3798_v24, %v3805_v55  ;;  %v5514_v61 = vcombine.low %v5506_v26, %v5513_v32  ;;  %v5540_v60 = vrot.slane %v11432_v40, %v8080_v58  ;;  %v11437_v40 = vld [vmem:[#allocation71_spill] sm:$0xff] }
 0x1bc   :  { %6666 = vperm.xlu0 %7516, %v5667_v19   ;;  %v5547_v12 = vrot.slane %v11433_v9, %v8080_v58  ;;  %v10147_v51 = vcombine.low %v3812_v59, %v3819_v21  ;;  %v5701_v50 = vcombine.low %v5693_v33, %v5700_v14  ;;  %v5727_v17 = vrot.slane %v9706_v46, %v8080_v58  ;;  %v11436_v14 = vld [vmem:[#allocation70_spill] sm:$0xff]  ;;  %v11438_v9 = vld [vmem:[#allocation63_spill] sm:$0xff] }
 0x1bd   :  { %11431 = vst [vmem:[#allocation75_spill] sm:$0xff] %v10141_v11  ;;  %v5734_v5 = vrot.slane %v9726_v2, %v8080_v58  ;;  %v3854_v49 = vrot.slane %v9652_v27, %v8009_v3  ;;  %v3861_v32 = vrot.slane %v9652_v27, %v8012_v4  ;;  %v3868_v19 = vrot.slane %v9652_v27, %v8027_v13  ;;  %v10161_v24 = vpop.permute.xlu1 %6453 }
 0x1be   :  { %11434 = vst [vmem:[#allocation76_spill] sm:$0xff] %v10147_v51  ;;  %v3875_v21 = vrot.slane %v9652_v27, %v8030_v16  ;;  %11435 = vst [vmem:[#allocation29_spill] sm:$0xff] %v10161_v24  ;;  %v10163_v33 = vpop.permute.xlu0 %6486  ;;  %v10165_v46 = vcombine.low %v3882_v38, %v3889_v56  ;;  %v10167_v2 = vcombine.low %v3896_v48, %v3903_v8 }
 0x1bf   :  { %6639 = vperm.xlu1 %7517, %v5514_v61   ;;  %v3938_v55 = vrot.slane %v9682_v54, %v8009_v3  ;;  %v3945_v59 = vrot.slane %v9682_v54, %v8012_v4  ;;  %v3952_v26 = vrot.slane %v9682_v54, %v8027_v13  ;;  %v5548_v27 = vcombine.low %v5540_v60, %v5547_v12 }
 0x1c0   :  { %6672 = vperm.xlu0 %7516, %v5701_v50   ;;  %v5574_v61 = vrot.slane %v11436_v14, %v8080_v58  ;;  %v5581_v38 = vrot.slane %v11437_v40, %v8080_v58  ;;  %v3959_v56 = vrot.slane %v9682_v54, %v8030_v16  ;;  %v5735_v48 = vcombine.low %v5727_v17, %v5734_v5 }
 0x1c1   :  { %v5761_v8 = vrot.slane %v9738_v57, %v8080_v58  ;;  %v5768_v50 = vrot.slane %v9750_v36, %v8080_v58  ;;  %v3910_v24 = vrot.slane %v11438_v9, %v8009_v3  ;;  %v3917_v60 = vrot.slane %v11438_v9, %v8012_v4  ;;  %v10193_v54 = vpop.permute.xlu1 %6459 }
 0x1c2   :  { %v3924_v12 = vrot.slane %v11438_v9, %v8027_v13  ;;  %v3931_v14 = vrot.slane %v11438_v9, %v8030_v16  ;;  %11439 = vst [vmem:[#allocation39_spill] sm:$0xff] %v10193_v54  ;;  %v10195_v5 = vpop.permute.xlu0 %6492  ;;  %v10197_v57 = vcombine.low %v3854_v49, %v3861_v32  ;;  %v10199_v36 = vcombine.low %v3868_v19, %v3875_v21  ;;  %v11442_v9 = vld [vmem:[#allocation41_spill] sm:$0xff] }
 0x1c3   :  { %6645 = vperm.xlu1 %7517, %v5548_v27   ;;  %v10203_v17 = vsub.s32 %v10045_v62, %v11429_v25  ;;  %v10205_v40 = vcombine.low %v3938_v55, %v3945_v59  ;;  %v5582_v45 = vcombine.low %v5574_v61, %v5581_v38  ;;  %v5608_v29 = vrot.slane %v11442_v9, %v8080_v58  ;;  %v11443_v27 = vld [vmem:[#allocation69_spill] sm:$0xff] }
 0x1c4   :  { %11440 = vst [vmem:[#allocation79_spill] sm:$0xff] %v10197_v57  ;;  %11441 = vst [vmem:[#allocation27_spill] sm:$0xff] %v10199_v36  ;;  %6678 = vperm.xlu0 %7516, %v5735_v48   ;;  %v5615_v54 = vrot.slane %v11443_v27, %v8080_v58  ;;  %v10211_v51 = vcombine.low %v3952_v26, %v3959_v56  ;;  %v5769_v49 = vcombine.low %v5761_v8, %v5768_v50  ;;  %v11446_v26 = vld [vmem:[#allocation14_spill] sm:$0xff]  ;;  %v11449_v27 = vld [vmem:[#allocation51_spill] sm:$0xff] }
 0x1c5   :  { %v5795_v32 = vrot.slane %v9802_v41, %v8080_v58  ;;  %v5802_v19 = vrot.slane %v9804_v6, %v8080_v58  ;;  %v10217_v21 = vcombine.low %v3910_v24, %v3917_v60  ;;  %v10219_v55 = vcombine.low %v3924_v12, %v3931_v14  ;;  %v6466_v61 = vpop.permute.xlu1 %6465  ;;  %v11448_v60 = vld [vmem:[#allocation42_spill] sm:$0xff]  ;;  %v11450_v56 = vld [vmem:[#allocation48_spill] sm:$0xff] }
 0x1c6   :  { %v6820_v59 = vadd.s32 4294967272, %v10045_v62  ;;  %v10222_v38 = vpop.permute.xlu0 %6498  ;;  %v6827_v24 = vadd.s32 4294967264, %v10045_v62  ;;  %v6914_v48 = vrot.slane %v6466_v61, %v10203_v17  ;;  %v5616_v8 = vcombine.low %v5608_v29, %v5615_v54 }
 0x1c7   :  { %11444 = vst [vmem:[#allocation21_spill] sm:$0xff] %v10217_v21  ;;  %11445 = vst [vmem:[#allocation60_spill] sm:$0xff] %v10219_v55  ;;  %6651 = vperm.xlu1 %7517, %v5582_v45   ;;  %v11447_v45 = vld [vmem:[#allocation54_spill] sm:$0xff]  ;;  %v5649_v12 = vrot.slane %v11448_v60, %v8080_v58  ;;  %v5803_v9 = vcombine.low %v5795_v32, %v5802_v19  ;;  %v5829_v6 = vrot.slane %v11449_v27, %v8080_v58 }
 0x1c8   :  { %6684 = vperm.xlu0 %7516, %v5769_v49   ;;  %v5642_v50 = vrot.slane %v11447_v45, %v8080_v58  ;;  %v5836_v41 = vrot.slane %v11450_v56, %v8080_v58  ;;  %v11451_v49 = vld [vmem:[#allocation6_spill] sm:$0xff]  ;;  %v6834_v54 = vadd.s32 4294967256, %v10045_v62  ;;  %v6918_v45 = vrot.slane %v10067_v7, %v10124_v47 }
 0x1c9   :  { %v6472_v60 = vpop.permute.xlu1 %6471  ;;  %v10252_v19 = vsub.s32 %v6820_v59, %v11429_v25  ;;  %v10255_v56 = vsub.s32 %v6827_v24, %v11429_v25  ;;  %v6841_v27 = vadd.s32 4294967248, %v10045_v62  ;;  %v11452_v7 = vld [vmem:[#allocation30_spill] sm:$0xff]  ;;  %v5863_v24 = vrot.slane %v9876_v39, %v8080_v58 }
 0x1ca   :  { %v10249_v32 = vpop.permute.xlu0 %6504  ;;  %v6923_v61 = vrot.slane %v6472_v60, %v10127_v63  ;;  %v6919_v29 = vsel %vm6811_vm1, %v6918_v45, %v6914_v48  ;;  %v5650_v14 = vcombine.low %v5642_v50, %v5649_v12  ;;  %v5676_v55 = vrot.slane %v11452_v7, %v8080_v58  ;;  %v11454_v45 = vld [vmem:[#allocation64_spill] sm:$0xff] }
 0x1cb   :  { %6657 = vperm.xlu1 %7517, %v5616_v8   ;;  %v11453_v8 = vld [vmem:[#allocation40_spill] sm:$0xff]  ;;  %v5837_v36 = vcombine.low %v5829_v6, %v5836_v41  ;;  %v5870_v57 = vrot.slane %v9878_v23, %v8080_v58  ;;  %v10272_v48 = vsub.s32 %v6834_v54, %v11429_v25  ;;  %v6928_v50 = vrot.slane %v10097_v44, %v10252_v19 }
 0x1cc   :  { %6690 = vperm.xlu0 %7516, %v5803_v9   ;;  %v5683_v21 = vrot.slane %v11453_v8, %v8080_v58  ;;  %v6924_v59 = vsel %vm6818_vm2, %v6923_v61, %v6919_v29  ;;  %v10279_v41 = vsub.s32 %v6841_v27, %v11429_v25  ;;  %v6848_v39 = vadd.s32 4294967240, %v10045_v62 }
 0x1cd   :  { %v6478_v12 = vpop.permute.xlu1 %6477  ;;  %v6855_v23 = vadd.s32 4294967232, %v10045_v62  ;;  %v6929_v29 = vsel %vm6825_vm3, %v6928_v50, %v6924_v59  ;;  %v5710_v44 = vrot.slane %v11454_v45, %v8080_v58  ;;  %v5871_v27 = vcombine.low %v5863_v24, %v5870_v57 }
 0x1ce   :  { %v10276_v61 = vpop.permute.xlu0 %6510  ;;  %v6933_v6 = vrot.slane %v6478_v12, %v10255_v56  ;;  %v5684_v54 = vcombine.low %v5676_v55, %v5683_v21  ;;  %v5897_v8 = vrot.slane %v9896_v28, %v8080_v58  ;;  %v5904_v9 = vrot.slane %v9898_v42, %v8080_v58 }
 0x1cf   :  { %6663 = vperm.xlu1 %7517, %v5650_v14   ;;  %v11455_v14 = vld [vmem:[#allocation65_spill] sm:$0xff]  ;;  %v6938_v21 = vrot.slane %v10131_v52, %v10272_v48  ;;  %v10300_v50 = vsub.s32 %v6848_v39, %v11429_v25  ;;  %v10303_v57 = vsub.s32 %v6855_v23, %v11429_v25  ;;  %v6869_v28 = vadd.s32 4294967216, %v10045_v62  ;;  %v11456_v52 = vld [vmem:[#allocation34_spill] sm:$0xff] }
 0x1d0   :  { %6696 = vperm.xlu0 %7516, %v5837_v36   ;;  %v5717_v60 = vrot.slane %v11455_v14, %v8080_v58  ;;  %v6934_v7 = vsel %vm6832_vm4, %v6933_v6, %v6929_v29  ;;  %v6862_v36 = vadd.s32 4294967224, %v10045_v62  ;;  %v5744_v6 = vrot.slane %v11456_v52, %v8080_v58  ;;  %v11457_v29 = vld [vmem:[#allocation72_spill] sm:$0xff] }
 0x1d1   :  { %v6484_v55 = vpop.permute.xlu1 %6483  ;;  %v6939_v24 = vsel %vm6839_vm5, %v6938_v21, %v6934_v7  ;;  %v5905_v45 = vcombine.low %v5897_v8, %v5904_v9  ;;  %v5931_v23 = vrot.slane %v9954_v18, %v8080_v58  ;;  %v5938_v14 = vrot.slane %v9960_v53, %v8080_v58 }
 0x1d2   :  { %v10297_v59 = vpop.permute.xlu0 %6516  ;;  %v6943_v42 = vrot.slane %v6484_v55, %v10279_v41  ;;  %v5718_v12 = vcombine.low %v5710_v44, %v5717_v60  ;;  %v6876_v44 = vadd.s32 4294967208, %v10045_v62  ;;  %v6948_v60 = vrot.slane %v10163_v33, %v10300_v50  ;;  %v11458_v55 = vld [vmem:[#allocation44_spill] sm:$0xff]  ;;  %v11459_v33 = vld [vmem:[#allocation57_spill] sm:$0xff] }
 0x1d3   :  { %6669 = vperm.xlu1 %7517, %v5684_v54   ;;  %v5751_v54 = vrot.slane %v11457_v29, %v8080_v58  ;;  %v10326_v9 = vsub.s32 %v6869_v28, %v11429_v25  ;;  %v6883_v18 = vadd.s32 4294967200, %v10045_v62  ;;  %v5939_v52 = vcombine.low %v5931_v23, %v5938_v14  ;;  %v11460_v29 = vld [vmem:[#allocation22_spill] sm:$0xff] }
 0x1d4   :  { %6702 = vperm.xlu0 %7516, %v5871_v27   ;;  %v6944_v39 = vsel %vm6846_vm6, %v6943_v42, %v6939_v24  ;;  %v10318_v27 = vsub.s32 %v6862_v36, %v11429_v25  ;;  %v5778_v42 = vrot.slane %v11458_v55, %v8080_v58  ;;  %v5785_v24 = vrot.slane %v11459_v33, %v8080_v58 }
 0x1d5   :  { %v6490_v7 = vpop.permute.xlu1 %6489  ;;  %v6949_v8 = vsel %vm6853_vm7, %v6948_v60, %v6944_v39  ;;  %v5752_v36 = vcombine.low %v5744_v6, %v5751_v54  ;;  %v5965_v28 = vrot.slane %v9972_v15, %v8080_v58  ;;  %v5972_v11 = vrot.slane %v11460_v29, %v8080_v58 }
 0x1d6   :  { %v10323_v21 = vpop.permute.xlu0 %6522  ;;  %v6953_v53 = vrot.slane %v6490_v7, %v10303_v57  ;;  %v6890_v6 = vadd.s32 4294967192, %v10045_v62  ;;  %v6958_v54 = vrot.slane %v10195_v5, %v10318_v27  ;;  %v10349_v23 = vsub.s32 %v6883_v18, %v11429_v25  ;;  %v11462_v5 = vld [vmem:[#allocation52_spill] sm:$0xff] }
 0x1d7   :  { %6675 = vperm.xlu1 %7517, %v5718_v12   ;;  %v6897_v15 = vadd.s32 4294967184, %v10045_v62  ;;  %v5786_v7 = vcombine.low %v5778_v42, %v5785_v24  ;;  %v5973_v33 = vcombine.low %v5965_v28, %v5972_v11  ;;  %v5999_v18 = vrot.slane %v10036_v22, %v8080_v58 }
 0x1d8   :  { %6708 = vperm.xlu0 %7516, %v5905_v45   ;;  %v6954_v12 = vsel %vm6860_vm8, %v6953_v53, %v6949_v8  ;;  %v10341_v45 = vsub.s32 %v6876_v44, %v11429_v25  ;;  %v11461_v53 = vld [vmem:[#allocation45_spill] sm:$0xff]  ;;  %v6006_v29 = vrot.slane %v10038_v31, %v8080_v58  ;;  %v10366_v42 = vsub.s32 %v6890_v6, %v11429_v25 }
 0x1d9   :  { %v6496_v39 = vpop.permute.xlu1 %6495  ;;  %v6959_v44 = vsel %vm6867_vm9, %v6958_v54, %v6954_v12  ;;  %v5812_v8 = vrot.slane %v11461_v53, %v8080_v58  ;;  %v6904_v24 = vadd.s32 4294967176, %v10045_v62  ;;  %v10374_v22 = vsub.s32 %v6897_v15, %v11429_v25  ;;  %v11463_v62 = vld [vmem:[#allocation8_spill] sm:$0xff] }
 0x1da   :  { %v10346_v60 = vpop.permute.xlu0 %6528  ;;  %v6963_v14 = vrot.slane %v6496_v39, %v10326_v9  ;;  %v6968_v12 = vrot.slane %v10222_v38, %v10341_v45  ;;  %v5846_v39 = vrot.slane %v11463_v62, %v8080_v58  ;;  %v11464_v38 = vld [vmem:[#allocation10_spill] sm:$0xff]  ;;  %v6033_v53 = vrot.slane %v10057_v10, %v8080_v58 }
 0x1db   :  { %6681 = vperm.xlu1 %7517, %v5752_v36   ;;  %v5819_v36 = vrot.slane %v11462_v5, %v8080_v58  ;;  %v6040_v15 = vrot.slane %v10059_v37, %v8080_v58  ;;  %v11465_v5 = vrot.slane %v11446_v26, %v8012_v4  ;;  %v6169_v62 = vrot.slane %v10119_v34, %v8080_v58 }
 0x1dc   :  { %6714 = vperm.xlu0 %7516, %v5939_v52   ;;  %v6964_v55 = vsel %vm6874_vm10, %v6963_v14, %v6959_v44  ;;  %v3987_v52 = vrot.slane %v11451_v49, %v8030_v16  ;;  %v5853_v14 = vrot.slane %v11464_v38, %v8080_v58  ;;  %v6176_v38 = vrot.slane %v10121_v35, %v8080_v58 }
 0x1dd   :  { %v6502_v54 = vpop.permute.xlu1 %6501  ;;  %v6969_v28 = vsel %vm6881_vm11, %v6968_v12, %v6964_v55  ;;  %v5820_v6 = vcombine.low %v5812_v8, %v5819_v36  ;;  %v11466_v8 = vrot.slane %v11446_v26, %v8009_v3  ;;  %v10396_v55 = vsub.s32 %v6904_v24, %v11429_v25 }
 0x1de   :  { %v10371_v11 = vpop.permute.xlu0 %6534  ;;  %v6973_v31 = vrot.slane %v6502_v54, %v10349_v23  ;;  %v5854_v54 = vcombine.low %v5846_v39, %v5853_v14  ;;  %v11471_v39 = vld [vmem:[#allocation31_spill] sm:$0xff] }
 0x1df   :  { %6687 = vperm.xlu1 %7517, %v5786_v7   ;;  %v6007_v7 = vcombine.low %v5999_v18, %v6006_v29  ;;  %v10393_v36 = vcombine.low %v11466_v8, %v11465_v5  ;;  %v11467_v29 = vld [vmem:[#allocation53_spill] sm:$0xff]  ;;  %v6988_v25 = vrot.slane %v10276_v61, %v10396_v55  ;;  %v11470_v61 = vrot.slane %v11446_v26, %v8027_v13 }
 0x1e0   :  { %6720 = vperm.xlu0 %7516, %v5973_v33   ;;  %v6974_v44 = vsel %vm6888_vm12, %v6973_v31, %v6969_v28  ;;  %v6978_v33 = vrot.slane %v10249_v32, %v10366_v42  ;;  %v5880_v12 = vrot.slane %v11467_v29, %v8080_v58  ;;  %v11468_v32 = vld [vmem:[#allocation78_spill] sm:$0xff]  ;;  %v4050_v14 = vrot.slane %v11471_v39, %v8009_v3 }
 0x1e1   :  { %v6508_v18 = vpop.permute.xlu1 %6507  ;;  %v5887_v31 = vrot.slane %v11468_v32, %v8080_v58  ;;  %v4064_v5 = vrot.slane %v11471_v39, %v8027_v13  ;;  %v6997_v8 = vrot.slane %v10297_v59, %v10124_v47  ;;  %v11475_v32 = vld [vmem:[#allocation11_spill] sm:$0xff] }
 0x1e2   :  { %v10400_v10 = vpop.permute.xlu0 %6540  ;;  %v6983_v37 = vrot.slane %v6508_v18, %v10374_v22  ;;  %v6979_v24 = vsel %vm6895_vm13, %v6978_v33, %v6974_v44  ;;  %v11472_v18 = vrot.slane %v11451_v49, %v8012_v4 }
 0x1e3   :  { %6693 = vperm.xlu1 %7517, %v5820_v6   ;;  %v6041_v6 = vcombine.low %v6033_v53, %v6040_v15  ;;  %v4057_v53 = vrot.slane %v11471_v39, %v8012_v4 }
 0x1e4   :  { %6726 = vperm.xlu0 %7516, %v6007_v7   ;;  %v6984_v28 = vsel %vm6902_vm14, %v6983_v37, %v6979_v24  ;;  %v11469_v7 = vrot.slane %v11446_v26, %v8030_v16  ;;  %v4071_v26 = vrot.slane %v11471_v39, %v8030_v16  ;;  %v11473_v37 = vrot.slane %v11451_v49, %v8009_v3  ;;  %v11474_v24 = vld [vmem:[#allocation74_spill] sm:$0xff] }
 0x1e5   :  { %v10428_v15 = vsel %vm6909_vm15, %v6988_v25, %v6984_v28  ;;  %v6514_v34 = vpop.permute.xlu1 %6513  ;;  %v5888_v25 = vcombine.low %v5880_v12, %v5887_v31  ;;  %v5921_v28 = vrot.slane %v11475_v32, %v8080_v58  ;;  %v11476_v39 = vrot.slane %v11451_v49, %v8027_v13  ;;  %v11477_v12 = vld [vmem:[#allocation50_spill] sm:$0xff] }
 0x1e6   :  { %v10421_v44 = vcombine.low %v11470_v61, %v11469_v7  ;;  %v10430_v35 = vpop.permute.xlu0 %6546  ;;  %v6993_v33 = vrot.slane %v6514_v34, %v10203_v17  ;;  %v10445_v29 = vcombine.low %v11473_v37, %v11472_v18  ;;  %v6177_v7 = vcombine.low %v6169_v62, %v6176_v38 }
 0x1e7   :  { %6699 = vperm.xlu1 %7517, %v5854_v54   ;;  %v5914_v54 = vrot.slane %v11474_v24, %v8080_v58  ;;  %v6210_v61 = vrot.slane %v10167_v2, %v8080_v58  ;;  %v10459_v34 = vcombine.low %v11476_v39, %v3987_v52  ;;  %v4022_v31 = vrot.slane %v11477_v12, %v8009_v3  ;;  %v11478_v24 = vld [vmem:[#allocation16_spill] sm:$0xff] }
 0x1e8   :  { %6732 = vperm.xlu0 %7516, %v6041_v6   ;;  %v6998_v59 = vsel %vm6811_vm1, %v6997_v8, %v6993_v33  ;;  %v6203_v6 = vrot.slane %v10165_v46, %v8080_v58  ;;  %v4029_v18 = vrot.slane %v11477_v12, %v8012_v4  ;;  %v10469_v8 = vcombine.low %v4050_v14, %v4057_v53 }
 0x1e9   :  { %v6520_v38 = vpop.permute.xlu1 %6519  ;;  %v10471_v2 = vcombine.low %v4064_v5, %v4071_v26  ;;  %v7007_v33 = vrot.slane %v10323_v21, %v10252_v19  ;;  %v5922_v37 = vcombine.low %v5914_v54, %v5921_v28  ;;  %v5948_v32 = vrot.slane %v11478_v24, %v8080_v58  ;;  %v11480_v54 = vld [vmem:[#allocation38_spill] sm:$0xff] }
 0x1ea   :  { %v10467_v46 = vpop.permute.xlu0 %6552  ;;  %v7002_v52 = vrot.slane %v6520_v38, %v10127_v63  ;;  %v6211_v53 = vcombine.low %v6203_v6, %v6210_v61  ;;  %v6237_v5 = vrot.slane %v10205_v40, %v8080_v58  ;;  %v6244_v26 = vrot.slane %v10211_v51, %v8080_v58 }
 0x1eb   :  { %6705 = vperm.xlu1 %7517, %v5888_v25   ;;  %v5955_v25 = vrot.slane %v10040_v0, %v8080_v58  ;;  %v4078_v28 = vrot.slane %v11480_v54, %v8009_v3  ;;  %v4085_v40 = vrot.slane %v11480_v54, %v8012_v4  ;;  %v4092_v51 = vrot.slane %v11480_v54, %v8027_v13 }
 0x1ec   :  { %6756 = vperm.xlu0 %7516, %v6177_v7   ;;  %v7003_v14 = vsel %vm6818_vm2, %v7002_v52, %v6998_v59  ;;  %v11479_v7 = vld [vmem:[#allocation68_spill] sm:$0xff]  ;;  %v4099_v6 = vrot.slane %v11480_v54, %v8030_v16  ;;  %v7017_v52 = vrot.slane %v10346_v60, %v10272_v48  ;;  %v6245_v62 = vcombine.low %v6237_v5, %v6244_v26 }
 0x1ed   :  { %v4106_v39 = vrot.slane %v11479_v7, %v8009_v3  ;;  %v4113_v21 = vrot.slane %v11479_v7, %v8012_v4  ;;  %v6526_v38 = vpop.permute.xlu1 %6525  ;;  %v7008_v0 = vsel %vm6825_vm3, %v7007_v33, %v7003_v14  ;;  %v5956_v24 = vcombine.low %v5948_v32, %v5955_v25 }
 0x1ee   :  { %v10494_v59 = vpop.permute.xlu0 %6558  ;;  %v7012_v61 = vrot.slane %v6526_v38, %v10255_v56  ;;  %v5982_v33 = vrot.slane %v10042_v20, %v8080_v58  ;;  %v6271_v49 = vrot.slane %v10393_v36, %v8080_v58  ;;  %v6278_v54 = vrot.slane %v10421_v44, %v8080_v58 }
 0x1ef   :  { %6711 = vperm.xlu1 %7517, %v5922_v37   ;;  %v5989_v37 = vrot.slane %v10051_v1, %v8080_v58  ;;  %v4127_v60 = vrot.slane %v11479_v7, %v8030_v16  ;;  %v10518_v32 = vcombine.low %v4022_v31, %v4029_v18  ;;  %v10523_v5 = vcombine.low %v4106_v39, %v4113_v21 }
 0x1f0   :  { %6762 = vperm.xlu0 %7516, %v6211_v53   ;;  %v7013_v14 = vsel %vm6832_vm4, %v7012_v61, %v7008_v0  ;;  %v4120_v53 = vrot.slane %v11479_v7, %v8027_v13  ;;  %v6314_v36 = vcombine.low %v4078_v28, %v4085_v40  ;;  %v6315_v26 = vcombine.low %v4092_v51, %v4099_v6  ;;  %v11481_v28 = vld [vmem:[#allocation43_spill] sm:$0xff]  ;;  %v11482_v40 = vld [vmem:[#allocation13_spill] sm:$0xff] }
 0x1f1   :  { %v6532_v20 = vpop.permute.xlu1 %6531  ;;  %v7018_v1 = vsel %vm6839_vm5, %v7017_v52, %v7013_v14  ;;  %v7027_v38 = vrot.slane %v10371_v11, %v10300_v50  ;;  %v5990_v0 = vcombine.low %v5982_v33, %v5989_v37  ;;  %v6016_v31 = vrot.slane %v10061_v30, %v8080_v58  ;;  %v11483_v37 = vld [vmem:[#allocation75_spill] sm:$0xff] }
 0x1f2   :  { %v10521_v25 = vpop.permute.xlu0 %6564  ;;  %v7022_v44 = vrot.slane %v6532_v20, %v10279_v41  ;;  %v6023_v18 = vrot.slane %v10063_v43, %v8080_v58  ;;  %v6279_v61 = vcombine.low %v6271_v49, %v6278_v54  ;;  %v6305_v39 = vrot.slane %v10469_v8, %v8080_v58  ;;  %v11484_v54 = vld [vmem:[#allocation76_spill] sm:$0xff] }
 0x1f3   :  { %6717 = vperm.xlu1 %7517, %v5956_v24   ;;  %v6312_v21 = vrot.slane %v10471_v2, %v8080_v58  ;;  %v4162_v11 = vrot.slane %v11481_v28, %v8009_v3  ;;  %v4134_v51 = vrot.slane %v11482_v40, %v8009_v3  ;;  %v4141_v49 = vrot.slane %v11482_v40, %v8012_v4 }
 0x1f4   :  { %6768 = vperm.xlu0 %7516, %v6245_v62   ;;  %v7023_v7 = vsel %vm6846_vm6, %v7022_v44, %v7018_v1  ;;  %v6332_v62 = vcombine.low %v4120_v53, %v4127_v60  ;;  %v4148_v8 = vrot.slane %v11482_v40, %v8027_v13  ;;  %v4155_v2 = vrot.slane %v11482_v40, %v8030_v16 }
 0x1f5   :  { %v6538_v30 = vpop.permute.xlu1 %6537  ;;  %v7028_v6 = vsel %vm6853_vm7, %v7027_v38, %v7023_v7  ;;  %v7037_v24 = vrot.slane %v10400_v10, %v10318_v27  ;;  %v6024_v33 = vcombine.low %v6016_v31, %v6023_v18  ;;  %v6152_v14 = vrot.slane %v11483_v37, %v8080_v58 }
 0x1f6   :  { %v10542_v43 = vpop.permute.xlu0 %6570  ;;  %v7032_v52 = vrot.slane %v6538_v30, %v10303_v57  ;;  %v6159_v53 = vrot.slane %v11484_v54, %v8080_v58  ;;  %v6313_v20 = vcombine.low %v6305_v39, %v6312_v21  ;;  %v6322_v1 = vrot.slane %v6314_v36, %v8080_v58  ;;  %v11489_v54 = vld [vmem:[#allocation49_spill] sm:$0xff] }
 0x1f7   :  { %6723 = vperm.xlu1 %7517, %v5990_v0   ;;  %v6329_v44 = vrot.slane %v6315_v26, %v8080_v58  ;;  %v4169_v38 = vrot.slane %v11481_v28, %v8012_v4  ;;  %v4176_v10 = vrot.slane %v11481_v28, %v8027_v13  ;;  %v4183_v0 = vrot.slane %v11481_v28, %v8030_v16 }
 0x1f8   :  { %6774 = vperm.xlu0 %7516, %v6279_v61   ;;  %v7033_v60 = vsel %vm6860_vm8, %v7032_v52, %v7028_v6  ;;  %v11485_v36 = vrot.slane %v11477_v12, %v8030_v16  ;;  %v11486_v26 = vrot.slane %v11477_v12, %v8027_v13  ;;  %v6348_v39 = vcombine.low %v4134_v51, %v4141_v49  ;;  %v11487_v6 = vld [vmem:[#allocation79_spill] sm:$0xff] }
 0x1f9   :  { %v6544_v31 = vpop.permute.xlu1 %6543  ;;  %v7038_v18 = vsel %vm6867_vm9, %v7037_v24, %v7033_v60  ;;  %v6349_v21 = vcombine.low %v4148_v8, %v4155_v2  ;;  %v7047_v28 = vrot.slane %v10430_v35, %v10341_v45  ;;  %v6160_v30 = vcombine.low %v6152_v14, %v6159_v53  ;;  %v11488_v24 = vld [vmem:[#allocation27_spill] sm:$0xff] }
 0x1fa   :  { %v10567_v7 = vpop.permute.xlu0 %6576  ;;  %v10575_v61 = vcombine.low %v11486_v26, %v11485_v36  ;;  %v7042_v40 = vrot.slane %v6544_v31, %v10326_v9  ;;  %v6186_v52 = vrot.slane %v11487_v6, %v8080_v58  ;;  %v6330_v12 = vcombine.low %v6322_v1, %v6329_v44 }
 0x1fb   :  { %6729 = vperm.xlu1 %7517, %v6024_v33   ;;  %v6193_v33 = vrot.slane %v11488_v24, %v8080_v58  ;;  %v6339_v51 = vrot.slane %v10523_v5, %v8080_v58  ;;  %v6346_v49 = vrot.slane %v6332_v62, %v8080_v58  ;;  %v6365_v8 = vcombine.low %v4162_v11, %v4169_v38  ;;  %v11490_v38 = vld [vmem:[#allocation21_spill] sm:$0xff] }
 0x1fc   :  { %6780 = vperm.xlu0 %7516, %v6313_v20   ;;  %v7043_v37 = vsel %vm6874_vm10, %v7042_v40, %v7038_v18  ;;  %v6366_v2 = vcombine.low %v4176_v10, %v4183_v0  ;;  %v4190_v35 = vrot.slane %v11489_v54, %v8009_v3  ;;  %v4197_v20 = vrot.slane %v11489_v54, %v8012_v4  ;;  %v11491_v0 = vld [vmem:[#allocation60_spill] sm:$0xff] }
 0x1fd   :  { %v6550_v14 = vpop.permute.xlu1 %6549  ;;  %v7048_v53 = vsel %vm6881_vm11, %v7047_v28, %v7043_v37  ;;  %v4204_v1 = vrot.slane %v11489_v54, %v8027_v13  ;;  %v4211_v5 = vrot.slane %v11489_v54, %v8030_v16  ;;  %v7057_v11 = vrot.slane %v10467_v46, %v10366_v42  ;;  %v11492_v28 = vld [vmem:[#allocation58_spill] sm:$0xff] }
 0x1fe   :  { %v10591_v60 = vpop.permute.xlu0 %6582  ;;  %v7052_v62 = vrot.slane %v6550_v14, %v10349_v23  ;;  %v6194_v44 = vcombine.low %v6186_v52, %v6193_v33  ;;  %v6220_v10 = vrot.slane %v11490_v38, %v8080_v58  ;;  %v6227_v31 = vrot.slane %v11491_v0, %v8080_v58 }
 0x1ff   :  { %6753 = vperm.xlu1 %7517, %v6160_v30   ;;  %v6347_v36 = vcombine.low %v6339_v51, %v6346_v49  ;;  %v6356_v26 = vrot.slane %v6348_v39, %v8080_v58  ;;  %v6363_v40 = vrot.slane %v6349_v21, %v8080_v58  ;;  %v4218_v30 = vrot.slane %v11492_v28, %v8009_v3 }
 0x200   :  { %6783 = vperm.xlu0 %7516, %v6330_v12   ;;  %v7053_v18 = vsel %vm6888_vm12, %v7052_v62, %v7048_v53  ;;  %v4225_v46 = vrot.slane %v11492_v28, %v8012_v4  ;;  %v4232_v6 = vrot.slane %v11492_v28, %v8027_v13  ;;  %v4239_v39 = vrot.slane %v11492_v28, %v8030_v16 }
 0x201   :  { %v6556_v52 = vpop.permute.xlu1 %6555  ;;  %v7058_v24 = vsel %vm6895_vm13, %v7057_v11, %v7053_v18  ;;  %v6382_v37 = vcombine.low %v4190_v35, %v4197_v20  ;;  %v6383_v21 = vcombine.low %v4204_v1, %v4211_v5  ;;  %v7067_v51 = vrot.slane %v10494_v59, %v10396_v55  ;;  %v11493_v20 = vld [vmem:[#allocation66_spill] sm:$0xff] }
 0x202   :  { %v10616_v33 = vpop.permute.xlu0 %6588  ;;  %v7062_v12 = vrot.slane %v6556_v52, %v10374_v22  ;;  %v6228_v49 = vcombine.low %v6220_v10, %v6227_v31  ;;  %v6254_v54 = vrot.slane %v10445_v29, %v8080_v58  ;;  %v6261_v14 = vrot.slane %v10459_v34, %v8080_v58  ;;  %v11494_v5 = vld [vmem:[#allocation46_spill] sm:$0xff] }
 0x203   :  { %6759 = vperm.xlu1 %7517, %v6194_v44   ;;  %v6364_v62 = vcombine.low %v6356_v26, %v6363_v40  ;;  %v6373_v11 = vrot.slane %v6365_v8, %v8080_v58  ;;  %v6380_v35 = vrot.slane %v6366_v2, %v8080_v58  ;;  %v3672_v1 = vrot.slane %v11493_v20, %v8027_v13 }
 0x204   :  { %6786 = vperm.xlu0 %7516, %v6347_v36   ;;  %v7063_v53 = vsel %vm6902_vm14, %v7062_v12, %v7058_v24  ;;  %v3679_v59 = vrot.slane %v11493_v20, %v8030_v16  ;;  %v11495_v44 = vrot.slane %v11494_v5, %v8012_v4  ;;  %v11496_v29 = vrot.slane %v11494_v5, %v8009_v3 }
 0x205   :  { %v10641_v38 = vsel %vm6909_vm15, %v7067_v51, %v7063_v53  ;;  %v6562_v10 = vpop.permute.xlu1 %6561  ;;  %v11497_v2 = vrot.slane %v11494_v5, %v8030_v16  ;;  %v11498_v0 = vrot.slane %v11494_v5, %v8027_v13  ;;  %v6399_v18 = vcombine.low %v4218_v30, %v4225_v46 }
 0x206   :  { %v6042_v34 = vcombine.low %v11496_v29, %v11495_v44  ;;  %v10643_v8 = vpop.permute.xlu0 %6594  ;;  %v7076_v36 = vrot.slane %v10521_v25, %v10124_v47  ;;  %v7072_v26 = vrot.slane %v6562_v10, %v10203_v17  ;;  %v6400_v40 = vcombine.low %v4232_v6, %v4239_v39 }
 0x207   :  { %6765 = vperm.xlu1 %7517, %v6228_v49   ;;  %v6043_v31 = vcombine.low %v11498_v0, %v11497_v2  ;;  %v6262_v28 = vcombine.low %v6254_v54, %v6261_v14  ;;  %v6288_v52 = vrot.slane %v10518_v32, %v8080_v58  ;;  %v6295_v24 = vrot.slane %v10575_v61, %v8080_v58  ;;  %v11501_v32 = vld [vmem:[#allocation32_spill] sm:$0xff]  ;;  %v11502_v61 = vld [vmem:[#allocation33_spill] sm:$0xff] }
 0x208   :  { %6789 = vperm.xlu0 %7516, %v6364_v62   ;;  %v7077_v12 = vsel %vm6811_vm1, %v7076_v36, %v7072_v26  ;;  %v6381_v51 = vcombine.low %v6373_v11, %v6380_v35  ;;  %v6390_v49 = vrot.slane %v6382_v37, %v8080_v58  ;;  %v6397_v30 = vrot.slane %v6383_v21, %v8080_v58 }
 0x209   :  { %v11499_v25 = vrot.slane %v11493_v20, %v8012_v4  ;;  %v11500_v46 = vrot.slane %v11493_v20, %v8009_v3  ;;  %v6060_v39 = vcombine.low %v3672_v1, %v3679_v59  ;;  %v3714_v54 = vrot.slane %v11501_v32, %v8009_v3  ;;  %v6568_v53 = vpop.permute.xlu1 %6567 }
 0x20a   :  { %v3686_v14 = vrot.slane %v11502_v61, %v8009_v3  ;;  %v10671_v62 = vpop.permute.xlu0 %6600  ;;  %v3693_v37 = vrot.slane %v11502_v61, %v8012_v4  ;;  %v3700_v21 = vrot.slane %v11502_v61, %v8027_v13  ;;  %v3707_v11 = vrot.slane %v11502_v61, %v8030_v16 }
 0x20b   :  { %v6059_v6 = vcombine.low %v11500_v46, %v11499_v25  ;;  %6771 = vperm.xlu1 %7517, %v6262_v28   ;;  %v7081_v35 = vrot.slane %v6568_v53, %v10127_v63  ;;  %v7086_v20 = vrot.slane %v10542_v43, %v10252_v19  ;;  %v6296_v1 = vcombine.low %v6288_v52, %v6295_v24 }
 0x20c   :  { %6792 = vperm.xlu0 %7516, %v6381_v51   ;;  %v6050_v59 = vrot.slane %v6042_v34, %v8080_v58  ;;  %v6057_v5 = vrot.slane %v6043_v31, %v8080_v58  ;;  %v6398_v29 = vcombine.low %v6390_v49, %v6397_v30  ;;  %v6407_v10 = vrot.slane %v6399_v18, %v8080_v58 }
 0x20d   :  { %v7082_v44 = vsel %vm6818_vm2, %v7081_v35, %v7077_v12  ;;  %v6414_v2 = vrot.slane %v6400_v40, %v8080_v58  ;;  %v3721_v0 = vrot.slane %v11501_v32, %v8012_v4  ;;  %v3728_v36 = vrot.slane %v11501_v32, %v8027_v13  ;;  %v6574_v26 = vpop.permute.xlu1 %6573 }
 0x20e   :  { %v3735_v43 = vrot.slane %v11501_v32, %v8030_v16  ;;  %v7087_v34 = vsel %vm6825_vm3, %v7086_v20, %v7082_v44  ;;  %v10694_v31 = vpop.permute.xlu0 %6606  ;;  %v6076_v28 = vcombine.low %v3686_v14, %v3693_v37  ;;  %v6077_v52 = vcombine.low %v3700_v21, %v3707_v11  ;;  %v11503_v32 = vld [vmem:[#allocation23_spill] sm:$0xff] }
 0x20f   :  { %6777 = vperm.xlu1 %7517, %v6296_v1   ;;  %v7091_v18 = vrot.slane %v6574_v26, %v10255_v56  ;;  %v7096_v40 = vrot.slane %v10567_v7, %v10272_v48  ;;  %v6058_v24 = vcombine.low %v6050_v59, %v6057_v5  ;;  %v6067_v12 = vrot.slane %v6059_v6, %v8080_v58  ;;  %v11504_v59 = vld [vmem:[#allocation25_spill] sm:$0xff] }
 0x210   :  { %6795 = vperm.xlu0 %7516, %v6398_v29   ;;  %v6074_v51 = vrot.slane %v6060_v39, %v8080_v58  ;;  %v6415_v30 = vcombine.low %v6407_v10, %v6414_v2  ;;  %v6093_v25 = vcombine.low %v3714_v54, %v3721_v0  ;;  %v6094_v46 = vcombine.low %v3728_v36, %v3735_v43 }
 0x211   :  { %v7092_v49 = vsel %vm6832_vm4, %v7091_v18, %v7087_v34  ;;  %v3742_v61 = vrot.slane %v11503_v32, %v8009_v3  ;;  %v6580_v14 = vpop.permute.xlu1 %6579  ;;  %v3749_v7 = vrot.slane %v11503_v32, %v8012_v4  ;;  %v3756_v6 = vrot.slane %v11503_v32, %v8027_v13 }
 0x212   :  { %v7097_v53 = vsel %vm6839_vm5, %v7096_v40, %v7092_v49  ;;  %v10705_v37 = vpop.permute.xlu0 %6612  ;;  %v3763_v39 = vrot.slane %v11503_v32, %v8030_v16  ;;  %v7101_v54 = vrot.slane %v6580_v14, %v10279_v41  ;;  %v7106_v21 = vrot.slane %v10591_v60, %v10300_v50 }
 0x213   :  { %6735 = vperm.xlu1 %7517, %v6058_v24   ;;  %v6075_v11 = vcombine.low %v6067_v12, %v6074_v51  ;;  %v6084_v35 = vrot.slane %v6076_v28, %v8080_v58  ;;  %v6091_v20 = vrot.slane %v6077_v52, %v8080_v58  ;;  %v3770_v5 = vrot.slane %v11504_v59, %v8009_v3 }
 0x214   :  { %6798 = vperm.xlu0 %7516, %v6415_v30   ;;  %v7102_v1 = vsel %vm6846_vm6, %v7101_v54, %v7097_v53  ;;  %v3777_v44 = vrot.slane %v11504_v59, %v8012_v4  ;;  %v3784_v29 = vrot.slane %v11504_v59, %v8027_v13  ;;  %v3791_v0 = vrot.slane %v11504_v59, %v8030_v16 }
 0x215   :  { %v6586_v10 = vpop.permute.xlu1 %6585  ;;  %v7107_v2 = vsel %vm6853_vm7, %v7106_v21, %v7102_v1  ;;  %v6110_v36 = vcombine.low %v3742_v61, %v3749_v7  ;;  %v6111_v43 = vcombine.low %v3756_v6, %v3763_v39  ;;  %v7116_v3 = vrot.slane %v10616_v33, %v10318_v27 }
 0x216   :  { %v6619_v60 = vpop.permute.xlu0 %6618  ;;  %v7111_v26 = vrot.slane %v6586_v10, %v10303_v57  ;;  %v6092_v34 = vcombine.low %v6084_v35, %v6091_v20  ;;  %v6101_v4 = vrot.slane %v6093_v25, %v8080_v58  ;;  %v6108_v13 = vrot.slane %v6094_v46, %v8080_v58 }
 0x217   :  { %6738 = vperm.xlu1 %7517, %v6075_v11   ;;  %v6127_v16 = vcombine.low %v3770_v5, %v3777_v44  ;;  %v6128_v24 = vcombine.low %v3784_v29, %v3791_v0  ;;  %v7126_v51 = vrot.slane %v10643_v8, %v10341_v45  ;;  %v6118_v49 = vrot.slane %v6110_v36, %v8080_v58 }
 0x218   :  { %v7112_v28 = vsel %vm6860_vm8, %v7111_v26, %v7107_v2  ;;  %v6109_v33 = vcombine.low %v6101_v4, %v6108_v13  ;;  %v6125_v30 = vrot.slane %v6111_v43, %v8080_v58  ;;  %v7136_v53 = vrot.slane %v10671_v62, %v10366_v42 }
 0x219   :  { %v6592_v52 = vpop.permute.xlu1 %6591  ;;  %v7117_v18 = vsel %vm6867_vm9, %v7116_v3, %v7112_v28  ;;  %v6135_v8 = vrot.slane %v6127_v16, %v8080_v58  ;;  %v6142_v6 = vrot.slane %v6128_v24, %v8080_v58  ;;  %v7146_v20 = vrot.slane %v10694_v31, %v10396_v55 }
 0x21a   :  { %v6625_v40 = vpop.permute.xlu0 %6624  ;;  %v7121_v12 = vrot.slane %v6592_v52, %v10326_v9  ;;  %v6126_v7 = vcombine.low %v6118_v49, %v6125_v30  ;;  %v7155_v29 = vrot.slane %v10705_v37, %v10124_v47  ;;  %v7165_v43 = vrot.slane %v6619_v60, %v10252_v19 }
 0x21b   :  { %6741 = vperm.xlu1 %7517, %v6092_v34   ;;  %v6143_v1 = vcombine.low %v6135_v8, %v6142_v6  ;;  %v7175_v37 = vrot.slane %v6625_v40, %v10272_v48 }
 0x21c   :  { %v7122_v25 = vsel %vm6874_vm10, %v7121_v12, %v7117_v18 }
 0x21d   :  { %v6598_v46 = vpop.permute.xlu1 %6597  ;;  %v7127_v32 = vsel %vm6881_vm11, %v7126_v51, %v7122_v25 }
 0x21e   :  { %v6631_v61 = vpop.permute.xlu0 %6630  ;;  %v7131_v14 = vrot.slane %v6598_v46, %v10349_v23 }
 0x21f   :  { %6744 = vperm.xlu1 %7517, %v6109_v33   ;;  %v7185_v60 = vrot.slane %v6631_v61, %v10300_v50 }
 0x220   :  { %v7132_v39 = vsel %vm6888_vm12, %v7131_v14, %v7127_v32 }
 0x221   :  { %v7137_v21 = vsel %vm6895_vm13, %v7136_v53, %v7132_v39 }
 0x222   :  { %v6604_v54 = vpop.permute.xlu1 %6603 }
 0x223   :  { %6747 = vperm.xlu1 %7517, %v6126_v7   ;;  %v6637_v11 = vpop.permute.xlu0 %6636  ;;  %v7141_v35 = vrot.slane %v6604_v54, %v10374_v22 }
 0x224   :  { %v7195_v40 = vrot.slane %v6637_v11, %v10318_v27 }
 0x225   :  { %v7142_v62 = vsel %vm6902_vm14, %v7141_v35, %v7137_v21 }
 0x226   :  { %v10754_v59 = vsel %vm6909_vm15, %v7146_v20, %v7142_v62  ;;  %v6610_v5 = vpop.permute.xlu1 %6609 }
 0x227   :  { %6750 = vperm.xlu1 %7517, %v6143_v1   ;;  %v6643_v44 = vpop.permute.xlu0 %6642  ;;  %v7151_v10 = vrot.slane %v6610_v5, %v10203_v17 }
 0x228   :  { %v7205_v61 = vrot.slane %v6643_v44, %v10341_v45 }
 0x229   :  { %v7156_v2 = vsel %vm6811_vm1, %v7155_v29, %v7151_v10 }
 0x22a   :  { %v6616_v0 = vpop.permute.xlu1 %6615 }
 0x22b   :  { %v6649_v36 = vpop.permute.xlu0 %6648  ;;  %v7160_v31 = vrot.slane %v6616_v0, %v10127_v63 }
 0x22c   :  { %v7215_v21 = vrot.slane %v6649_v36, %v10366_v42 }
 0x22d   :  { %v7161_v26 = vsel %vm6818_vm2, %v7160_v31, %v7156_v2 }
 0x22e   :  { %v6622_v3 = vpop.permute.xlu1 %6621  ;;  %v7166_v34 = vsel %vm6825_vm3, %v7165_v43, %v7161_v26  ;;  %v11505_v43 = vld [vmem:[#allocation7_spill] sm:$0xff] }
 0x22f   :  { %v6655_v4 = vpop.permute.xlu0 %6654  ;;  %v7170_v13 = vrot.slane %v6622_v3, %v10255_v56  ;;  %v6805_v26 = vrot.slane %v11505_v43, %v10203_v17 }
 0x230   :  { %v7225_v5 = vrot.slane %v6655_v4, %v10396_v55 }
 0x231   :  { %v7171_v28 = vsel %vm6832_vm4, %v7170_v13, %v7166_v34  ;;  %v11506_v13 = vld [vmem:[#allocation15_spill] sm:$0xff] }
 0x232   :  { %v6628_v52 = vpop.permute.xlu1 %6627  ;;  %v7176_v18 = vsel %vm6839_vm5, %v7175_v37, %v7171_v28  ;;  %v6810_v37 = vrot.slane %v11506_v13, %v10124_v47 }
 0x233   :  { %v6661_v16 = vpop.permute.xlu0 %6660  ;;  %v7180_v24 = vrot.slane %v6628_v52, %v10279_v41  ;;  %v11507_v52 = vld [vmem:[#allocation55_spill] sm:$0xff] }
 0x234   :  { %v7234_v0 = vrot.slane %v6661_v16, %v10124_v47 }
 0x235   :  { %v7181_v12 = vsel %vm6846_vm6, %v7180_v24, %v7176_v18  ;;  %v6817_v18 = vrot.slane %v11507_v52, %v10127_v63  ;;  %v6812_v24 = vsel %vm6811_vm1, %v6810_v37, %v6805_v26 }
 0x236   :  { %v6634_v51 = vpop.permute.xlu1 %6633  ;;  %v7186_v33 = vsel %vm6853_vm7, %v7185_v60, %v7181_v12  ;;  %v11508_v60 = vld [vmem:[#allocation47_spill] sm:$0xff] }
 0x237   :  { %v6667_v49 = vpop.permute.xlu0 %6666  ;;  %v7190_v30 = vrot.slane %v6634_v51, %v10303_v57  ;;  %v6824_v12 = vrot.slane %v11508_v60, %v10252_v19 }
 0x238   :  { %v7244_v28 = vrot.slane %v6667_v49, %v10252_v19 }
 0x239   :  { %v7191_v25 = vsel %vm6860_vm8, %v7190_v30, %v7186_v33 }
 0x23a   :  { %v6640_v46 = vpop.permute.xlu1 %6639  ;;  %v7196_v32 = vsel %vm6867_vm9, %v7195_v40, %v7191_v25  ;;  %v11509_v40 = vld [vmem:[#allocation12_spill] sm:$0xff] }
 0x23b   :  { %v6673_v14 = vpop.permute.xlu0 %6672  ;;  %v7200_v53 = vrot.slane %v6640_v46, %v10326_v9  ;;  %v6831_v25 = vrot.slane %v11509_v40, %v10255_v56  ;;  %v11510_v46 = vld [vmem:[#allocation17_spill] sm:$0xff] }
 0x23d   :  { %v7201_v7 = vsel %vm6874_vm10, %v7200_v53, %v7196_v32  ;;  %v6838_v32 = vrot.slane %v11510_v46, %v10272_v48  ;;  %v7254_v53 = vrot.slane %v6673_v14, %v10272_v48  ;;  %v11513_v14 = vld [vmem:[#allocation37_spill] sm:$0xff] }
 0x23e   :  { %v6646_v8 = vpop.permute.xlu1 %6645  ;;  %v7206_v6 = vsel %vm6881_vm11, %v7205_v61, %v7201_v7  ;;  %v6819_v61 = vsel %vm6818_vm2, %v6817_v18, %v6812_v24  ;;  %v11511_v7 = vld [vmem:[#allocation26_spill] sm:$0xff] }
 0x23f   :  { %v6679_v39 = vpop.permute.xlu0 %6678  ;;  %v7210_v54 = vrot.slane %v6646_v8, %v10349_v23  ;;  %v6845_v8 = vrot.slane %v11511_v7, %v10279_v41 }
 0x241   :  { %v7211_v11 = vsel %vm6888_vm12, %v7210_v54, %v7206_v6  ;;  %v6826_v54 = vsel %vm6825_vm3, %v6824_v12, %v6819_v61 }
 0x242   :  { %v6652_v35 = vpop.permute.xlu1 %6651  ;;  %v7216_v20 = vsel %vm6895_vm13, %v7215_v21, %v7211_v11  ;;  %v11512_v21 = vld [vmem:[#allocation73_spill] sm:$0xff] }
 0x243   :  { %v6685_v1 = vpop.permute.xlu0 %6684  ;;  %v7220_v62 = vrot.slane %v6652_v35, %v10374_v22  ;;  %v6852_v11 = vrot.slane %v11512_v21, %v10300_v50 }
 0x244   :  { %v7274_v24 = vrot.slane %v6685_v1, %v10318_v27 }
 0x245   :  { %v7221_v44 = vsel %vm6902_vm14, %v7220_v62, %v7216_v20 }
 0x246   :  { %v10788_v29 = vsel %vm6909_vm15, %v7225_v5, %v7221_v44  ;;  %v6658_v10 = vpop.permute.xlu1 %6657  ;;  %v6833_v5 = vsel %vm6832_vm4, %v6831_v25, %v6826_v54  ;;  %v6859_v44 = vrot.slane %v11513_v14, %v10303_v57  ;;  %v11519_v14 = vld [vmem:[#allocation24_spill] sm:$0xff] }
 0x247   :  { %v6691_v2 = vpop.permute.xlu0 %6690  ;;  %v7230_v36 = vrot.slane %v6658_v10, %v10203_v17 }
 0x248   :  { %v7284_v1 = vrot.slane %v6691_v2, %v10341_v45 }
 0x249   :  { %v7235_v31 = vsel %vm6811_vm1, %v7234_v0, %v7230_v36  ;;  %v6840_v0 = vsel %vm6839_vm5, %v6838_v32, %v6833_v5  ;;  %v7264_v36 = vrot.slane %v6679_v39, %v10300_v50  ;;  %v11515_v39 = vld [vmem:[#allocation77_spill] sm:$0xff] }
 0x24a   :  { %v6664_v3 = vpop.permute.xlu1 %6663 }
 0x24b   :  { %v10795_v34 = vpop.permute.xlu0 %6696  ;;  %v7239_v4 = vrot.slane %v6664_v3, %v10127_v63 }
 0x24c   :  { %v7294_v2 = vrot.slane %v10795_v34, %v10366_v42 }
 0x24d   :  { %v7240_v16 = vsel %vm6818_vm2, %v7239_v4, %v7235_v31  ;;  %v6847_v31 = vsel %vm6846_vm6, %v6845_v8, %v6840_v0 }
 0x24e   :  { %v6670_v51 = vpop.permute.xlu1 %6669  ;;  %v7245_v33 = vsel %vm6825_vm3, %v7244_v28, %v7240_v16  ;;  %v6854_v26 = vsel %vm6853_vm7, %v6852_v11, %v6847_v31  ;;  %v11514_v28 = vld [vmem:[#allocation67_spill] sm:$0xff]  ;;  %v6866_v16 = vrot.slane %v11515_v39, %v10318_v27 }
 0x24f   :  { %v10808_v30 = vpop.permute.xlu0 %6702  ;;  %v7249_v49 = vrot.slane %v6670_v51, %v10255_v56  ;;  %v6861_v37 = vsel %vm6860_vm8, %v6859_v44, %v6854_v26  ;;  %v6873_v52 = vrot.slane %v11514_v28, %v10326_v9  ;;  %v6894_v44 = vrot.slane %v11519_v14, %v10366_v42 }
 0x250   :  { %v6868_v12 = vsel %vm6867_vm9, %v6866_v16, %v6861_v37  ;;  %v7304_v28 = vrot.slane %v10808_v30, %v10396_v55 }
 0x251   :  { %v7250_v6 = vsel %vm6832_vm4, %v7249_v49, %v7245_v33  ;;  %v6875_v25 = vsel %vm6874_vm10, %v6873_v52, %v6868_v12  ;;  %v11516_v49 = vld [vmem:[#allocation29_spill] sm:$0xff] }
 0x252   :  { %v6676_v35 = vpop.permute.xlu1 %6675  ;;  %v7255_v20 = vsel %vm6839_vm5, %v7254_v53, %v7250_v6  ;;  %v6887_v46 = vrot.slane %v11516_v49, %v10349_v23  ;;  %v11517_v53 = vld [vmem:[#allocation18_spill] sm:$0xff] }
 0x253   :  { %v10824_v62 = vpop.permute.xlu0 %6708  ;;  %v7259_v10 = vrot.slane %v6676_v35, %v10279_v41  ;;  %v6880_v61 = vrot.slane %v11517_v53, %v10341_v45  ;;  %v11518_v35 = vld [vmem:[#allocation39_spill] sm:$0xff] }
 0x255   :  { %v7260_v43 = vsel %vm6846_vm6, %v7259_v10, %v7255_v20  ;;  %v6882_v8 = vsel %vm6881_vm11, %v6880_v61, %v6875_v25  ;;  %v6901_v20 = vrot.slane %v11518_v35, %v10374_v22 }
 0x256   :  { %v6682_v3 = vpop.permute.xlu1 %6681  ;;  %v7265_v4 = vsel %vm6853_vm7, %v7264_v36, %v7260_v43  ;;  %v6889_v11 = vsel %vm6888_vm12, %v6887_v46, %v6882_v8 }
 0x257   :  { %v10836_v13 = vpop.permute.xlu0 %6714  ;;  %v7269_v18 = vrot.slane %v6682_v3, %v10303_v57  ;;  %v6896_v0 = vsel %vm6895_vm13, %v6894_v44, %v6889_v11 }
 0x258   :  { %v6903_v26 = vsel %vm6902_vm14, %v6901_v20, %v6896_v0 }
 0x259   :  { %v7270_v60 = vsel %vm6860_vm8, %v7269_v18, %v7265_v4  ;;  %v11520_v4 = vld [vmem:[#allocation56_spill] sm:$0xff] }
 0x25a   :  { %v6688_v51 = vpop.permute.xlu1 %6687  ;;  %v7275_v33 = vsel %vm6867_vm9, %v7274_v24, %v7270_v60  ;;  %v6908_v37 = vrot.slane %v11520_v4, %v10396_v55 }
 0x25b   :  { %v10848_v40 = vpop.permute.xlu0 %6720  ;;  %v7279_v32 = vrot.slane %v6688_v51, %v10326_v9 }
 0x25c   :  { %v6910_v52 = vsel %vm6909_vm15, %v6908_v37, %v6903_v26 }
 0x25d   :  { %v7280_v7 = vsel %vm6874_vm10, %v7279_v32, %v7275_v33  ;;  %v10886_v24 = vsel %vm7464_vm0, %v10788_v29, %v6910_v52  ;;  %v7313_v52 = vrot.slane %v10824_v62, %v10124_v47 }
 0x25e   :  { %v6694_v6 = vpop.permute.xlu1 %6693  ;;  %v7285_v54 = vsel %vm6881_vm11, %v7284_v1, %v7280_v7 }
 0x25f   :  { %v10860_v21 = vpop.permute.xlu0 %6726  ;;  %v7289_v5 = vrot.slane %v6694_v6, %v10349_v23 }
 0x261   :  { %v7290_v10 = vsel %vm6888_vm12, %v7289_v5, %v7285_v54 }
 0x262   :  { %v6700_v36 = vpop.permute.xlu1 %6699  ;;  %v7295_v31 = vsel %vm6895_vm13, %v7294_v2, %v7290_v10 }
 0x263   :  { %v10873_v43 = vpop.permute.xlu0 %6732  ;;  %v7299_v3 = vrot.slane %v6700_v36, %v10374_v22 }
 0x265   :  { %v7300_v34 = vsel %vm6902_vm14, %v7299_v3, %v7295_v31 }
 0x266   :  { %v7305_v18 = vsel %vm6909_vm15, %v7304_v28, %v7300_v34  ;;  %v6706_v39 = vpop.permute.xlu1 %6705 }
 0x267   :  { %v6757_v16 = vpop.permute.xlu0 %6756  ;;  %v10890_v60 = vsel %vm7464_vm0, %v7305_v18, %v10428_v15  ;;  %v7309_v3 = vrot.slane %v6706_v39, %v10203_v17 }
 0x268   :  { %v7469_v30 = vcombine.low %v10886_v24, %v10890_v60  ;;  %v7392_v7 = vrot.slane %v6757_v16, %v10124_v47 }
 0x26a   :  { %v6712_v12 = vpop.permute.xlu1 %6711 }
 0x26b   :  { %v6763_v51 = vpop.permute.xlu0 %6762  ;;  %v7318_v28 = vrot.slane %v6712_v12, %v10127_v63 }
 0x26c   :  { %v7402_v35 = vrot.slane %v6763_v51, %v10252_v19 }
 0x26e   :  { %v6718_v33 = vpop.permute.xlu1 %6717 }
 0x26f   :  { %v6769_v25 = vpop.permute.xlu0 %6768  ;;  %v7328_v39 = vrot.slane %v6718_v33, %v10255_v56 }
 0x270   :  { %v7412_v10 = vrot.slane %v6769_v25, %v10272_v48  ;;  %v7314_v25 = vsel %vm6811_vm1, %v7313_v52, %v7309_v3  ;;  %v7477_v52 = vrot.slane %v7469_v30, %v8080_v58 }
 0x272   :  { %v6724_v49 = vpop.permute.xlu1 %6723 }
 0x273   :  { %v6775_v46 = vpop.permute.xlu0 %6774 }
 0x274   :  { %v7422_v4 = vrot.slane %v6775_v46, %v10300_v50 }
 0x276   :  { %v6730_v32 = vpop.permute.xlu1 %6729 }
 0x277   :  { %v6781_v53 = vpop.permute.xlu0 %6780 }
 0x27a   :  { %v6754_v61 = vpop.permute.xlu1 %6753 }
 0x27b   :  { %v7388_v1 = vrot.slane %v6754_v61, %v10203_v17  ;;  %v6784_v8 = vpop.permute.xlu0 %6783  ;;  %v7432_v61 = vrot.slane %v6781_v53, %v10318_v27  ;;  %v7319_v17 = vsel %vm6818_vm2, %v7318_v28, %v7314_v25 }
 0x27c   :  { %v7437_v47 = vrot.slane %v6784_v8, %v10326_v9 }
 0x27d   :  { %v7393_v6 = vsel %vm6811_vm1, %v7392_v7, %v7388_v1  ;;  %v7338_v7 = vrot.slane %v6724_v49, %v10279_v41 }
 0x27e   :  { %v6760_v29 = vpop.permute.xlu1 %6759 }
 0x27f   :  { %v7397_v15 = vrot.slane %v6760_v29, %v10127_v63  ;;  %v6787_v14 = vpop.permute.xlu0 %6786  ;;  %v7323_v63 = vrot.slane %v10836_v13, %v10252_v19 }
 0x280   :  { %v7442_v33 = vrot.slane %v6787_v14, %v10341_v45 }
 0x281   :  { %v7398_v54 = vsel %vm6818_vm2, %v7397_v15, %v7393_v6  ;;  %v7324_v1 = vsel %vm6825_vm3, %v7323_v63, %v7319_v17  ;;  %v7348_v6 = vrot.slane %v6730_v32, %v10303_v57 }
 0x282   :  { %v6766_v11 = vpop.permute.xlu1 %6765  ;;  %v7403_v5 = vsel %vm6825_vm3, %v7402_v35, %v7398_v54  ;;  %v7329_v29 = vsel %vm6832_vm4, %v7328_v39, %v7324_v1 }
 0x283   :  { %v7407_v20 = vrot.slane %v6766_v11, %v10255_v56  ;;  %v6790_v34 = vpop.permute.xlu0 %6789  ;;  %v7333_v56 = vrot.slane %v10848_v40, %v10272_v48 }
 0x284   :  { %v7447_v54 = vrot.slane %v6790_v34, %v10349_v23 }
 0x285   :  { %v7408_v44 = vsel %vm6832_vm4, %v7407_v20, %v7403_v5  ;;  %v7334_v13 = vsel %vm6839_vm5, %v7333_v56, %v7329_v29 }
 0x286   :  { %v6772_v2 = vpop.permute.xlu1 %6771  ;;  %v7413_v36 = vsel %vm6839_vm5, %v7412_v10, %v7408_v44  ;;  %v7339_v8 = vsel %vm6846_vm6, %v7338_v7, %v7334_v13 }
 0x287   :  { %v7417_v0 = vrot.slane %v6772_v2, %v10279_v41  ;;  %v6793_v62 = vpop.permute.xlu0 %6792  ;;  %v7343_v41 = vrot.slane %v10860_v21, %v10300_v50 }
 0x288   :  { %v7452_v35 = vrot.slane %v6793_v62, %v10366_v42 }
 0x289   :  { %v7418_v31 = vsel %vm6846_vm6, %v7417_v0, %v7413_v36  ;;  %v7344_v40 = vsel %vm6853_vm7, %v7343_v41, %v7339_v8 }
 0x28a   :  { %v6778_v26 = vpop.permute.xlu1 %6777  ;;  %v7423_v18 = vsel %vm6853_vm7, %v7422_v4, %v7418_v31  ;;  %v7349_v20 = vsel %vm6860_vm8, %v7348_v6, %v7344_v40 }
 0x28b   :  { %v7427_v37 = vrot.slane %v6778_v26, %v10303_v57  ;;  %v6796_v11 = vpop.permute.xlu0 %6795  ;;  %v7353_v57 = vrot.slane %v10873_v43, %v10318_v27 }
 0x28c   :  { %v7457_v50 = vrot.slane %v6796_v11, %v10374_v22 }
 0x28d   :  { %v7428_v16 = vsel %vm6860_vm8, %v7427_v37, %v7423_v18  ;;  %v7354_v10 = vsel %vm6867_vm9, %v7353_v57, %v7349_v20 }
 0x28e   :  { %v6736_v51 = vpop.permute.xlu1 %6735  ;;  %v7433_v12 = vsel %vm6867_vm9, %v7432_v61, %v7428_v16 }
 0x28f   :  { %v7438_v53 = vsel %vm6874_vm10, %v7437_v47, %v7433_v12  ;;  %v7358_v5 = vrot.slane %v6736_v51, %v10326_v9  ;;  %v6799_v21 = vpop.permute.xlu0 %6798 }
 0x290   :  { %v7443_v15 = vsel %vm6881_vm11, %v7442_v33, %v7438_v53  ;;  %v7462_v43 = vrot.slane %v6799_v21, %v10396_v55 }
 0x291   :  { %v7448_v49 = vsel %vm6888_vm12, %v7447_v54, %v7443_v15  ;;  %v7359_v9 = vsel %vm6874_vm10, %v7358_v5, %v7354_v10 }
 0x292   :  { %v6739_v46 = vpop.permute.xlu1 %6738  ;;  %v7453_v32 = vsel %vm6895_vm13, %v7452_v35, %v7448_v49 }
 0x293   :  { %v7363_v14 = vrot.slane %v6739_v46, %v10341_v45  ;;  %v7458_v36 = vsel %vm6902_vm14, %v7457_v50, %v7453_v32 }
 0x295   :  { %v7364_v45 = vsel %vm6881_vm11, %v7363_v14, %v7359_v9 }
 0x296   :  { %v6742_v19 = vpop.permute.xlu1 %6741 }
 0x297   :  { %v7368_v44 = vrot.slane %v6742_v19, %v10349_v23  ;;  %v7463_v23 = vsel %vm6909_vm15, %v7462_v43, %v7458_v36 }
 0x299   :  { %v7369_v31 = vsel %vm6888_vm12, %v7368_v44, %v7364_v45 }
 0x29a   :  { %v6745_v48 = vpop.permute.xlu1 %6744 }
 0x29b   :  { %v7373_v0 = vrot.slane %v6745_v48, %v10366_v42 }
 0x29d   :  { %v7374_v3 = vsel %vm6895_vm13, %v7373_v0, %v7369_v31 }
 0x29e   :  { %v6748_v2 = vpop.permute.xlu1 %6747 }
 0x29f   :  { %v7378_v27 = vrot.slane %v6748_v2, %v10374_v22  ;;  %v7468_v22 = vsel %vm7464_vm0, %v7463_v23, %v10754_v59 }
 0x2a1   :  { %v7379_v42 = vsel %vm6902_vm14, %v7378_v27, %v7374_v3 }
 0x2a2   :  { %v6751_v26 = vpop.permute.xlu1 %6750 }
 0x2a3   :  { %v7383_v4 = vrot.slane %v6751_v26, %v10396_v55 }
 0x2a5   :  { %v7384_v37 = vsel %vm6909_vm15, %v7383_v4, %v7379_v42 }
 0x2a6   :  { %v7467_v28 = vsel %vm7464_vm0, %v7384_v37, %v10641_v38 }
 0x2a7   :  { %v7470_v34 = vcombine.low %v7467_v28, %v7468_v22 }
 0x2a9   :  { %v7484_v18 = vrot.slane %v7470_v34, %v8080_v58 }
 0x2ab   :  { %v7485_v55 = vcombine.low %v7477_v52, %v7484_v18 }
 0x2ad   :  { %v7493_v16 = vmul.f32 0.020408163, %v7485_v55 }
 0x2af   :  { %7494 = vst [vmem:[#allocation3] sm:$0xff] %v7493_v16 }
 0x2b0   :  { %7529 = shalt.err (!%p7526_p4)
}
 0x2b1   :  { %7504 = dma.vmem_to_hbm [thread:$0]  %s7502_s30, 128, %s10974_s1, [#allocation4]  }
 0x2b2   :  { %7538 = dma.done.wait [#allocation4], 128  }
 0x2b3   :  { %7539 = vsyncadd [#allocation4], 4294967168 }
 0x2b4   :  { %7508 = vsyncpa [#allocation4], 1 }

</bundles_post_ra>
